<compile_context>
chip_gen: v7x
topology: tpu7x:2x2x1
jax: 0.10.0
libtpu: 0.0.40
codegen_flags: <defaults>
</compile_context>

<pallas_src>
import jax
import jax.numpy as jnp
from jax import lax
from jax.experimental import pallas as pl
from jax.experimental.pallas import tpu as pltpu

H = W = 20
CIN = 3
COUT = 32
KH = KW = 3
PH, PW = H // 2, W // 2          # 10, 10
FLAT = COUT * PH * PW            # 3200
HID = 10
KDIM = KH * KW * CIN             # 27 im2col features
KPAD = 32                        # per-tap feature dim (27 feats + 1 bias + 4 zero)
LANES = 4 * KPAD                 # 128: four 2x2-pool taps packed into lanes


def _round_up(a, m):
    return ((a + m - 1) // m) * m


# ---------------------------------------------------------------------------
# Kernel A: conv (im2col GEMM) + ReLU + 2x2 avg pool, lane-packed.
#   patches_ref: (bq, 128) bf16   lane = tap*32 + k, row = b*100 + q
#   wbig_ref:    (128, 128) bf16  block-diagonal, bias row + 0.25 pre-folded
#   pmat_ref:    (128, 32) bf16   tap-sum ("pool") matrix of ones
#   o_ref:       (bq, 32) bf16    pooled activations (f32 accumulation inside)
# ---------------------------------------------------------------------------
def conv_pool_kernel(patches_ref, wbig_ref, pmat_ref, o_ref):
    # One 128-wide MXU pass: column group t = 0.25 * (conv_tap_t + bias).
    y = jnp.dot(patches_ref[...], wbig_ref[...],
                preferred_element_type=jnp.float32)
    y = jnp.maximum(y, 0.0)                       # ReLU per tap (before pooling)
    # Average pool = sum of the 4 ReLU'd lane groups (0.25 already folded in),
    # done on the otherwise idle MXU so the VPU/XLU stay free.
    o_ref[...] = jnp.dot(y.astype(jnp.bfloat16), pmat_ref[...],
                         preferred_element_type=jnp.float32).astype(o_ref.dtype)


# ---------------------------------------------------------------------------
# Kernel B: Linear(3200,10) + ReLU + Linear(10,1), one batch tile per step.
# w1 arrives already refolded to the pooled (q, c) flatten layout (bf16).
# ---------------------------------------------------------------------------
def mlp_kernel(x_ref, w1_ref, b1_ref, w2_ref, b2_ref, o_ref):
    h = jnp.dot(x_ref[...], w1_ref[...], preferred_element_type=jnp.float32)
    h = jnp.maximum(h + b1_ref[...], 0.0)
    o_ref[...] = (jnp.dot(h, w2_ref[...], preferred_element_type=jnp.float32)
                  + b2_ref[...])


def laser_detector_forward(x_nchw, params, batch_tile=64):
    wc, bc, w1, b1, w2, b2 = (params[k] for k in ("wc", "bc", "w1", "b1", "w2", "b2"))
    n = x_nchw.shape[0]

    # ---- batch tile selection ------------------------------------------------
    # bt multiple of 16 (bf16 (16,128) sublane tile; bq = bt*100 stays aligned).
    # Small batches are padded so the grid has >= 2 steps, letting the
    # "parallel" axis shard across v7x's two TensorCores.
    bt = max(16, (batch_tile // 16) * 16)
    n16 = _round_up(max(n, 1), 16)
    if n16 <= bt:
        bt = max(16, ((n16 // 2) // 16) * 16)
    n_pad = _round_up(max(n16, 2 * bt), bt)
    bq = bt * PH * PW                                              # rows per tile

    # ---- host glue: NCHW -> bf16 NHWC, halo pad, lane-packed im2col ----------
    # Row order (b, q=ph*10+pw); lane order tap*32 + feature, feature 27 == 1.0
    # (bias lane), features 28..31 == 0.
    x_p = jnp.pad(x_nchw, ((0, n_pad - n), (0, 0), (0, 0), (0, 0)))
    x_nhwc = jnp.transpose(x_p, (0, 2, 3, 1)).astype(jnp.bfloat16)   # (N,20,20,3)
    x_halo = jnp.pad(x_nhwc, ((0, 0), (1, 1), (1, 1), (0, 0)))       # (N,22,22,3)
    feats = [x_halo[:, dy:dy + H, dx:dx + W, :] for dy in range(KH) for dx in range(KW)]
    feats.append(jnp.ones((n_pad, H, W, 1), jnp.bfloat16))           # bias lane 27
    feats.append(jnp.zeros((n_pad, H, W, KPAD - KDIM - 1), jnp.bfloat16))
    cols = jnp.concatenate(feats, axis=-1)                            # (N,20,20,32)
    # (n, 2*ph+py, 2*pw+px, k) -> (n, ph, pw, py, px, k) -> (N*100, 128)
    patches = cols.reshape(n_pad, PH, 2, PW, 2, KPAD)
    patches = patches.transpose(0, 1, 3, 2, 4, 5).reshape(n_pad * PH * PW, LANES)

    # ---- host weight prep (one-time in a real deployment) --------------------
    # conv weight (COUT,CIN,KH,KW) -> (27,32) in (dy,dx,c) tap order.
    wc_flat = jnp.transpose(wc, (2, 3, 1, 0)).reshape(KDIM, COUT)
    # Fold bias (row 27) and the 0.25 pooling scale into the per-tap block.
    wc_aug = jnp.concatenate(
        [0.25 * wc_flat,
         0.25 * bc.reshape(1, COUT),
         jnp.zeros((KPAD - KDIM - 1, COUT), wc.dtype)], axis=0)       # (32, 32)
    wbig = jnp.kron(jnp.eye(4, dtype=wc.dtype), wc_aug).astype(jnp.bfloat16)  # (128,128)
    pmat = jnp.tile(jnp.eye(COUT, dtype=jnp.float32), (4, 1)).astype(jnp.bfloat16)  # (128,32)
    # Refold w1 rows from PyTorch's NCHW flatten order (c*100+q) to the pooled
    # (q*32+c) order so the inter-kernel flatten is a free row-major reshape.
    w1_fold = (w1.reshape(COUT, PH * PW, HID).transpose(1, 0, 2)
               .reshape(FLAT, HID).astype(jnp.bfloat16))

    # ---- kernel A: conv + ReLU + avg-pool -------------------------------------
    pooled = pl.pallas_call(
        conv_pool_kernel,
        out_shape=jax.ShapeDtypeStruct((n_pad * PH * PW, COUT), jnp.bfloat16),
        grid=(n_pad // bt,),
        in_specs=[
            pl.BlockSpec((bq, LANES), lambda i: (i, 0)),
            pl.BlockSpec((LANES, LANES), lambda i: (0, 0)),
            pl.BlockSpec((LANES, COUT), lambda i: (0, 0)),
        ],
        out_specs=pl.BlockSpec((bq, COUT), lambda i: (i, 0)),
        compiler_params=pltpu.CompilerParams(
            dimension_semantics=("parallel",),
            vmem_limit_bytes=48 * 1024 * 1024),
    )(patches, wbig, pmat)                                          # (N*100, 32) bf16

    # Free bitcast: (N*100, 32) row-major == (N, 3200) row-major (w1 refolded).
    flat = pooled.reshape(n_pad, FLAT)

    # ---- kernel B: Linear(3200,10) + ReLU + Linear(10,1) ----------------------
    # TODO(synk): fusing the MLP into kernel A would need a q-batched (100x)
    # tiny-matmul contraction that is MXU-latency-bound; kept as a second kernel.
    out = pl.pallas_call(
        mlp_kernel,
        out_shape=jax.ShapeDtypeStruct((n_pad, 1), jnp.float32),
        grid=(n_pad // bt,),
        in_specs=[
            pl.BlockSpec((bt, FLAT), lambda i: (i, 0)),
            pl.BlockSpec((FLAT, HID), lambda i: (0, 0)),
            pl.BlockSpec((1, HID), lambda i: (0, 0)),
            pl.BlockSpec((HID, 1), lambda i: (0, 0)),
            pl.BlockSpec((1, 1), lambda i: (0, 0)),
        ],
        out_specs=pl.BlockSpec((bt, 1), lambda i: (i, 0)),
        compiler_params=pltpu.CompilerParams(
            dimension_semantics=("parallel",),
            vmem_limit_bytes=32 * 1024 * 1024),
    )(flat, w1_fold, b1.reshape(1, HID), w2, b2.reshape(1, 1))
    return out[:n]


# ---------------------------------------------------------------------------
# Pure-JAX reference (mirrors the PyTorch forward in eval mode, full f32).
# ---------------------------------------------------------------------------
def reference_forward(x_nchw, params):
    wc, bc, w1, b1, w2, b2 = (params[k] for k in ("wc", "bc", "w1", "b1", "w2", "b2"))
    n = x_nchw.shape[0]
    y = lax.conv_general_dilated(
        x_nchw, wc, window_strides=(1, 1), padding=((1, 1), (1, 1)),
        dimension_numbers=("NCHW", "OIHW", "NCHW"),
        precision=lax.Precision.HIGHEST)
    y = jnp.maximum(y + bc.reshape(1, COUT, 1, 1), 0.0)
    y = y.reshape(n, COUT, PH, 2, PW, 2).mean(axis=(3, 5))          # AvgPool2d(2,2)
    flat = y.reshape(n, FLAT)                                       # Flatten (NCHW order)
    h = jnp.maximum(jnp.dot(flat, w1, precision=lax.Precision.HIGHEST) + b1, 0.0)
    return jnp.dot(h, w2, precision=lax.Precision.HIGHEST) + b2


if __name__ == "__main__":
    key = jax.random.PRNGKey(0)
    kx, kwc, kbc, kw1, kb1, kw2, kb2 = jax.random.split(key, 7)

    n = 2
    x = jax.random.normal(kx, (n, CIN, H, W), dtype=jnp.float32)

    # Deterministic synthetic parameters (shapes from the module's __init__).
    params = dict(
        wc=0.05 * jax.random.normal(kwc, (COUT, CIN, KH, KW), jnp.float32),
        bc=0.05 * jax.random.normal(kbc, (COUT,), jnp.float32),
        w1=0.02 * jax.random.normal(kw1, (FLAT, HID), jnp.float32),   # Linear1 (in, out)
        b1=0.05 * jax.random.normal(kb1, (HID,), jnp.float32),
        w2=0.10 * jax.random.normal(kw2, (HID, 1), jnp.float32),      # Linear2 (in, out)
        b2=0.05 * jax.random.normal(kb2, (1,), jnp.float32),
    )

    fwd = jax.jit(laser_detector_forward, static_argnames=("batch_tile",))
    out = fwd(x, params)
    out = jax.block_until_ready(out)

    ref = reference_forward(x, params)
    assert out.shape == (n, 1), out.shape
    # bf16 storage + single-pass MXU matmuls vs an f32 HIGHEST reference:
    # allow a few e-3 of accumulated rounding.
    assert jnp.allclose(out, ref, rtol=2e-2, atol=2e-2), (out, ref)

    print("KERNEL_OK")
</pallas_src>

<mosaic_0001>
module attributes {stable_mosaic.version = 11 : i64} {
  func.func @conv_pool_kernel(%arg0: i32, %arg1: memref<1600x128xbf16, #tpu.memory_space<vmem>>, %arg2: memref<128x128xbf16, #tpu.memory_space<vmem>>, %arg3: memref<128x32xbf16, #tpu.memory_space<vmem>>, %arg4: memref<1600x32xbf16, #tpu.memory_space<vmem>>) attributes {dimension_semantics = [#tpu.dimension_semantics<parallel>], iteration_bounds = array<i64: 2>, scalar_prefetch = 0 : i64, scratch_operands = 0 : i64, tpu.core_type = #tpu.core_type<tc>, window_params = [{transform_indices = @transform_0, window_bounds = array<i64: 1600, 128>}, {pipeline_mode = #tpu.pipeline_mode<synchronous>, transform_indices = @transform_1, window_bounds = array<i64: 128, 128>}, {pipeline_mode = #tpu.pipeline_mode<synchronous>, transform_indices = @transform_2, window_bounds = array<i64: 128, 32>}, {transform_indices = @transform_3, window_bounds = array<i64: 1600, 32>}]} {
    %c0 = arith.constant 0 : index
    %c0_0 = arith.constant 0 : index
    %0 = vector.load %arg1[%c0, %c0_0] : memref<1600x128xbf16, #tpu.memory_space<vmem>>, vector<1600x128xbf16>
    %c0_1 = arith.constant 0 : index
    %c0_2 = arith.constant 0 : index
    %1 = vector.load %arg2[%c0_1, %c0_2] : memref<128x128xbf16, #tpu.memory_space<vmem>>, vector<128x128xbf16>
    %cst = arith.constant dense<0.000000e+00> : vector<1600x128xf32>
    %2 = tpu.matmul %0, %1, %cst {dimension_numbers = #tpu.dot_dimension_numbers<[1], [0], [0], [1], [0, 0, 1, 1], [], []>} : vector<1600x128xbf16>, vector<128x128xbf16>, vector<1600x128xf32> -> vector<1600x128xf32>
    %cst_3 = arith.constant 0.000000e+00 : f32
    %3 = vector.broadcast %cst_3 : f32 to vector<1600x128xf32>
    %4 = arith.maximumf %2, %3 : vector<1600x128xf32>
    %5 = arith.truncf %4 : vector<1600x128xf32> to vector<1600x128xbf16>
    %c0_4 = arith.constant 0 : index
    %c0_5 = arith.constant 0 : index
    %6 = vector.load %arg3[%c0_4, %c0_5] : memref<128x32xbf16, #tpu.memory_space<vmem>>, vector<128x32xbf16>
    %cst_6 = arith.constant dense<0.000000e+00> : vector<1600x32xf32>
    %7 = tpu.matmul %5, %6, %cst_6 {dimension_numbers = #tpu.dot_dimension_numbers<[1], [0], [0], [1], [0, 0, 1, 1], [], []>} : vector<1600x128xbf16>, vector<128x32xbf16>, vector<1600x32xf32> -> vector<1600x32xf32>
    %8 = arith.truncf %7 : vector<1600x32xf32> to vector<1600x32xbf16>
    %c0_7 = arith.constant 0 : index
    %c0_8 = arith.constant 0 : index
    %9 = vector.load %arg4[%c0_7, %c0_8] : memref<1600x32xbf16, #tpu.memory_space<vmem>>, vector<1600x32xbf16>
    tpu.vector_store %arg4[%c0_7, %c0_8], %8 {strides = array<i32>} : memref<1600x32xbf16, #tpu.memory_space<vmem>>, vector<1600x32xbf16>,
    return
  }
  func.func @transform_0(%arg0: i32) -> (i32, i32) {
    %c0_i32 = arith.constant 0 : i32
    %c0_i32_0 = arith.constant 0 : i32
    return %arg0, %c0_i32 : i32, i32
  }
  func.func @transform_1(%arg0: i32) -> (i32, i32) {
    %c0_i32 = arith.constant 0 : i32
    %c0_i32_0 = arith.constant 0 : i32
    %c0_i32_1 = arith.constant 0 : i32
    return %c0_i32, %c0_i32_0 : i32, i32
  }
  func.func @transform_2(%arg0: i32) -> (i32, i32) {
    %c0_i32 = arith.constant 0 : i32
    %c0_i32_0 = arith.constant 0 : i32
    %c0_i32_1 = arith.constant 0 : i32
    return %c0_i32, %c0_i32_0 : i32, i32
  }
  func.func @transform_3(%arg0: i32) -> (i32, i32) {
    %c0_i32 = arith.constant 0 : i32
    %c0_i32_0 = arith.constant 0 : i32
    return %arg0, %c0_i32 : i32, i32
  }
}

module attributes {stable_mosaic.version = 11 : i64} {
  func.func @mlp_kernel(%arg0: i32, %arg1: memref<16x3200xbf16, #tpu.memory_space<vmem>>, %arg2: memref<3200x10xbf16, #tpu.memory_space<vmem>>, %arg3: memref<1x10xf32, #tpu.memory_space<vmem>>, %arg4: memref<10x1xf32, #tpu.memory_space<vmem>>, %arg5: memref<1x1xf32, #tpu.memory_space<vmem>>, %arg6: memref<16x1xf32, #tpu.memory_space<vmem>>) attributes {dimension_semantics = [#tpu.dimension_semantics<parallel>], iteration_bounds = array<i64: 2>, scalar_prefetch = 0 : i64, scratch_operands = 0 : i64, tpu.core_type = #tpu.core_type<tc>, window_params = [{transform_indices = @transform_0, window_bounds = array<i64: 16, 3200>}, {pipeline_mode = #tpu.pipeline_mode<synchronous>, transform_indices = @transform_1, window_bounds = array<i64: 3200, 10>}, {pipeline_mode = #tpu.pipeline_mode<synchronous>, transform_indices = @transform_2, window_bounds = array<i64: 1, 10>}, {pipeline_mode = #tpu.pipeline_mode<synchronous>, transform_indices = @transform_3, window_bounds = array<i64: 10, 1>}, {pipeline_mode = #tpu.pipeline_mode<synchronous>, transform_indices = @transform_4, window_bounds = array<i64: 1, 1>}, {transform_indices = @transform_5, window_bounds = array<i64: 16, 1>}]} {
    %c0 = arith.constant 0 : index
    %c0_0 = arith.constant 0 : index
    %0 = vector.load %arg1[%c0, %c0_0] : memref<16x3200xbf16, #tpu.memory_space<vmem>>, vector<16x3200xbf16>
    %c0_1 = arith.constant 0 : index
    %c0_2 = arith.constant 0 : index
    %1 = vector.load %arg2[%c0_1, %c0_2] : memref<3200x10xbf16, #tpu.memory_space<vmem>>, vector<3200x10xbf16>
    %cst = arith.constant dense<0.000000e+00> : vector<16x10xf32>
    %2 = tpu.matmul %0, %1, %cst {dimension_numbers = #tpu.dot_dimension_numbers<[1], [0], [0], [1], [0, 0, 1, 1], [], []>} : vector<16x3200xbf16>, vector<3200x10xbf16>, vector<16x10xf32> -> vector<16x10xf32>
    %c0_3 = arith.constant 0 : index
    %c0_4 = arith.constant 0 : index
    %3 = vector.load %arg3[%c0_3, %c0_4] : memref<1x10xf32, #tpu.memory_space<vmem>>, vector<1x10xf32>
    %4 = vector.broadcast %3 : vector<1x10xf32> to vector<16x10xf32>
    %5 = arith.addf %2, %4 : vector<16x10xf32>
    %cst_5 = arith.constant 0.000000e+00 : f32
    %6 = vector.broadcast %cst_5 : f32 to vector<16x10xf32>
    %7 = arith.maximumf %5, %6 : vector<16x10xf32>
    %c0_6 = arith.constant 0 : index
    %c0_7 = arith.constant 0 : index
    %8 = vector.load %arg4[%c0_6, %c0_7] : memref<10x1xf32, #tpu.memory_space<vmem>>, vector<10x1xf32>
    %cst_8 = arith.constant dense<0.000000e+00> : vector<16x1xf32>
    %9 = tpu.matmul %7, %8, %cst_8 {dimension_numbers = #tpu.dot_dimension_numbers<[1], [0], [0], [1], [0, 0, 1, 1], [], []>} : vector<16x10xf32>, vector<10x1xf32>, vector<16x1xf32> -> vector<16x1xf32>
    %c0_9 = arith.constant 0 : index
    %c0_10 = arith.constant 0 : index
    %10 = vector.load %arg5[%c0_9, %c0_10] : memref<1x1xf32, #tpu.memory_space<vmem>>, vector<1x1xf32>
    %11 = vector.broadcast %10 : vector<1x1xf32> to vector<16x1xf32>
    %12 = arith.addf %9, %11 : vector<16x1xf32>
    %c0_11 = arith.constant 0 : index
    %c0_12 = arith.constant 0 : index
    %13 = vector.load %arg6[%c0_11, %c0_12] : memref<16x1xf32, #tpu.memory_space<vmem>>, vector<16x1xf32>
    tpu.vector_store %arg6[%c0_11, %c0_12], %12 {strides = array<i32>} : memref<16x1xf32, #tpu.memory_space<vmem>>, vector<16x1xf32>,
    return
  }
  func.func @transform_0(%arg0: i32) -> (i32, i32) {
    %c0_i32 = arith.constant 0 : i32
    %c0_i32_0 = arith.constant 0 : i32
    return %arg0, %c0_i32 : i32, i32
  }
  func.func @transform_1(%arg0: i32) -> (i32, i32) {
    %c0_i32 = arith.constant 0 : i32
    %c0_i32_0 = arith.constant 0 : i32
    %c0_i32_1 = arith.constant 0 : i32
    return %c0_i32, %c0_i32_0 : i32, i32
  }
  func.func @transform_2(%arg0: i32) -> (i32, i32) {
    %c0_i32 = arith.constant 0 : i32
    %c0_i32_0 = arith.constant 0 : i32
    %c0_i32_1 = arith.constant 0 : i32
    return %c0_i32, %c0_i32_0 : i32, i32
  }
  func.func @transform_3(%arg0: i32) -> (i32, i32) {
    %c0_i32 = arith.constant 0 : i32
    %c0_i32_0 = arith.constant 0 : i32
    %c0_i32_1 = arith.constant 0 : i32
    return %c0_i32, %c0_i32_0 : i32, i32
  }
  func.func @transform_4(%arg0: i32) -> (i32, i32) {
    %c0_i32 = arith.constant 0 : i32
    %c0_i32_0 = arith.constant 0 : i32
    %c0_i32_1 = arith.constant 0 : i32
    return %c0_i32, %c0_i32_0 : i32, i32
  }
  func.func @transform_5(%arg0: i32) -> (i32, i32) {
    %c0_i32 = arith.constant 0 : i32
    %c0_i32_0 = arith.constant 0 : i32
    return %arg0, %c0_i32 : i32, i32
  }
}

</mosaic_0001>

<bundles_post_ra>
// kernel: laser_detector_forward.2
= control target key start
LH: loop header
LB: loop body
LE: loop exit
PB: predicated region body
PF: predicated region fallthrough
CT: control target
= control target key end

     0   :  { %s5451_s12 = smov 0   ;;  %s6027_s0 = inlined_call_operand.vmem [shape: bf16[3200,128], index: 0, kind: input, shape index: {}]   ;;  %s6028_s1 = inlined_call_operand.vmem [shape: bf16[128,128], index: 1, kind: input, shape index: {}]   ;;  %s6029_s2 = inlined_call_operand.vmem [shape: bf16[128,32], index: 2, kind: input, shape index: {}]   ;;  %s6030_s3 = inlined_call_operand.vmem [shape: bf16[3200,32], index: 3, kind: output, shape index: {}]  }
   0x1 LB: > { %s4126_s13 = sadd.s32 4294967295, %s5429_s12   ;;  %p4130_p0 = scmp.ge.s32.totalorder %s5429_s12, 1  ;;  %s5429_s12 = sphi %s5451_s12, %s13_s12  }
   0x2   : > { %p138_p1 = scmp.lt.s32.totalorder %s5429_s12, 3 }
   0x4   : > { %p139_p2 = pnand %p4130_p0, %p138_p1 }
   0x5   : > { %v5307_v0 = vld [vmem:[%s6028_s1] sm:$0xff] (!%p139_p2)   ;;  %s162_s16 = smul.u32 (!%p139_p2), 200, %s4126_s13  ;;  %v5308_v1 = vld [vmem:[%s6028_s1 + $0x8] sm:$0xff] (!%p139_p2)   ;;  %v5309_v2 = vld [vmem:[%s6028_s1 + $0x10] sm:$0xff] (!%p139_p2)   ;;  %vm3869_vm0 = vcmask (!%p139_p2), 257024  }
   0x6   : > { %142 = sbr.rel (%p139_p2) target bundleno = 868 (0x364), region = 32  ;;  %4867 = vmatprep.subr.bf16.mxu0 (!%p139_p2), %v5307_v0  ;;  %v5310_v3 = vld [vmem:[%s6028_s1 + $0x18] sm:$0xff] (!%p139_p2)   ;;  %v5311_v5 = vld [vmem:[%s6028_s1 + $0x20] sm:$0xff] (!%p139_p2)   ;;  %v5312_v6 = vld [vmem:[%s6028_s1 + $0x28] sm:$0xff] (!%p139_p2)  }
   0x7   : > { %p163_p3 = scmp.lt.s32.totalorder (!%p139_p2), %s162_s16, 399  ;;  %4868 = vmatpush3.bf16.msra.mxu0 (!%p139_p2), %v5307_v0  ;;  %v5313_v7 = vld [vmem:[%s6028_s1 + $0x30] sm:$0xff] (!%p139_p2)   ;;  %v5314_v8 = vld [vmem:[%s6028_s1 + $0x38] sm:$0xff] (!%p139_p2)   ;;  %v5363_v25 = vld [vmem:[%s6029_s2] sm:$0xff] (!%p139_p2)  }
   0x8   : > { %4869 = vmatprep.subr.bf16.mxu0 (!%p139_p2), %v5308_v1  ;;  %5083 = vmatprep.subr.bf16.mxu1 (!%p139_p2), %v5363_v25  ;;  %v5366_v28 = vld [vmem:[%s6029_s2 + $0x8] sm:$0xff] (!%p139_p2)   ;;  %v5367_v29 = vld [vmem:[%s6029_s2 + $0x10] sm:$0xff] (!%p139_p2)   ;;  %v5370_v32 = vld [vmem:[%s6029_s2 + $0x18] sm:$0xff] (!%p139_p2)  }
   0x9   : > { %5084 = vmatpush3.bf16.msra.mxu1 (!%p139_p2), %v5363_v25  ;;  %v5371_v33 = vld [vmem:[%s6029_s2 + $0x20] sm:$0xff] (!%p139_p2)   ;;  %v5374_v36 = vld [vmem:[%s6029_s2 + $0x28] sm:$0xff] (!%p139_p2)   ;;  %v5375_v37 = vld [vmem:[%s6029_s2 + $0x30] sm:$0xff] (!%p139_p2)  }
   0xa   : > { %5085 = vmatprep.subr.bf16.mxu1 (!%p139_p2), %v5366_v28  ;;  %v5378_v40 = vld [vmem:[%s6029_s2 + $0x38] sm:$0xff] (!%p139_p2)  }
   0xb   : > { %4870 = vmatpush3.bf16.msra.mxu0 (!%p139_p2), %v5308_v1 }
   0xc   : > { %4871 = vmatprep.subr.bf16.mxu0 (!%p139_p2), %v5309_v2 }
   0xd   : > { %s6032_s16 = smov (!%p163_p3, %s162_s16), 399  ;;  %5086 = vmatpush3.bf16.msra.mxu1 %v5366_v28 }
   0xe   : > { %s4131_s21 = sshll.u32 %s6032_s16, 2  ;;  %5087 = vmatprep.subr.bf16.mxu1 %v5367_v29 }
   0xf   : > { %s5479_s26 = scalar_lea.vmem %s6027_s0, %s4131_s21  ;;  %4872 = vmatpush3.bf16.msra.mxu0 %v5309_v2  ;;  %s5622_s29 = scalar_lea.vmem %s6030_s3, %s4131_s21 }
  0x10   : > { %v5315_v4 = vld [vmem:[%s5479_s26] sm:$0xff]   ;;  %4873 = vmatprep.subr.bf16.mxu0 %v5310_v3  ;;  %v5316_v9 = vld [vmem:[%s5479_s26 + $0x8] sm:$0xff]   ;;  %v5317_v10 = vld [vmem:[%s5479_s26 + $0x10] sm:$0xff]  }
  0x11   : > { %4883 = vmatprep.mubr.bf16.mxu0 %v5315_v4  ;;  %v5318_v11 = vld [vmem:[%s5479_s26 + $0x18] sm:$0xff]   ;;  %v5319_v12 = vld [vmem:[%s5479_s26 + $0x20] sm:$0xff]   ;;  %v5320_v13 = vld [vmem:[%s5479_s26 + $0x28] sm:$0xff]   ;;  %5088 = vmatpush3.bf16.msra.mxu1 %v5367_v29 }
  0x12   : > { %v5321_v14 = vld [vmem:[%s5479_s26 + $0x30] sm:$0xff]   ;;  %v5322_v15 = vld [vmem:[%s5479_s26 + $0x38] sm:$0xff]   ;;  %v5323_v16 = vld [vmem:[%s5479_s26 + $0x40] sm:$0xff]   ;;  %5089 = vmatprep.subr.bf16.mxu1 %v5370_v32 }
  0x13   : > { %4874 = vmatpush3.bf16.msra.mxu0 %v5310_v3  ;;  %v5324_v17 = vld [vmem:[%s5479_s26 + $0x48] sm:$0xff]   ;;  %v5325_v18 = vld [vmem:[%s5479_s26 + $0x50] sm:$0xff]   ;;  %v5326_v19 = vld [vmem:[%s5479_s26 + $0x58] sm:$0xff]  }
  0x14   : > { %4875 = vmatprep.subr.bf16.mxu0 %v5311_v5  ;;  %v5327_v20 = vld [vmem:[%s5479_s26 + $0x60] sm:$0xff]   ;;  %v5328_v21 = vld [vmem:[%s5479_s26 + $0x68] sm:$0xff]   ;;  %v5329_v22 = vld [vmem:[%s5479_s26 + $0x70] sm:$0xff]  }
  0x15   : > { %v5330_v23 = vld [vmem:[%s5479_s26 + $0x78] sm:$0xff]   ;;  %v5331_v24 = vld [vmem:[%s5479_s26 + $0x80] sm:$0xff]   ;;  %v5332_v26 = vld [vmem:[%s5479_s26 + $0x88] sm:$0xff]   ;;  %5090 = vmatpush3.bf16.msra.mxu1 %v5370_v32 }
  0x16   : > { %v5333_v27 = vld [vmem:[%s5479_s26 + $0x90] sm:$0xff]   ;;  %v5334_v30 = vld [vmem:[%s5479_s26 + $0x98] sm:$0xff]   ;;  %v5335_v31 = vld [vmem:[%s5479_s26 + $0xa0] sm:$0xff]   ;;  %5091 = vmatprep.subr.bf16.mxu1 %v5371_v33 }
  0x17   : > { %4876 = vmatpush3.bf16.msra.mxu0 %v5311_v5  ;;  %v5336_v34 = vld [vmem:[%s5479_s26 + $0xa8] sm:$0xff]   ;;  %v5337_v35 = vld [vmem:[%s5479_s26 + $0xb0] sm:$0xff]   ;;  %v5338_v38 = vld [vmem:[%s5479_s26 + $0xb8] sm:$0xff]  }
  0x18   : > { %4877 = vmatprep.subr.bf16.mxu0 %v5312_v6  ;;  %v5339_v39 = vld [vmem:[%s5479_s26 + $0xc0] sm:$0xff]   ;;  %v5340_v41 = vld [vmem:[%s5479_s26 + $0xc8] sm:$0xff]   ;;  %v5341_v42 = vld [vmem:[%s5479_s26 + $0xd0] sm:$0xff]  }
  0x19   : > { %5092 = vmatpush3.bf16.msra.mxu1 %v5371_v33  ;;  %v5342_v43 = vld [vmem:[%s5479_s26 + $0xd8] sm:$0xff]   ;;  %v5343_v44 = vld [vmem:[%s5479_s26 + $0xe0] sm:$0xff]   ;;  %v5344_v45 = vld [vmem:[%s5479_s26 + $0xe8] sm:$0xff]  }
  0x1a   : > { %5093 = vmatprep.subr.bf16.mxu1 %v5374_v36  ;;  %v5345_v46 = vld [vmem:[%s5479_s26 + $0xf0] sm:$0xff]   ;;  %v5346_v47 = vld [vmem:[%s5479_s26 + $0xf8] sm:$0xff]   ;;  %v5347_v48 = vld [vmem:[%s5479_s26 + $0x100] sm:$0xff]  }
  0x1b   : > { %4878 = vmatpush3.bf16.msra.mxu0 %v5312_v6  ;;  %v5348_v49 = vld [vmem:[%s5479_s26 + $0x108] sm:$0xff]   ;;  %v5349_v50 = vld [vmem:[%s5479_s26 + $0x110] sm:$0xff]   ;;  %v5350_v51 = vld [vmem:[%s5479_s26 + $0x118] sm:$0xff]  }
  0x1c   : > { %4879 = vmatprep.subr.bf16.mxu0 %v5313_v7  ;;  %v5351_v52 = vld [vmem:[%s5479_s26 + $0x120] sm:$0xff]   ;;  %v5352_v53 = vld [vmem:[%s5479_s26 + $0x128] sm:$0xff]   ;;  %v5353_v54 = vld [vmem:[%s5479_s26 + $0x130] sm:$0xff]  }
  0x1d   : > { %5094 = vmatpush3.bf16.msra.mxu1 %v5374_v36  ;;  %v5354_v55 = vld [vmem:[%s5479_s26 + $0x138] sm:$0xff]   ;;  %v5355_v56 = vld [vmem:[%s5479_s26 + $0x140] sm:$0xff]   ;;  %v5356_v57 = vld [vmem:[%s5479_s26 + $0x148] sm:$0xff]  }
  0x1e   : > { %5095 = vmatprep.subr.bf16.mxu1 %v5375_v37  ;;  %v5357_v58 = vld [vmem:[%s5479_s26 + $0x150] sm:$0xff]   ;;  %v5358_v59 = vld [vmem:[%s5479_s26 + $0x158] sm:$0xff]   ;;  %v5359_v60 = vld [vmem:[%s5479_s26 + $0x160] sm:$0xff]  }
  0x1f   : > { %4880 = vmatpush3.bf16.msra.mxu0 %v5313_v7  ;;  %v5360_v61 = vld [vmem:[%s5479_s26 + $0x168] sm:$0xff]   ;;  %v5361_v62 = vld [vmem:[%s5479_s26 + $0x170] sm:$0xff]   ;;  %v5362_v63 = vld [vmem:[%s5479_s26 + $0x178] sm:$0xff]  }
  0x20   : > { %4881 = vmatprep.subr.bf16.mxu0 %v5314_v8  ;;  %v5364_v0 = vld [vmem:[%s5479_s26 + $0x180] sm:$0xff]   ;;  %v5365_v1 = vld [vmem:[%s5479_s26 + $0x188] sm:$0xff]   ;;  %v5368_v2 = vld [vmem:[%s5479_s26 + $0x190] sm:$0xff]  }
  0x21   : > { %5096 = vmatpush3.bf16.msra.mxu1 %v5375_v37  ;;  %v5369_v3 = vld [vmem:[%s5479_s26 + $0x198] sm:$0xff]   ;;  %v5372_v4 = vld [vmem:[%s5479_s26 + $0x1a0] sm:$0xff]   ;;  %v5373_v5 = vld [vmem:[%s5479_s26 + $0x1a8] sm:$0xff]  }
  0x22   : > { %5097 = vmatprep.subr.bf16.mxu1 %v5378_v40  ;;  %v5376_v6 = vld [vmem:[%s5479_s26 + $0x1b0] sm:$0xff]   ;;  %v5382_v33 = vld [vmem:[%s5479_s26 + $0x1d8] sm:$0xff]  }
  0x23   : > { %4882 = vmatpush3.bf16.msra.mxu0 %v5314_v8 }
  0x25   : > { %5098 = vmatpush3.bf16.msra.mxu1 %v5378_v40 }
  0x26   : > { %4884 = vmatmul.mubr.bf16.vlgmr.msra.gmra.mrb[0].mxu0 %v5316_v9  ;;  %v5377_v9 = vld [vmem:[%s5479_s26 + $0x1b8] sm:$0xff]  }
  0x27   : > { %4887 = vmatprep.mubr.bf16.mxu0 %v5317_v10 }
  0x2e   : > { %4888 = vmatmul.mubr.bf16.gmra.mrb[4].mxu0 %v5318_v11  ;;  %v5379_v11 = vld [vmem:[%s5479_s26 + $0x1c0] sm:$0xff]  }
  0x2f   : > { %4891 = vmatprep.mubr.bf16.mxu0 %v5319_v12 }
  0x36   : > { %4892 = vmatmul.mubr.bf16.gmra.mrb[8].mxu0 %v5320_v13 }
  0x37   : > { %4895 = vmatprep.mubr.bf16.mxu0 %v5321_v14 }
  0x3e   : > { %4896 = vmatmul.mubr.bf16.gmra.mrb[12].mxu0 %v5322_v15 }
  0x3f   : > { %4899 = vmatprep.mubr.bf16.mxu0 %v5323_v16 }
  0x46   : > { %4900 = vmatmul.mubr.bf16.gmra.mrb[16].mxu0 %v5324_v17 }
  0x47   : > { %4903 = vmatprep.mubr.bf16.mxu0 %v5325_v18 }
  0x4e   : > { %4904 = vmatmul.mubr.bf16.gmra.mrb[20].mxu0 %v5326_v19 }
  0x4f   : > { %4907 = vmatprep.mubr.bf16.mxu0 %v5327_v20 }
  0x56   : > { %4908 = vmatmul.mubr.bf16.gmra.mrb[24].mxu0 %v5328_v21  ;;  %v5380_v21 = vld [vmem:[%s5479_s26 + $0x1c8] sm:$0xff]  }
  0x57   : > { %4911 = vmatprep.mubr.bf16.mxu0 %v5329_v22 }
  0x5e   : > { %4912 = vmatmul.mubr.bf16.gmra.mrb[28].mxu0 %v5330_v23  ;;  %v5381_v23 = vld [vmem:[%s5479_s26 + $0x1d0] sm:$0xff]  }
  0x5f   : > { %4915 = vmatprep.mubr.bf16.mxu0 %v5331_v24 }
  0x66   : > { %4916 = vmatmul.mubr.bf16.gmra.mrb[32].mxu0 %v5332_v26 }
  0x67   : > { %4919 = vmatprep.mubr.bf16.mxu0 %v5333_v27 }
  0x6e   : > { %4920 = vmatmul.mubr.bf16.gmra.mrb[36].mxu0 %v5334_v30 }
  0x6f   : > { %4923 = vmatprep.mubr.bf16.mxu0 %v5335_v31 }
  0x76   : > { %4924 = vmatmul.mubr.bf16.gmra.mrb[40].mxu0 %v5336_v34 }
  0x77   : > { %4927 = vmatprep.mubr.bf16.mxu0 %v5337_v35  ;;  %v5383_v35 = vld [vmem:[%s5479_s26 + $0x1e0] sm:$0xff]  }
  0x7e   : > { %4928 = vmatmul.mubr.bf16.gmra.mrb[44].mxu0 %v5338_v38 }
  0x7f   : > { %4931 = vmatprep.mubr.bf16.mxu0 %v5339_v39 }
  0x86   : > { %4932 = vmatmul.mubr.bf16.gmra.mrb[48].mxu0 %v5340_v41 }
  0x87   : > { %4935 = vmatprep.mubr.bf16.mxu0 %v5341_v42 }
  0x8e   : > { %4936 = vmatmul.mubr.bf16.gmra.mrb[52].mxu0 %v5342_v43 }
  0x8f   : > { %4939 = vmatprep.mubr.bf16.mxu0 %v5343_v44 }
  0x96   : > { %4940 = vmatmul.mubr.bf16.gmra.mrb[56].mxu0 %v5344_v45  ;;  %v5384_v45 = vld [vmem:[%s5479_s26 + $0x1e8] sm:$0xff]  }
  0x97   : > { %4943 = vmatprep.mubr.bf16.mxu0 %v5345_v46 }
  0x9e   : > { %4944 = vmatmul.mubr.bf16.gmra.mrb[60].mxu0 %v5346_v47  ;;  %v5385_v47 = vld [vmem:[%s5479_s26 + $0x1f0] sm:$0xff]  }
  0x9f   : > { %4947 = vmatprep.mubr.bf16.mxu0 %v5347_v48 }
  0xa6   : > { %4948 = vmatmul.mubr.bf16.gmra.mrb[64].mxu0 %v5348_v49 }
  0xa7   : > { %4951 = vmatprep.mubr.bf16.mxu0 %v5349_v50 }
  0xae   : > { %4952 = vmatmul.mubr.bf16.gmra.mrb[68].mxu0 %v5350_v51 }
  0xaf   : > { %4955 = vmatprep.mubr.bf16.mxu0 %v5351_v52 }
  0xb6   : > { %4956 = vmatmul.mubr.bf16.gmra.mrb[72].mxu0 %v5352_v53 }
  0xb7   : > { %4959 = vmatprep.mubr.bf16.mxu0 %v5353_v54 }
  0xbe   : > { %4960 = vmatmul.mubr.bf16.gmra.mrb[76].mxu0 %v5354_v55 }
  0xbf   : > { %4963 = vmatprep.mubr.bf16.mxu0 %v5355_v56 }
  0xc6   : > { %4964 = vmatmul.mubr.bf16.gmra.mrb[80].mxu0 %v5356_v57  ;;  %v5386_v57 = vld [vmem:[%s5479_s26 + $0x1f8] sm:$0xff]  }
  0xc7   : > { %4967 = vmatprep.mubr.bf16.mxu0 %v5357_v58 }
  0xce   : > { %4968 = vmatmul.mubr.bf16.gmra.mrb[84].mxu0 %v5358_v59  ;;  %v5387_v59 = vld [vmem:[%s5479_s26 + $0x200] sm:$0xff]  }
  0xcf   : > { %4971 = vmatprep.mubr.bf16.mxu0 %v5359_v60 }
  0xd6   : > { %4972 = vmatmul.mubr.bf16.gmra.mrb[88].mxu0 %v5360_v61 }
  0xd7   : > { %4975 = vmatprep.mubr.bf16.mxu0 %v5361_v62 }
  0xde   : > { %4976 = vmatmul.mubr.bf16.gmra.mrb[92].mxu0 %v5362_v63 }
  0xdf   : > { %4979 = vmatprep.mubr.bf16.mxu0 %v5364_v0 }
  0xe6   : > { %4980 = vmatmul.mubr.bf16.gmra.mrb[96].mxu0 %v5365_v1 }
  0xe7   : > { %4983 = vmatprep.mubr.bf16.mxu0 %v5368_v2 }
  0xee   : > { %4984 = vmatmul.mubr.bf16.gmra.mrb[100].mxu0 %v5369_v3 }
  0xef   : > { %4987 = vmatprep.mubr.bf16.mxu0 %v5372_v4 }
  0xf6   : > { %4988 = vmatmul.mubr.bf16.gmra.mrb[104].mxu0 %v5373_v5  ;;  %v5388_v5 = vld [vmem:[%s5479_s26 + $0x208] sm:$0xff]  }
  0xf7   : > { %4991 = vmatprep.mubr.bf16.mxu0 %v5376_v6 }
  0xf9   : > { %v4885_v7 = vpop.f32.mrb[0].mxu0 }
  0xfa   : > { %v1073_v8 = vpop.f32.mrb[1].mxu0  ;;  %v1874_v12 = vmax.f32 %v4885_v7, 0.0  ;;  %v5389_v7 = vld [vmem:[%s5479_s26 + $0x210] sm:$0xff]  }
  0xfb   : > { %v4886_v10 = vpop.f32.mrb[2].mxu0  ;;  %v1872_v15 = vmax.f32 %v1073_v8, 0.0 }
  0xfc   : > { %v1875_v13 = vmax.f32 %v4886_v10, 0.0  ;;  %v1076_v14 = vpop.f32.mrb[3].mxu0 }
  0xfd   : > { %v1873_v16 = vmax.f32 %v1076_v14, 0.0 }
  0xfe   : > { %v2073_v17 = vpack.c.bf16 %v1875_v13, %v1874_v12  ;;  %4992 = vmatmul.mubr.bf16.gmra.mrb[108].mxu0 %v5377_v9 }
  0xff   : > { %v2072_v18 = vpack.c.bf16 %v1873_v16, %v1872_v15  ;;  %4995 = vmatprep.mubr.bf16.mxu0 %v5379_v11 }
 0x101   : > { %v4889_v19 = vpop.f32.mrb[4].mxu0  ;;  %5099 = vmatprep.mubr.bf16.mxu1 %v2072_v18 }
 0x102   : > { %v1089_v20 = vpop.f32.mrb[5].mxu0  ;;  %5100 = vmatmul.mubr.bf16.vlgmr.msra.gmra.mrb[0].mxu1 %v2073_v17  ;;  %v1878_v24 = vmax.f32 %v4889_v19, 0.0  ;;  %v5390_v17 = vld [vmem:[%s5479_s26 + $0x218] sm:$0xff]   ;;  %v5391_v19 = vld [vmem:[%s5479_s26 + $0x220] sm:$0xff]  }
 0x103   : > { %v4890_v22 = vpop.f32.mrb[6].mxu0  ;;  %v1876_v27 = vmax.f32 %v1089_v20, 0.0 }
 0x104   : > { %v1879_v25 = vmax.f32 %v4890_v22, 0.0  ;;  %v1092_v26 = vpop.f32.mrb[7].mxu0 }
 0x105   : > { %v1877_v28 = vmax.f32 %v1092_v26, 0.0 }
 0x106   : > { %v2075_v29 = vpack.c.bf16 %v1879_v25, %v1878_v24  ;;  %4996 = vmatmul.mubr.bf16.gmra.mrb[112].mxu0 %v5380_v21 }
 0x107   : > { %v2074_v30 = vpack.c.bf16 %v1877_v28, %v1876_v27  ;;  %4999 = vmatprep.mubr.bf16.mxu0 %v5381_v23 }
 0x109   : > { %v4893_v31 = vpop.f32.mrb[8].mxu0  ;;  %5103 = vmatprep.mubr.bf16.mxu1 %v2074_v30 }
 0x10a   : > { %v1105_v32 = vpop.f32.mrb[9].mxu0  ;;  %5104 = vmatmul.mubr.bf16.gmra.mrb[4].mxu1 %v2075_v29  ;;  %v1882_v36 = vmax.f32 %v4893_v31, 0.0  ;;  %v5392_v29 = vld [vmem:[%s5479_s26 + $0x228] sm:$0xff]   ;;  %v5393_v31 = vld [vmem:[%s5479_s26 + $0x230] sm:$0xff]  }
 0x10b   : > { %v4894_v34 = vpop.f32.mrb[10].mxu0  ;;  %v1880_v39 = vmax.f32 %v1105_v32, 0.0 }
 0x10c   : > { %v1883_v37 = vmax.f32 %v4894_v34, 0.0  ;;  %v1108_v38 = vpop.f32.mrb[11].mxu0 }
 0x10d   : > { %v1881_v40 = vmax.f32 %v1108_v38, 0.0 }
 0x10e   : > { %v2077_v41 = vpack.c.bf16 %v1883_v37, %v1882_v36  ;;  %5000 = vmatmul.mubr.bf16.gmra.mrb[116].mxu0 %v5382_v33 }
 0x10f   : > { %v2076_v42 = vpack.c.bf16 %v1881_v40, %v1880_v39  ;;  %5003 = vmatprep.mubr.bf16.mxu0 %v5383_v35 }
 0x111   : > { %v4897_v43 = vpop.f32.mrb[12].mxu0  ;;  %5107 = vmatprep.mubr.bf16.mxu1 %v2076_v42 }
 0x112   : > { %v1121_v44 = vpop.f32.mrb[13].mxu0  ;;  %5108 = vmatmul.mubr.bf16.gmra.mrb[8].mxu1 %v2077_v41  ;;  %v1886_v48 = vmax.f32 %v4897_v43, 0.0  ;;  %v5394_v41 = vld [vmem:[%s5479_s26 + $0x238] sm:$0xff]   ;;  %v5395_v43 = vld [vmem:[%s5479_s26 + $0x240] sm:$0xff]  }
 0x113   : > { %v4898_v46 = vpop.f32.mrb[14].mxu0  ;;  %v1884_v51 = vmax.f32 %v1121_v44, 0.0 }
 0x114   : > { %v1887_v49 = vmax.f32 %v4898_v46, 0.0  ;;  %v1124_v50 = vpop.f32.mrb[15].mxu0 }
 0x115   : > { %v1885_v52 = vmax.f32 %v1124_v50, 0.0 }
 0x116   : > { %v2079_v53 = vpack.c.bf16 %v1887_v49, %v1886_v48  ;;  %5004 = vmatmul.mubr.bf16.gmra.mrb[120].mxu0 %v5384_v45 }
 0x117   : > { %v2078_v54 = vpack.c.bf16 %v1885_v52, %v1884_v51  ;;  %5007 = vmatprep.mubr.bf16.mxu0 %v5385_v47 }
 0x119   : > { %v4901_v55 = vpop.f32.mrb[16].mxu0  ;;  %5111 = vmatprep.mubr.bf16.mxu1 %v2078_v54 }
 0x11a   : > { %v1137_v56 = vpop.f32.mrb[17].mxu0  ;;  %5112 = vmatmul.mubr.bf16.gmra.mrb[12].mxu1 %v2079_v53  ;;  %v1890_v60 = vmax.f32 %v4901_v55, 0.0  ;;  %v5396_v53 = vld [vmem:[%s5479_s26 + $0x248] sm:$0xff]   ;;  %v5397_v55 = vld [vmem:[%s5479_s26 + $0x250] sm:$0xff]  }
 0x11b   : > { %v4902_v58 = vpop.f32.mrb[18].mxu0  ;;  %v1888_v63 = vmax.f32 %v1137_v56, 0.0 }
 0x11c   : > { %v1891_v61 = vmax.f32 %v4902_v58, 0.0  ;;  %v1140_v62 = vpop.f32.mrb[19].mxu0 }
 0x11d   : > { %v1889_v0 = vmax.f32 %v1140_v62, 0.0 }
 0x11e   : > { %v2081_v1 = vpack.c.bf16 %v1891_v61, %v1890_v60  ;;  %5008 = vmatmul.mubr.bf16.gmra.mrb[124].mxu0 %v5386_v57 }
 0x11f   : > { %v2080_v2 = vpack.c.bf16 %v1889_v0, %v1888_v63  ;;  %5011 = vmatprep.mubr.bf16.mxu0 %v5387_v59 }
 0x121   : > { %v4905_v3 = vpop.f32.mrb[20].mxu0  ;;  %5115 = vmatprep.mubr.bf16.mxu1 %v2080_v2 }
 0x122   : > { %v1153_v4 = vpop.f32.mrb[21].mxu0  ;;  %5116 = vmatmul.mubr.bf16.gmra.mrb[16].mxu1 %v2081_v1  ;;  %v1894_v8 = vmax.f32 %v4905_v3, 0.0  ;;  %v5398_v1 = vld [vmem:[%s5479_s26 + $0x258] sm:$0xff]   ;;  %v5399_v3 = vld [vmem:[%s5479_s26 + $0x260] sm:$0xff]  }
 0x123   : > { %v4906_v6 = vpop.f32.mrb[22].mxu0  ;;  %v1892_v11 = vmax.f32 %v1153_v4, 0.0 }
 0x124   : > { %v1895_v9 = vmax.f32 %v4906_v6, 0.0  ;;  %v1156_v10 = vpop.f32.mrb[23].mxu0 }
 0x125   : > { %v1893_v12 = vmax.f32 %v1156_v10, 0.0 }
 0x126   : > { %v2083_v13 = vpack.c.bf16 %v1895_v9, %v1894_v8  ;;  %5012 = vmatmul.mubr.bf16.gmra.mrb[128].mxu0 %v5388_v5 }
 0x127   : > { %v2082_v14 = vpack.c.bf16 %v1893_v12, %v1892_v11  ;;  %5015 = vmatprep.mubr.bf16.mxu0 %v5389_v7 }
 0x129   : > { %v4909_v15 = vpop.f32.mrb[24].mxu0  ;;  %5119 = vmatprep.mubr.bf16.mxu1 %v2082_v14 }
 0x12a   : > { %v1169_v16 = vpop.f32.mrb[25].mxu0  ;;  %5120 = vmatmul.mubr.bf16.gmra.mrb[20].mxu1 %v2083_v13  ;;  %v1898_v20 = vmax.f32 %v4909_v15, 0.0  ;;  %v5400_v13 = vld [vmem:[%s5479_s26 + $0x268] sm:$0xff]   ;;  %v5401_v15 = vld [vmem:[%s5479_s26 + $0x270] sm:$0xff]  }
 0x12b   : > { %v4910_v18 = vpop.f32.mrb[26].mxu0  ;;  %v1896_v23 = vmax.f32 %v1169_v16, 0.0 }
 0x12c   : > { %v1899_v21 = vmax.f32 %v4910_v18, 0.0  ;;  %v1172_v22 = vpop.f32.mrb[27].mxu0 }
 0x12d   : > { %v1897_v24 = vmax.f32 %v1172_v22, 0.0 }
 0x12e   : > { %v2085_v25 = vpack.c.bf16 %v1899_v21, %v1898_v20  ;;  %5016 = vmatmul.mubr.bf16.gmra.mrb[132].mxu0 %v5390_v17 }
 0x12f   : > { %v2084_v26 = vpack.c.bf16 %v1897_v24, %v1896_v23  ;;  %5019 = vmatprep.mubr.bf16.mxu0 %v5391_v19 }
 0x131   : > { %v4913_v27 = vpop.f32.mrb[28].mxu0  ;;  %5123 = vmatprep.mubr.bf16.mxu1 %v2084_v26 }
 0x132   : > { %v1185_v28 = vpop.f32.mrb[29].mxu0  ;;  %5124 = vmatmul.mubr.bf16.gmra.mrb[24].mxu1 %v2085_v25  ;;  %v1902_v32 = vmax.f32 %v4913_v27, 0.0  ;;  %v5402_v25 = vld [vmem:[%s5479_s26 + $0x278] sm:$0xff]   ;;  %v5403_v27 = vld [vmem:[%s5479_s26 + $0x280] sm:$0xff]  }
 0x133   : > { %v4914_v30 = vpop.f32.mrb[30].mxu0  ;;  %v1900_v35 = vmax.f32 %v1185_v28, 0.0 }
 0x134   : > { %v1903_v33 = vmax.f32 %v4914_v30, 0.0  ;;  %v1188_v34 = vpop.f32.mrb[31].mxu0 }
 0x135   : > { %v1901_v36 = vmax.f32 %v1188_v34, 0.0 }
 0x136   : > { %v2087_v37 = vpack.c.bf16 %v1903_v33, %v1902_v32  ;;  %5020 = vmatmul.mubr.bf16.gmra.mrb[136].mxu0 %v5392_v29 }
 0x137   : > { %v2086_v38 = vpack.c.bf16 %v1901_v36, %v1900_v35  ;;  %5023 = vmatprep.mubr.bf16.mxu0 %v5393_v31 }
 0x139   : > { %v4917_v39 = vpop.f32.mrb[32].mxu0  ;;  %5127 = vmatprep.mubr.bf16.mxu1 %v2086_v38 }
 0x13a   : > { %v1201_v40 = vpop.f32.mrb[33].mxu0  ;;  %5128 = vmatmul.mubr.bf16.gmra.mrb[28].mxu1 %v2087_v37  ;;  %v1906_v44 = vmax.f32 %v4917_v39, 0.0  ;;  %v5404_v37 = vld [vmem:[%s5479_s26 + $0x288] sm:$0xff]   ;;  %v5405_v39 = vld [vmem:[%s5479_s26 + $0x290] sm:$0xff]  }
 0x13b   : > { %v4918_v42 = vpop.f32.mrb[34].mxu0  ;;  %v1904_v47 = vmax.f32 %v1201_v40, 0.0 }
 0x13c   : > { %v1907_v45 = vmax.f32 %v4918_v42, 0.0  ;;  %v1204_v46 = vpop.f32.mrb[35].mxu0 }
 0x13d   : > { %v1905_v48 = vmax.f32 %v1204_v46, 0.0 }
 0x13e   : > { %v2089_v49 = vpack.c.bf16 %v1907_v45, %v1906_v44  ;;  %5024 = vmatmul.mubr.bf16.gmra.mrb[140].mxu0 %v5394_v41 }
 0x13f   : > { %v2088_v50 = vpack.c.bf16 %v1905_v48, %v1904_v47  ;;  %5027 = vmatprep.mubr.bf16.mxu0 %v5395_v43 }
 0x141   : > { %v4921_v51 = vpop.f32.mrb[36].mxu0  ;;  %5131 = vmatprep.mubr.bf16.mxu1 %v2088_v50 }
 0x142   : > { %v1217_v52 = vpop.f32.mrb[37].mxu0  ;;  %5132 = vmatmul.mubr.bf16.gmra.mrb[32].mxu1 %v2089_v49  ;;  %v1910_v56 = vmax.f32 %v4921_v51, 0.0  ;;  %v5406_v49 = vld [vmem:[%s5479_s26 + $0x298] sm:$0xff]   ;;  %v5407_v51 = vld [vmem:[%s5479_s26 + $0x2a0] sm:$0xff]  }
 0x143   : > { %v4922_v54 = vpop.f32.mrb[38].mxu0  ;;  %v1908_v59 = vmax.f32 %v1217_v52, 0.0 }
 0x144   : > { %v1911_v57 = vmax.f32 %v4922_v54, 0.0  ;;  %v1220_v58 = vpop.f32.mrb[39].mxu0 }
 0x145   : > { %v1909_v60 = vmax.f32 %v1220_v58, 0.0 }
 0x146   : > { %v2091_v61 = vpack.c.bf16 %v1911_v57, %v1910_v56  ;;  %5028 = vmatmul.mubr.bf16.gmra.mrb[144].mxu0 %v5396_v53 }
 0x147   : > { %v2090_v62 = vpack.c.bf16 %v1909_v60, %v1908_v59  ;;  %5031 = vmatprep.mubr.bf16.mxu0 %v5397_v55 }
 0x149   : > { %v4925_v63 = vpop.f32.mrb[40].mxu0  ;;  %5135 = vmatprep.mubr.bf16.mxu1 %v2090_v62 }
 0x14a   : > { %v1233_v0 = vpop.f32.mrb[41].mxu0  ;;  %5136 = vmatmul.mubr.bf16.gmra.mrb[36].mxu1 %v2091_v61  ;;  %v1914_v4 = vmax.f32 %v4925_v63, 0.0  ;;  %v5408_v61 = vld [vmem:[%s5479_s26 + $0x2a8] sm:$0xff]   ;;  %v5409_v63 = vld [vmem:[%s5479_s26 + $0x2b0] sm:$0xff]  }
 0x14b   : > { %v4926_v2 = vpop.f32.mrb[42].mxu0  ;;  %v1912_v7 = vmax.f32 %v1233_v0, 0.0 }
 0x14c   : > { %v1915_v5 = vmax.f32 %v4926_v2, 0.0  ;;  %v1236_v6 = vpop.f32.mrb[43].mxu0 }
 0x14d   : > { %v1913_v8 = vmax.f32 %v1236_v6, 0.0 }
 0x14e   : > { %v2093_v9 = vpack.c.bf16 %v1915_v5, %v1914_v4  ;;  %5032 = vmatmul.mubr.bf16.gmra.mrb[148].mxu0 %v5398_v1 }
 0x14f   : > { %v2092_v10 = vpack.c.bf16 %v1913_v8, %v1912_v7  ;;  %5035 = vmatprep.mubr.bf16.mxu0 %v5399_v3 }
 0x151   : > { %v4929_v11 = vpop.f32.mrb[44].mxu0  ;;  %5139 = vmatprep.mubr.bf16.mxu1 %v2092_v10 }
 0x152   : > { %v1249_v12 = vpop.f32.mrb[45].mxu0  ;;  %5140 = vmatmul.mubr.bf16.gmra.mrb[40].mxu1 %v2093_v9  ;;  %v1918_v16 = vmax.f32 %v4929_v11, 0.0  ;;  %v5410_v9 = vld [vmem:[%s5479_s26 + $0x2b8] sm:$0xff]   ;;  %v5411_v11 = vld [vmem:[%s5479_s26 + $0x2c0] sm:$0xff]  }
 0x153   : > { %v4930_v14 = vpop.f32.mrb[46].mxu0  ;;  %v1916_v19 = vmax.f32 %v1249_v12, 0.0 }
 0x154   : > { %v1919_v17 = vmax.f32 %v4930_v14, 0.0  ;;  %v1252_v18 = vpop.f32.mrb[47].mxu0 }
 0x155   : > { %v1917_v20 = vmax.f32 %v1252_v18, 0.0 }
 0x156   : > { %v2095_v21 = vpack.c.bf16 %v1919_v17, %v1918_v16  ;;  %5036 = vmatmul.mubr.bf16.gmra.mrb[152].mxu0 %v5400_v13 }
 0x157   : > { %v2094_v22 = vpack.c.bf16 %v1917_v20, %v1916_v19  ;;  %5039 = vmatprep.mubr.bf16.mxu0 %v5401_v15 }
 0x159   : > { %v4933_v23 = vpop.f32.mrb[48].mxu0  ;;  %5143 = vmatprep.mubr.bf16.mxu1 %v2094_v22 }
 0x15a   : > { %v1265_v24 = vpop.f32.mrb[49].mxu0  ;;  %5144 = vmatmul.mubr.bf16.gmra.mrb[44].mxu1 %v2095_v21  ;;  %v1922_v28 = vmax.f32 %v4933_v23, 0.0  ;;  %v5412_v21 = vld [vmem:[%s5479_s26 + $0x2c8] sm:$0xff]   ;;  %v5413_v23 = vld [vmem:[%s5479_s26 + $0x2d0] sm:$0xff]  }
 0x15b   : > { %v4934_v26 = vpop.f32.mrb[50].mxu0  ;;  %v1920_v31 = vmax.f32 %v1265_v24, 0.0 }
 0x15c   : > { %v1923_v29 = vmax.f32 %v4934_v26, 0.0  ;;  %v1268_v30 = vpop.f32.mrb[51].mxu0 }
 0x15d   : > { %v1921_v32 = vmax.f32 %v1268_v30, 0.0 }
 0x15e   : > { %v2097_v33 = vpack.c.bf16 %v1923_v29, %v1922_v28  ;;  %5040 = vmatmul.mubr.bf16.gmra.mrb[156].mxu0 %v5402_v25 }
 0x15f   : > { %v2096_v34 = vpack.c.bf16 %v1921_v32, %v1920_v31  ;;  %5043 = vmatprep.mubr.bf16.mxu0 %v5403_v27 }
 0x161   : > { %v4937_v35 = vpop.f32.mrb[52].mxu0  ;;  %5147 = vmatprep.mubr.bf16.mxu1 %v2096_v34 }
 0x162   : > { %v1281_v36 = vpop.f32.mrb[53].mxu0  ;;  %5148 = vmatmul.mubr.bf16.gmra.mrb[48].mxu1 %v2097_v33  ;;  %v1926_v40 = vmax.f32 %v4937_v35, 0.0  ;;  %v5414_v33 = vld [vmem:[%s5479_s26 + $0x2d8] sm:$0xff]   ;;  %v5415_v35 = vld [vmem:[%s5479_s26 + $0x2e0] sm:$0xff]  }
 0x163   : > { %v4938_v38 = vpop.f32.mrb[54].mxu0  ;;  %v1924_v43 = vmax.f32 %v1281_v36, 0.0 }
 0x164   : > { %v1927_v41 = vmax.f32 %v4938_v38, 0.0  ;;  %v1284_v42 = vpop.f32.mrb[55].mxu0 }
 0x165   : > { %v1925_v44 = vmax.f32 %v1284_v42, 0.0 }
 0x166   : > { %v2099_v45 = vpack.c.bf16 %v1927_v41, %v1926_v40  ;;  %5044 = vmatmul.mubr.bf16.gmra.mrb[160].mxu0 %v5404_v37 }
 0x167   : > { %v2098_v46 = vpack.c.bf16 %v1925_v44, %v1924_v43  ;;  %5047 = vmatprep.mubr.bf16.mxu0 %v5405_v39 }
 0x169   : > { %v4941_v47 = vpop.f32.mrb[56].mxu0  ;;  %5151 = vmatprep.mubr.bf16.mxu1 %v2098_v46 }
 0x16a   : > { %v1297_v48 = vpop.f32.mrb[57].mxu0  ;;  %5152 = vmatmul.mubr.bf16.gmra.mrb[52].mxu1 %v2099_v45  ;;  %v1930_v52 = vmax.f32 %v4941_v47, 0.0  ;;  %v5416_v45 = vld [vmem:[%s5479_s26 + $0x2e8] sm:$0xff]   ;;  %v5417_v47 = vld [vmem:[%s5479_s26 + $0x2f0] sm:$0xff]  }
 0x16b   : > { %v4942_v50 = vpop.f32.mrb[58].mxu0  ;;  %v1928_v55 = vmax.f32 %v1297_v48, 0.0 }
 0x16c   : > { %v1931_v53 = vmax.f32 %v4942_v50, 0.0  ;;  %v1300_v54 = vpop.f32.mrb[59].mxu0 }
 0x16d   : > { %v1929_v56 = vmax.f32 %v1300_v54, 0.0 }
 0x16e   : > { %v2101_v57 = vpack.c.bf16 %v1931_v53, %v1930_v52  ;;  %5048 = vmatmul.mubr.bf16.gmra.mrb[164].mxu0 %v5406_v49 }
 0x16f   : > { %v2100_v58 = vpack.c.bf16 %v1929_v56, %v1928_v55  ;;  %5051 = vmatprep.mubr.bf16.mxu0 %v5407_v51 }
 0x171   : > { %v4945_v59 = vpop.f32.mrb[60].mxu0  ;;  %5155 = vmatprep.mubr.bf16.mxu1 %v2100_v58 }
 0x172   : > { %v1313_v60 = vpop.f32.mrb[61].mxu0  ;;  %5156 = vmatmul.mubr.bf16.gmra.mrb[56].mxu1 %v2101_v57  ;;  %v1934_v0 = vmax.f32 %v4945_v59, 0.0  ;;  %v5418_v57 = vld [vmem:[%s5479_s26 + $0x2f8] sm:$0xff]   ;;  %v5419_v59 = vld [vmem:[%s5479_s26 + $0x300] sm:$0xff]  }
 0x173   : > { %v4946_v62 = vpop.f32.mrb[62].mxu0  ;;  %v1932_v3 = vmax.f32 %v1313_v60, 0.0 }
 0x174   : > { %v1935_v1 = vmax.f32 %v4946_v62, 0.0  ;;  %v1316_v2 = vpop.f32.mrb[63].mxu0 }
 0x175   : > { %v1933_v4 = vmax.f32 %v1316_v2, 0.0 }
 0x176   : > { %v2103_v5 = vpack.c.bf16 %v1935_v1, %v1934_v0  ;;  %5052 = vmatmul.mubr.bf16.gmra.mrb[168].mxu0 %v5408_v61 }
 0x177   : > { %v2102_v6 = vpack.c.bf16 %v1933_v4, %v1932_v3  ;;  %5055 = vmatprep.mubr.bf16.mxu0 %v5409_v63 }
 0x179   : > { %v4949_v7 = vpop.f32.mrb[64].mxu0  ;;  %5159 = vmatprep.mubr.bf16.mxu1 %v2102_v6 }
 0x17a   : > { %v1329_v8 = vpop.f32.mrb[65].mxu0  ;;  %5160 = vmatmul.mubr.bf16.gmra.mrb[60].mxu1 %v2103_v5  ;;  %v1938_v12 = vmax.f32 %v4949_v7, 0.0  ;;  %v5420_v5 = vld [vmem:[%s5479_s26 + $0x308] sm:$0xff]   ;;  %v5421_v7 = vld [vmem:[%s5479_s26 + $0x310] sm:$0xff]  }
 0x17b   : > { %v4950_v10 = vpop.f32.mrb[66].mxu0  ;;  %v1936_v15 = vmax.f32 %v1329_v8, 0.0 }
 0x17c   : > { %v1939_v13 = vmax.f32 %v4950_v10, 0.0  ;;  %v1332_v14 = vpop.f32.mrb[67].mxu0 }
 0x17d   : > { %v1937_v16 = vmax.f32 %v1332_v14, 0.0 }
 0x17e   : > { %v2105_v17 = vpack.c.bf16 %v1939_v13, %v1938_v12  ;;  %5056 = vmatmul.mubr.bf16.gmra.mrb[172].mxu0 %v5410_v9 }
 0x17f   : > { %v2104_v18 = vpack.c.bf16 %v1937_v16, %v1936_v15  ;;  %5059 = vmatprep.mubr.bf16.mxu0 %v5411_v11 }
 0x181   : > { %v4953_v19 = vpop.f32.mrb[68].mxu0  ;;  %5163 = vmatprep.mubr.bf16.mxu1 %v2104_v18 }
 0x182   : > { %v1345_v20 = vpop.f32.mrb[69].mxu0  ;;  %5164 = vmatmul.mubr.bf16.gmra.mrb[64].mxu1 %v2105_v17  ;;  %v1942_v24 = vmax.f32 %v4953_v19, 0.0  ;;  %v5422_v17 = vld [vmem:[%s5479_s26 + $0x318] sm:$0xff]  }
 0x183   : > { %v4954_v22 = vpop.f32.mrb[70].mxu0  ;;  %v1940_v27 = vmax.f32 %v1345_v20, 0.0 }
 0x184   : > { %v1943_v25 = vmax.f32 %v4954_v22, 0.0  ;;  %v1348_v26 = vpop.f32.mrb[71].mxu0 }
 0x185   : > { %v1941_v28 = vmax.f32 %v1348_v26, 0.0 }
 0x186   : > { %v2107_v29 = vpack.c.bf16 %v1943_v25, %v1942_v24  ;;  %5060 = vmatmul.mubr.bf16.gmra.mrb[176].mxu0 %v5412_v21 }
 0x187   : > { %v2106_v30 = vpack.c.bf16 %v1941_v28, %v1940_v27  ;;  %5063 = vmatprep.mubr.bf16.mxu0 %v5413_v23 }
 0x189   : > { %v4957_v31 = vpop.f32.mrb[72].mxu0  ;;  %5167 = vmatprep.mubr.bf16.mxu1 %v2106_v30 }
 0x18a   : > { %v1361_v32 = vpop.f32.mrb[73].mxu0  ;;  %5168 = vmatmul.mubr.bf16.gmra.mrb[68].mxu1 %v2107_v29  ;;  %v1946_v36 = vmax.f32 %v4957_v31, 0.0 }
 0x18b   : > { %v4958_v34 = vpop.f32.mrb[74].mxu0  ;;  %v1944_v39 = vmax.f32 %v1361_v32, 0.0 }
 0x18c   : > { %v1947_v37 = vmax.f32 %v4958_v34, 0.0  ;;  %v1364_v38 = vpop.f32.mrb[75].mxu0 }
 0x18d   : > { %v1945_v40 = vmax.f32 %v1364_v38, 0.0 }
 0x18e   : > { %v2109_v41 = vpack.c.bf16 %v1947_v37, %v1946_v36  ;;  %5064 = vmatmul.mubr.bf16.gmra.mrb[180].mxu0 %v5414_v33 }
 0x18f   : > { %v2108_v42 = vpack.c.bf16 %v1945_v40, %v1944_v39  ;;  %5067 = vmatprep.mubr.bf16.mxu0 %v5415_v35 }
 0x191   : > { %v4961_v43 = vpop.f32.mrb[76].mxu0  ;;  %5171 = vmatprep.mubr.bf16.mxu1 %v2108_v42 }
 0x192   : > { %v1377_v44 = vpop.f32.mrb[77].mxu0  ;;  %5172 = vmatmul.mubr.bf16.gmra.mrb[72].mxu1 %v2109_v41  ;;  %v1950_v48 = vmax.f32 %v4961_v43, 0.0 }
 0x193   : > { %v4962_v46 = vpop.f32.mrb[78].mxu0  ;;  %v1948_v51 = vmax.f32 %v1377_v44, 0.0 }
 0x194   : > { %v1951_v49 = vmax.f32 %v4962_v46, 0.0  ;;  %v1380_v50 = vpop.f32.mrb[79].mxu0 }
 0x195   : > { %v1949_v52 = vmax.f32 %v1380_v50, 0.0 }
 0x196   : > { %v2111_v53 = vpack.c.bf16 %v1951_v49, %v1950_v48  ;;  %5068 = vmatmul.mubr.bf16.gmra.mrb[184].mxu0 %v5416_v45 }
 0x197   : > { %v2110_v54 = vpack.c.bf16 %v1949_v52, %v1948_v51  ;;  %5071 = vmatprep.mubr.bf16.mxu0 %v5417_v47 }
 0x199   : > { %v4965_v55 = vpop.f32.mrb[80].mxu0  ;;  %5175 = vmatprep.mubr.bf16.mxu1 %v2110_v54 }
 0x19a   : > { %v1393_v56 = vpop.f32.mrb[81].mxu0  ;;  %5176 = vmatmul.mubr.bf16.gmra.mrb[76].mxu1 %v2111_v53  ;;  %v1954_v60 = vmax.f32 %v4965_v55, 0.0 }
 0x19b   : > { %v4966_v58 = vpop.f32.mrb[82].mxu0  ;;  %v1952_v63 = vmax.f32 %v1393_v56, 0.0 }
 0x19c   : > { %v1955_v61 = vmax.f32 %v4966_v58, 0.0  ;;  %v1396_v62 = vpop.f32.mrb[83].mxu0 }
 0x19d   : > { %v1953_v0 = vmax.f32 %v1396_v62, 0.0 }
 0x19e   : > { %v2113_v1 = vpack.c.bf16 %v1955_v61, %v1954_v60  ;;  %5072 = vmatmul.mubr.bf16.gmra.mrb[188].mxu0 %v5418_v57 }
 0x19f   : > { %v2112_v2 = vpack.c.bf16 %v1953_v0, %v1952_v63  ;;  %5075 = vmatprep.mubr.bf16.mxu0 %v5419_v59 }
 0x1a1   : > { %v4969_v3 = vpop.f32.mrb[84].mxu0  ;;  %5179 = vmatprep.mubr.bf16.mxu1 %v2112_v2 }
 0x1a2   : > { %v1409_v4 = vpop.f32.mrb[85].mxu0  ;;  %5180 = vmatmul.mubr.bf16.gmra.mrb[80].mxu1 %v2113_v1  ;;  %v1958_v8 = vmax.f32 %v4969_v3, 0.0 }
 0x1a3   : > { %v4970_v6 = vpop.f32.mrb[86].mxu0  ;;  %v1956_v11 = vmax.f32 %v1409_v4, 0.0 }
 0x1a4   : > { %v1959_v9 = vmax.f32 %v4970_v6, 0.0  ;;  %v1412_v10 = vpop.f32.mrb[87].mxu0 }
 0x1a5   : > { %v1957_v12 = vmax.f32 %v1412_v10, 0.0 }
 0x1a6   : > { %v2115_v13 = vpack.c.bf16 %v1959_v9, %v1958_v8  ;;  %5076 = vmatmul.mubr.bf16.gmra.mrb[192].mxu0 %v5420_v5 }
 0x1a7   : > { %v2114_v14 = vpack.c.bf16 %v1957_v12, %v1956_v11  ;;  %5079 = vmatprep.mubr.bf16.mxu0 %v5421_v7 }
 0x1a9   : > { %v4973_v15 = vpop.f32.mrb[88].mxu0  ;;  %5183 = vmatprep.mubr.bf16.mxu1 %v2114_v14 }
 0x1aa   : > { %v1425_v16 = vpop.f32.mrb[89].mxu0  ;;  %5184 = vmatmul.mubr.bf16.gmra.mrb[84].mxu1 %v2115_v13  ;;  %v1962_v19 = vmax.f32 %v4973_v15, 0.0 }
 0x1ab   : > { %v4974_v18 = vpop.f32.mrb[90].mxu0  ;;  %v1960_v22 = vmax.f32 %v1425_v16, 0.0 }
 0x1ac   : > { %v1963_v20 = vmax.f32 %v4974_v18, 0.0  ;;  %v1428_v21 = vpop.f32.mrb[91].mxu0 }
 0x1ad   : > { %v1961_v23 = vmax.f32 %v1428_v21, 0.0 }
 0x1ae   : > { %v2117_v24 = vpack.c.bf16 %v1963_v20, %v1962_v19  ;;  %5080 = vmatmul.mubr.bf16.gmra.mrb[196].mxu0 %v5422_v17 }
 0x1af   : > { %v2116_v25 = vpack.c.bf16 %v1961_v23, %v1960_v22 }
 0x1b1   : > { %v4977_v26 = vpop.f32.mrb[92].mxu0  ;;  %5187 = vmatprep.mubr.bf16.mxu1 %v2116_v25 }
 0x1b2   : > { %v1441_v27 = vpop.f32.mrb[93].mxu0  ;;  %5188 = vmatmul.mubr.bf16.gmra.mrb[88].mxu1 %v2117_v24  ;;  %v1966_v29 = vmax.f32 %v4977_v26, 0.0 }
 0x1b3   : > { %v4978_v28 = vpop.f32.mrb[94].mxu0  ;;  %v1964_v32 = vmax.f32 %v1441_v27, 0.0 }
 0x1b4   : > { %v1967_v30 = vmax.f32 %v4978_v28, 0.0  ;;  %v1444_v31 = vpop.f32.mrb[95].mxu0 }
 0x1b5   : > { %v1965_v33 = vmax.f32 %v1444_v31, 0.0 }
 0x1b6   : > { %v2119_v34 = vpack.c.bf16 %v1967_v30, %v1966_v29 }
 0x1b7   : > { %v2118_v35 = vpack.c.bf16 %v1965_v33, %v1964_v32 }
 0x1b9   : > { %v4981_v36 = vpop.f32.mrb[96].mxu0  ;;  %5191 = vmatprep.mubr.bf16.mxu1 %v2118_v35 }
 0x1ba   : > { %v1457_v37 = vpop.f32.mrb[97].mxu0  ;;  %5192 = vmatmul.mubr.bf16.gmra.mrb[92].mxu1 %v2119_v34  ;;  %v1970_v39 = vmax.f32 %v4981_v36, 0.0 }
 0x1bb   : > { %v4982_v38 = vpop.f32.mrb[98].mxu0  ;;  %v1968_v42 = vmax.f32 %v1457_v37, 0.0 }
 0x1bc   : > { %v1971_v40 = vmax.f32 %v4982_v38, 0.0  ;;  %v1460_v41 = vpop.f32.mrb[99].mxu0 }
 0x1bd   : > { %v1969_v43 = vmax.f32 %v1460_v41, 0.0 }
 0x1be   : > { %v2121_v44 = vpack.c.bf16 %v1971_v40, %v1970_v39 }
 0x1bf   : > { %v2120_v45 = vpack.c.bf16 %v1969_v43, %v1968_v42 }
 0x1c1   : > { %v4985_v46 = vpop.f32.mrb[100].mxu0  ;;  %5195 = vmatprep.mubr.bf16.mxu1 %v2120_v45 }
 0x1c2   : > { %v1473_v47 = vpop.f32.mrb[101].mxu0  ;;  %5196 = vmatmul.mubr.bf16.gmra.mrb[96].mxu1 %v2121_v44  ;;  %v1974_v49 = vmax.f32 %v4985_v46, 0.0 }
 0x1c3   : > { %v4986_v48 = vpop.f32.mrb[102].mxu0  ;;  %v1972_v52 = vmax.f32 %v1473_v47, 0.0 }
 0x1c4   : > { %v1975_v50 = vmax.f32 %v4986_v48, 0.0  ;;  %v1476_v51 = vpop.f32.mrb[103].mxu0 }
 0x1c5   : > { %v1973_v53 = vmax.f32 %v1476_v51, 0.0 }
 0x1c6   : > { %v2123_v54 = vpack.c.bf16 %v1975_v50, %v1974_v49 }
 0x1c7   : > { %v2122_v55 = vpack.c.bf16 %v1973_v53, %v1972_v52 }
 0x1c9   : > { %v4989_v56 = vpop.f32.mrb[104].mxu0  ;;  %5199 = vmatprep.mubr.bf16.mxu1 %v2122_v55 }
 0x1ca   : > { %v1489_v57 = vpop.f32.mrb[105].mxu0  ;;  %5200 = vmatmul.mubr.bf16.gmra.mrb[100].mxu1 %v2123_v54  ;;  %v1978_v59 = vmax.f32 %v4989_v56, 0.0 }
 0x1cb   : > { %v4990_v58 = vpop.f32.mrb[106].mxu0  ;;  %v1976_v62 = vmax.f32 %v1489_v57, 0.0 }
 0x1cc   : > { %v1979_v60 = vmax.f32 %v4990_v58, 0.0  ;;  %v1492_v61 = vpop.f32.mrb[107].mxu0 }
 0x1cd   : > { %v1977_v63 = vmax.f32 %v1492_v61, 0.0 }
 0x1ce   : > { %v2125_v0 = vpack.c.bf16 %v1979_v60, %v1978_v59 }
 0x1cf   : > { %v2124_v1 = vpack.c.bf16 %v1977_v63, %v1976_v62 }
 0x1d1   : > { %v4993_v2 = vpop.f32.mrb[108].mxu0  ;;  %5203 = vmatprep.mubr.bf16.mxu1 %v2124_v1 }
 0x1d2   : > { %v1505_v3 = vpop.f32.mrb[109].mxu0  ;;  %5204 = vmatmul.mubr.bf16.gmra.mrb[104].mxu1 %v2125_v0  ;;  %v1982_v5 = vmax.f32 %v4993_v2, 0.0 }
 0x1d3   : > { %v4994_v4 = vpop.f32.mrb[110].mxu0  ;;  %v1980_v8 = vmax.f32 %v1505_v3, 0.0 }
 0x1d4   : > { %v1983_v6 = vmax.f32 %v4994_v4, 0.0  ;;  %v1508_v7 = vpop.f32.mrb[111].mxu0 }
 0x1d5   : > { %v1981_v9 = vmax.f32 %v1508_v7, 0.0  ;;  %v5101_v10 = vpop.f32.mrb[0].mxu1 }
 0x1d6   : > { %v2127_v11 = vpack.c.bf16 %v1983_v6, %v1982_v5  ;;  %v4453_v12 = vpack.c.bf16 %v5101_v10, %v5101_v10  ;;  %v2270_v13 = vpop.f32.mrb[1].mxu1 }
 0x1d7   : > { %v2126_v14 = vpack.c.bf16 %v1981_v9, %v1980_v8  ;;  %v4451_v15 = vpack.c.bf16 %v2270_v13, %v2270_v13  ;;  %v5102_v16 = vpop.f32.mrb[2].mxu1 }
 0x1d8   : > { %3872 = vst.msk [vmem:[%s5622_s29 + $0x8] sm:$0xf] %vm3869_vm0, %v4453_v12  ;;  %v4454_v17 = vpack.c.bf16 %v5102_v16, %v5102_v16  ;;  %v2273_v18 = vpop.f32.mrb[3].mxu1 }
 0x1d9   : > { %3870 = vst.msk [vmem:[%s5622_s29] sm:$0xf] %vm3869_vm0, %v4451_v15  ;;  %v4452_v19 = vpack.c.bf16 %v2273_v18, %v2273_v18  ;;  %v4997_v20 = vpop.f32.mrb[112].mxu0  ;;  %5207 = vmatprep.mubr.bf16.mxu1 %v2126_v14 }
 0x1da   : > { %3873 = vst.msk [vmem:[%s5622_s29 + $0xc] sm:$0xf] %vm3869_vm0, %v4454_v17  ;;  %v1521_v21 = vpop.f32.mrb[113].mxu0  ;;  %5208 = vmatmul.mubr.bf16.gmra.mrb[108].mxu1 %v2127_v11  ;;  %v1986_v23 = vmax.f32 %v4997_v20, 0.0 }
 0x1db   : > { %3871 = vst.msk [vmem:[%s5622_s29 + $0x4] sm:$0xf] %vm3869_vm0, %v4452_v19  ;;  %v4998_v22 = vpop.f32.mrb[114].mxu0  ;;  %v1984_v26 = vmax.f32 %v1521_v21, 0.0 }
 0x1dc   : > { %v1987_v24 = vmax.f32 %v4998_v22, 0.0  ;;  %v1524_v25 = vpop.f32.mrb[115].mxu0 }
 0x1dd   : > { %v1985_v27 = vmax.f32 %v1524_v25, 0.0  ;;  %v5105_v28 = vpop.f32.mrb[4].mxu1 }
 0x1de   : > { %v2129_v29 = vpack.c.bf16 %v1987_v24, %v1986_v23  ;;  %v4457_v30 = vpack.c.bf16 %v5105_v28, %v5105_v28  ;;  %v2286_v31 = vpop.f32.mrb[5].mxu1 }
 0x1df   : > { %v2128_v32 = vpack.c.bf16 %v1985_v27, %v1984_v26  ;;  %v4455_v33 = vpack.c.bf16 %v2286_v31, %v2286_v31  ;;  %v5106_v34 = vpop.f32.mrb[6].mxu1 }
 0x1e0   : > { %3876 = vst.msk [vmem:[%s5622_s29 + $0x18] sm:$0xf] %vm3869_vm0, %v4457_v30  ;;  %v4458_v35 = vpack.c.bf16 %v5106_v34, %v5106_v34  ;;  %v2289_v36 = vpop.f32.mrb[7].mxu1 }
 0x1e1   : > { %3874 = vst.msk [vmem:[%s5622_s29 + $0x10] sm:$0xf] %vm3869_vm0, %v4455_v33  ;;  %v4456_v37 = vpack.c.bf16 %v2289_v36, %v2289_v36  ;;  %v5001_v38 = vpop.f32.mrb[116].mxu0  ;;  %5211 = vmatprep.mubr.bf16.mxu1 %v2128_v32 }
 0x1e2   : > { %3877 = vst.msk [vmem:[%s5622_s29 + $0x1c] sm:$0xf] %vm3869_vm0, %v4458_v35  ;;  %v1537_v39 = vpop.f32.mrb[117].mxu0  ;;  %5212 = vmatmul.mubr.bf16.gmra.mrb[112].mxu1 %v2129_v29  ;;  %v1990_v41 = vmax.f32 %v5001_v38, 0.0 }
 0x1e3   : > { %3875 = vst.msk [vmem:[%s5622_s29 + $0x14] sm:$0xf] %vm3869_vm0, %v4456_v37  ;;  %v5002_v40 = vpop.f32.mrb[118].mxu0  ;;  %v1988_v44 = vmax.f32 %v1537_v39, 0.0 }
 0x1e4   : > { %v1991_v42 = vmax.f32 %v5002_v40, 0.0  ;;  %v1540_v43 = vpop.f32.mrb[119].mxu0 }
 0x1e5   : > { %v1989_v45 = vmax.f32 %v1540_v43, 0.0  ;;  %v5109_v46 = vpop.f32.mrb[8].mxu1 }
 0x1e6   : > { %v2131_v47 = vpack.c.bf16 %v1991_v42, %v1990_v41  ;;  %v4461_v48 = vpack.c.bf16 %v5109_v46, %v5109_v46  ;;  %v2302_v49 = vpop.f32.mrb[9].mxu1 }
 0x1e7   : > { %v2130_v50 = vpack.c.bf16 %v1989_v45, %v1988_v44  ;;  %v4459_v51 = vpack.c.bf16 %v2302_v49, %v2302_v49  ;;  %v5110_v52 = vpop.f32.mrb[10].mxu1 }
 0x1e8   : > { %3880 = vst.msk [vmem:[%s5622_s29 + $0x28] sm:$0xf] %vm3869_vm0, %v4461_v48  ;;  %v4462_v53 = vpack.c.bf16 %v5110_v52, %v5110_v52  ;;  %v2305_v54 = vpop.f32.mrb[11].mxu1 }
 0x1e9   : > { %3878 = vst.msk [vmem:[%s5622_s29 + $0x20] sm:$0xf] %vm3869_vm0, %v4459_v51  ;;  %v4460_v55 = vpack.c.bf16 %v2305_v54, %v2305_v54  ;;  %v5005_v56 = vpop.f32.mrb[120].mxu0  ;;  %5215 = vmatprep.mubr.bf16.mxu1 %v2130_v50 }
 0x1ea   : > { %3881 = vst.msk [vmem:[%s5622_s29 + $0x2c] sm:$0xf] %vm3869_vm0, %v4462_v53  ;;  %v1553_v57 = vpop.f32.mrb[121].mxu0  ;;  %5216 = vmatmul.mubr.bf16.gmra.mrb[116].mxu1 %v2131_v47  ;;  %v1994_v59 = vmax.f32 %v5005_v56, 0.0 }
 0x1eb   : > { %3879 = vst.msk [vmem:[%s5622_s29 + $0x24] sm:$0xf] %vm3869_vm0, %v4460_v55  ;;  %v5006_v58 = vpop.f32.mrb[122].mxu0  ;;  %v1992_v62 = vmax.f32 %v1553_v57, 0.0 }
 0x1ec   : > { %v1995_v60 = vmax.f32 %v5006_v58, 0.0  ;;  %v1556_v61 = vpop.f32.mrb[123].mxu0 }
 0x1ed   : > { %v1993_v63 = vmax.f32 %v1556_v61, 0.0  ;;  %v5113_v0 = vpop.f32.mrb[12].mxu1 }
 0x1ee   : > { %v2133_v1 = vpack.c.bf16 %v1995_v60, %v1994_v59  ;;  %v4465_v2 = vpack.c.bf16 %v5113_v0, %v5113_v0  ;;  %v2318_v3 = vpop.f32.mrb[13].mxu1 }
 0x1ef   : > { %v2132_v4 = vpack.c.bf16 %v1993_v63, %v1992_v62  ;;  %v4463_v5 = vpack.c.bf16 %v2318_v3, %v2318_v3  ;;  %v5114_v6 = vpop.f32.mrb[14].mxu1 }
 0x1f0   : > { %3884 = vst.msk [vmem:[%s5622_s29 + $0x38] sm:$0xf] %vm3869_vm0, %v4465_v2  ;;  %v4466_v7 = vpack.c.bf16 %v5114_v6, %v5114_v6  ;;  %v2321_v8 = vpop.f32.mrb[15].mxu1 }
 0x1f1   : > { %3882 = vst.msk [vmem:[%s5622_s29 + $0x30] sm:$0xf] %vm3869_vm0, %v4463_v5  ;;  %v4464_v9 = vpack.c.bf16 %v2321_v8, %v2321_v8  ;;  %v5009_v10 = vpop.f32.mrb[124].mxu0  ;;  %5219 = vmatprep.mubr.bf16.mxu1 %v2132_v4 }
 0x1f2   : > { %3885 = vst.msk [vmem:[%s5622_s29 + $0x3c] sm:$0xf] %vm3869_vm0, %v4466_v7  ;;  %v1569_v11 = vpop.f32.mrb[125].mxu0  ;;  %5220 = vmatmul.mubr.bf16.gmra.mrb[120].mxu1 %v2133_v1  ;;  %v1998_v13 = vmax.f32 %v5009_v10, 0.0 }
 0x1f3   : > { %3883 = vst.msk [vmem:[%s5622_s29 + $0x34] sm:$0xf] %vm3869_vm0, %v4464_v9  ;;  %v5010_v12 = vpop.f32.mrb[126].mxu0  ;;  %v1996_v16 = vmax.f32 %v1569_v11, 0.0 }
 0x1f4   : > { %v1999_v14 = vmax.f32 %v5010_v12, 0.0  ;;  %v1572_v15 = vpop.f32.mrb[127].mxu0 }
 0x1f5   : > { %v1997_v17 = vmax.f32 %v1572_v15, 0.0  ;;  %v5117_v18 = vpop.f32.mrb[16].mxu1 }
 0x1f6   : > { %v2135_v19 = vpack.c.bf16 %v1999_v14, %v1998_v13  ;;  %v4469_v20 = vpack.c.bf16 %v5117_v18, %v5117_v18  ;;  %v2334_v21 = vpop.f32.mrb[17].mxu1 }
 0x1f7   : > { %v2134_v22 = vpack.c.bf16 %v1997_v17, %v1996_v16  ;;  %v4467_v23 = vpack.c.bf16 %v2334_v21, %v2334_v21  ;;  %v5118_v24 = vpop.f32.mrb[18].mxu1 }
 0x1f8   : > { %3888 = vst.msk [vmem:[%s5622_s29 + $0x48] sm:$0xf] %vm3869_vm0, %v4469_v20  ;;  %v4470_v25 = vpack.c.bf16 %v5118_v24, %v5118_v24  ;;  %v2337_v26 = vpop.f32.mrb[19].mxu1 }
 0x1f9   : > { %3886 = vst.msk [vmem:[%s5622_s29 + $0x40] sm:$0xf] %vm3869_vm0, %v4467_v23  ;;  %v4468_v27 = vpack.c.bf16 %v2337_v26, %v2337_v26  ;;  %v5013_v28 = vpop.f32.mrb[128].mxu0  ;;  %5223 = vmatprep.mubr.bf16.mxu1 %v2134_v22 }
 0x1fa   : > { %3889 = vst.msk [vmem:[%s5622_s29 + $0x4c] sm:$0xf] %vm3869_vm0, %v4470_v25  ;;  %v1585_v29 = vpop.f32.mrb[129].mxu0  ;;  %5224 = vmatmul.mubr.bf16.gmra.mrb[124].mxu1 %v2135_v19  ;;  %v2002_v31 = vmax.f32 %v5013_v28, 0.0 }
 0x1fb   : > { %3887 = vst.msk [vmem:[%s5622_s29 + $0x44] sm:$0xf] %vm3869_vm0, %v4468_v27  ;;  %v5014_v30 = vpop.f32.mrb[130].mxu0  ;;  %v2000_v34 = vmax.f32 %v1585_v29, 0.0 }
 0x1fc   : > { %v2003_v32 = vmax.f32 %v5014_v30, 0.0  ;;  %v1588_v33 = vpop.f32.mrb[131].mxu0 }
 0x1fd   : > { %v2001_v35 = vmax.f32 %v1588_v33, 0.0  ;;  %v5121_v36 = vpop.f32.mrb[20].mxu1 }
 0x1fe   : > { %v2137_v37 = vpack.c.bf16 %v2003_v32, %v2002_v31  ;;  %v4473_v38 = vpack.c.bf16 %v5121_v36, %v5121_v36  ;;  %v2350_v39 = vpop.f32.mrb[21].mxu1 }
 0x1ff   : > { %v2136_v40 = vpack.c.bf16 %v2001_v35, %v2000_v34  ;;  %v4471_v41 = vpack.c.bf16 %v2350_v39, %v2350_v39  ;;  %v5122_v42 = vpop.f32.mrb[22].mxu1 }
 0x200   : > { %3892 = vst.msk [vmem:[%s5622_s29 + $0x58] sm:$0xf] %vm3869_vm0, %v4473_v38  ;;  %v4474_v43 = vpack.c.bf16 %v5122_v42, %v5122_v42  ;;  %v2353_v44 = vpop.f32.mrb[23].mxu1 }
 0x201   : > { %3890 = vst.msk [vmem:[%s5622_s29 + $0x50] sm:$0xf] %vm3869_vm0, %v4471_v41  ;;  %v4472_v45 = vpack.c.bf16 %v2353_v44, %v2353_v44  ;;  %v5017_v46 = vpop.f32.mrb[132].mxu0  ;;  %5227 = vmatprep.mubr.bf16.mxu1 %v2136_v40 }
 0x202   : > { %3893 = vst.msk [vmem:[%s5622_s29 + $0x5c] sm:$0xf] %vm3869_vm0, %v4474_v43  ;;  %v1601_v47 = vpop.f32.mrb[133].mxu0  ;;  %5228 = vmatmul.mubr.bf16.gmra.mrb[128].mxu1 %v2137_v37  ;;  %v2006_v49 = vmax.f32 %v5017_v46, 0.0 }
 0x203   : > { %3891 = vst.msk [vmem:[%s5622_s29 + $0x54] sm:$0xf] %vm3869_vm0, %v4472_v45  ;;  %v5018_v48 = vpop.f32.mrb[134].mxu0  ;;  %v2004_v52 = vmax.f32 %v1601_v47, 0.0 }
 0x204   : > { %v2007_v50 = vmax.f32 %v5018_v48, 0.0  ;;  %v1604_v51 = vpop.f32.mrb[135].mxu0 }
 0x205   : > { %v2005_v53 = vmax.f32 %v1604_v51, 0.0  ;;  %v5125_v54 = vpop.f32.mrb[24].mxu1 }
 0x206   : > { %v2139_v55 = vpack.c.bf16 %v2007_v50, %v2006_v49  ;;  %v4477_v56 = vpack.c.bf16 %v5125_v54, %v5125_v54  ;;  %v2366_v57 = vpop.f32.mrb[25].mxu1 }
 0x207   : > { %v2138_v58 = vpack.c.bf16 %v2005_v53, %v2004_v52  ;;  %v4475_v59 = vpack.c.bf16 %v2366_v57, %v2366_v57  ;;  %v5126_v60 = vpop.f32.mrb[26].mxu1 }
 0x208   : > { %3896 = vst.msk [vmem:[%s5622_s29 + $0x68] sm:$0xf] %vm3869_vm0, %v4477_v56  ;;  %v4478_v61 = vpack.c.bf16 %v5126_v60, %v5126_v60  ;;  %v2369_v62 = vpop.f32.mrb[27].mxu1 }
 0x209   : > { %3894 = vst.msk [vmem:[%s5622_s29 + $0x60] sm:$0xf] %vm3869_vm0, %v4475_v59  ;;  %v4476_v63 = vpack.c.bf16 %v2369_v62, %v2369_v62  ;;  %v5021_v0 = vpop.f32.mrb[136].mxu0  ;;  %5231 = vmatprep.mubr.bf16.mxu1 %v2138_v58 }
 0x20a   : > { %3897 = vst.msk [vmem:[%s5622_s29 + $0x6c] sm:$0xf] %vm3869_vm0, %v4478_v61  ;;  %v1617_v1 = vpop.f32.mrb[137].mxu0  ;;  %5232 = vmatmul.mubr.bf16.gmra.mrb[132].mxu1 %v2139_v55  ;;  %v2010_v3 = vmax.f32 %v5021_v0, 0.0 }
 0x20b   : > { %3895 = vst.msk [vmem:[%s5622_s29 + $0x64] sm:$0xf] %vm3869_vm0, %v4476_v63  ;;  %v5022_v2 = vpop.f32.mrb[138].mxu0  ;;  %v2008_v6 = vmax.f32 %v1617_v1, 0.0 }
 0x20c   : > { %v2011_v4 = vmax.f32 %v5022_v2, 0.0  ;;  %v1620_v5 = vpop.f32.mrb[139].mxu0 }
 0x20d   : > { %v2009_v7 = vmax.f32 %v1620_v5, 0.0  ;;  %v5129_v8 = vpop.f32.mrb[28].mxu1 }
 0x20e   : > { %v2141_v9 = vpack.c.bf16 %v2011_v4, %v2010_v3  ;;  %v4481_v10 = vpack.c.bf16 %v5129_v8, %v5129_v8  ;;  %v2382_v11 = vpop.f32.mrb[29].mxu1 }
 0x20f   : > { %v2140_v12 = vpack.c.bf16 %v2009_v7, %v2008_v6  ;;  %v4479_v13 = vpack.c.bf16 %v2382_v11, %v2382_v11  ;;  %v5130_v14 = vpop.f32.mrb[30].mxu1 }
 0x210   : > { %3900 = vst.msk [vmem:[%s5622_s29 + $0x78] sm:$0xf] %vm3869_vm0, %v4481_v10  ;;  %v4482_v15 = vpack.c.bf16 %v5130_v14, %v5130_v14  ;;  %v2385_v16 = vpop.f32.mrb[31].mxu1 }
 0x211   : > { %3898 = vst.msk [vmem:[%s5622_s29 + $0x70] sm:$0xf] %vm3869_vm0, %v4479_v13  ;;  %v4480_v17 = vpack.c.bf16 %v2385_v16, %v2385_v16  ;;  %v5025_v18 = vpop.f32.mrb[140].mxu0  ;;  %5235 = vmatprep.mubr.bf16.mxu1 %v2140_v12 }
 0x212   : > { %3901 = vst.msk [vmem:[%s5622_s29 + $0x7c] sm:$0xf] %vm3869_vm0, %v4482_v15  ;;  %v1633_v19 = vpop.f32.mrb[141].mxu0  ;;  %5236 = vmatmul.mubr.bf16.gmra.mrb[136].mxu1 %v2141_v9  ;;  %v2014_v21 = vmax.f32 %v5025_v18, 0.0 }
 0x213   : > { %3899 = vst.msk [vmem:[%s5622_s29 + $0x74] sm:$0xf] %vm3869_vm0, %v4480_v17  ;;  %v5026_v20 = vpop.f32.mrb[142].mxu0  ;;  %v2012_v24 = vmax.f32 %v1633_v19, 0.0 }
 0x214   : > { %v2015_v22 = vmax.f32 %v5026_v20, 0.0  ;;  %v1636_v23 = vpop.f32.mrb[143].mxu0 }
 0x215   : > { %v2013_v25 = vmax.f32 %v1636_v23, 0.0  ;;  %v5133_v26 = vpop.f32.mrb[32].mxu1 }
 0x216   : > { %v2143_v27 = vpack.c.bf16 %v2015_v22, %v2014_v21  ;;  %v4485_v28 = vpack.c.bf16 %v5133_v26, %v5133_v26  ;;  %v2398_v29 = vpop.f32.mrb[33].mxu1 }
 0x217   : > { %v2142_v30 = vpack.c.bf16 %v2013_v25, %v2012_v24  ;;  %v4483_v31 = vpack.c.bf16 %v2398_v29, %v2398_v29  ;;  %v5134_v32 = vpop.f32.mrb[34].mxu1 }
 0x218   : > { %3904 = vst.msk [vmem:[%s5622_s29 + $0x88] sm:$0xf] %vm3869_vm0, %v4485_v28  ;;  %v4486_v33 = vpack.c.bf16 %v5134_v32, %v5134_v32  ;;  %v2401_v34 = vpop.f32.mrb[35].mxu1 }
 0x219   : > { %3902 = vst.msk [vmem:[%s5622_s29 + $0x80] sm:$0xf] %vm3869_vm0, %v4483_v31  ;;  %v4484_v35 = vpack.c.bf16 %v2401_v34, %v2401_v34  ;;  %v5029_v36 = vpop.f32.mrb[144].mxu0  ;;  %5239 = vmatprep.mubr.bf16.mxu1 %v2142_v30 }
 0x21a   : > { %3905 = vst.msk [vmem:[%s5622_s29 + $0x8c] sm:$0xf] %vm3869_vm0, %v4486_v33  ;;  %v1649_v37 = vpop.f32.mrb[145].mxu0  ;;  %5240 = vmatmul.mubr.bf16.gmra.mrb[140].mxu1 %v2143_v27  ;;  %v2018_v39 = vmax.f32 %v5029_v36, 0.0 }
 0x21b   : > { %3903 = vst.msk [vmem:[%s5622_s29 + $0x84] sm:$0xf] %vm3869_vm0, %v4484_v35  ;;  %v5030_v38 = vpop.f32.mrb[146].mxu0  ;;  %v2016_v42 = vmax.f32 %v1649_v37, 0.0 }
 0x21c   : > { %v2019_v40 = vmax.f32 %v5030_v38, 0.0  ;;  %v1652_v41 = vpop.f32.mrb[147].mxu0 }
 0x21d   : > { %v2017_v43 = vmax.f32 %v1652_v41, 0.0  ;;  %v5137_v44 = vpop.f32.mrb[36].mxu1 }
 0x21e   : > { %v2145_v45 = vpack.c.bf16 %v2019_v40, %v2018_v39  ;;  %v4489_v46 = vpack.c.bf16 %v5137_v44, %v5137_v44  ;;  %v2414_v47 = vpop.f32.mrb[37].mxu1 }
 0x21f   : > { %v2144_v48 = vpack.c.bf16 %v2017_v43, %v2016_v42  ;;  %v4487_v49 = vpack.c.bf16 %v2414_v47, %v2414_v47  ;;  %v5138_v50 = vpop.f32.mrb[38].mxu1 }
 0x220   : > { %3908 = vst.msk [vmem:[%s5622_s29 + $0x98] sm:$0xf] %vm3869_vm0, %v4489_v46  ;;  %v4490_v51 = vpack.c.bf16 %v5138_v50, %v5138_v50  ;;  %v2417_v52 = vpop.f32.mrb[39].mxu1 }
 0x221   : > { %3906 = vst.msk [vmem:[%s5622_s29 + $0x90] sm:$0xf] %vm3869_vm0, %v4487_v49  ;;  %v4488_v53 = vpack.c.bf16 %v2417_v52, %v2417_v52  ;;  %v5033_v54 = vpop.f32.mrb[148].mxu0  ;;  %5243 = vmatprep.mubr.bf16.mxu1 %v2144_v48 }
 0x222   : > { %3909 = vst.msk [vmem:[%s5622_s29 + $0x9c] sm:$0xf] %vm3869_vm0, %v4490_v51  ;;  %v1665_v55 = vpop.f32.mrb[149].mxu0  ;;  %5244 = vmatmul.mubr.bf16.gmra.mrb[144].mxu1 %v2145_v45  ;;  %v2022_v57 = vmax.f32 %v5033_v54, 0.0 }
 0x223   : > { %3907 = vst.msk [vmem:[%s5622_s29 + $0x94] sm:$0xf] %vm3869_vm0, %v4488_v53  ;;  %v5034_v56 = vpop.f32.mrb[150].mxu0  ;;  %v2020_v60 = vmax.f32 %v1665_v55, 0.0 }
 0x224   : > { %v2023_v58 = vmax.f32 %v5034_v56, 0.0  ;;  %v1668_v59 = vpop.f32.mrb[151].mxu0 }
 0x225   : > { %v2021_v61 = vmax.f32 %v1668_v59, 0.0  ;;  %v5141_v62 = vpop.f32.mrb[40].mxu1 }
 0x226   : > { %v2147_v63 = vpack.c.bf16 %v2023_v58, %v2022_v57  ;;  %v4493_v0 = vpack.c.bf16 %v5141_v62, %v5141_v62  ;;  %v2430_v1 = vpop.f32.mrb[41].mxu1 }
 0x227   : > { %v2146_v2 = vpack.c.bf16 %v2021_v61, %v2020_v60  ;;  %v4491_v3 = vpack.c.bf16 %v2430_v1, %v2430_v1  ;;  %v5142_v4 = vpop.f32.mrb[42].mxu1 }
 0x228   : > { %3912 = vst.msk [vmem:[%s5622_s29 + $0xa8] sm:$0xf] %vm3869_vm0, %v4493_v0  ;;  %v4494_v5 = vpack.c.bf16 %v5142_v4, %v5142_v4  ;;  %v2433_v6 = vpop.f32.mrb[43].mxu1 }
 0x229   : > { %3910 = vst.msk [vmem:[%s5622_s29 + $0xa0] sm:$0xf] %vm3869_vm0, %v4491_v3  ;;  %v4492_v7 = vpack.c.bf16 %v2433_v6, %v2433_v6  ;;  %v5037_v8 = vpop.f32.mrb[152].mxu0  ;;  %5247 = vmatprep.mubr.bf16.mxu1 %v2146_v2 }
 0x22a   : > { %3913 = vst.msk [vmem:[%s5622_s29 + $0xac] sm:$0xf] %vm3869_vm0, %v4494_v5  ;;  %v1681_v9 = vpop.f32.mrb[153].mxu0  ;;  %5248 = vmatmul.mubr.bf16.gmra.mrb[148].mxu1 %v2147_v63  ;;  %v2026_v11 = vmax.f32 %v5037_v8, 0.0 }
 0x22b   : > { %3911 = vst.msk [vmem:[%s5622_s29 + $0xa4] sm:$0xf] %vm3869_vm0, %v4492_v7  ;;  %v5038_v10 = vpop.f32.mrb[154].mxu0  ;;  %v2024_v14 = vmax.f32 %v1681_v9, 0.0 }
 0x22c   : > { %v2027_v12 = vmax.f32 %v5038_v10, 0.0  ;;  %v1684_v13 = vpop.f32.mrb[155].mxu0 }
 0x22d   : > { %v2025_v15 = vmax.f32 %v1684_v13, 0.0  ;;  %v5145_v16 = vpop.f32.mrb[44].mxu1 }
 0x22e   : > { %v2149_v17 = vpack.c.bf16 %v2027_v12, %v2026_v11  ;;  %v4497_v18 = vpack.c.bf16 %v5145_v16, %v5145_v16  ;;  %v2446_v19 = vpop.f32.mrb[45].mxu1 }
 0x22f   : > { %v2148_v20 = vpack.c.bf16 %v2025_v15, %v2024_v14  ;;  %v4495_v21 = vpack.c.bf16 %v2446_v19, %v2446_v19  ;;  %v5146_v22 = vpop.f32.mrb[46].mxu1 }
 0x230   : > { %3916 = vst.msk [vmem:[%s5622_s29 + $0xb8] sm:$0xf] %vm3869_vm0, %v4497_v18  ;;  %v4498_v23 = vpack.c.bf16 %v5146_v22, %v5146_v22  ;;  %v2449_v24 = vpop.f32.mrb[47].mxu1 }
 0x231   : > { %3914 = vst.msk [vmem:[%s5622_s29 + $0xb0] sm:$0xf] %vm3869_vm0, %v4495_v21  ;;  %v4496_v25 = vpack.c.bf16 %v2449_v24, %v2449_v24  ;;  %v5041_v26 = vpop.f32.mrb[156].mxu0  ;;  %5251 = vmatprep.mubr.bf16.mxu1 %v2148_v20 }
 0x232   : > { %3917 = vst.msk [vmem:[%s5622_s29 + $0xbc] sm:$0xf] %vm3869_vm0, %v4498_v23  ;;  %v1697_v27 = vpop.f32.mrb[157].mxu0  ;;  %5252 = vmatmul.mubr.bf16.gmra.mrb[152].mxu1 %v2149_v17  ;;  %v2030_v29 = vmax.f32 %v5041_v26, 0.0 }
 0x233   : > { %3915 = vst.msk [vmem:[%s5622_s29 + $0xb4] sm:$0xf] %vm3869_vm0, %v4496_v25  ;;  %v5042_v28 = vpop.f32.mrb[158].mxu0  ;;  %v2028_v32 = vmax.f32 %v1697_v27, 0.0 }
 0x234   : > { %v2031_v30 = vmax.f32 %v5042_v28, 0.0  ;;  %v1700_v31 = vpop.f32.mrb[159].mxu0 }
 0x235   : > { %v2029_v33 = vmax.f32 %v1700_v31, 0.0  ;;  %v5149_v34 = vpop.f32.mrb[48].mxu1 }
 0x236   : > { %v2151_v35 = vpack.c.bf16 %v2031_v30, %v2030_v29  ;;  %v4501_v36 = vpack.c.bf16 %v5149_v34, %v5149_v34  ;;  %v2462_v37 = vpop.f32.mrb[49].mxu1 }
 0x237   : > { %v2150_v38 = vpack.c.bf16 %v2029_v33, %v2028_v32  ;;  %v4499_v39 = vpack.c.bf16 %v2462_v37, %v2462_v37  ;;  %v5150_v40 = vpop.f32.mrb[50].mxu1 }
 0x238   : > { %3920 = vst.msk [vmem:[%s5622_s29 + $0xc8] sm:$0xf] %vm3869_vm0, %v4501_v36  ;;  %v4502_v41 = vpack.c.bf16 %v5150_v40, %v5150_v40  ;;  %v2465_v42 = vpop.f32.mrb[51].mxu1 }
 0x239   : > { %3918 = vst.msk [vmem:[%s5622_s29 + $0xc0] sm:$0xf] %vm3869_vm0, %v4499_v39  ;;  %v4500_v43 = vpack.c.bf16 %v2465_v42, %v2465_v42  ;;  %v5045_v44 = vpop.f32.mrb[160].mxu0  ;;  %5255 = vmatprep.mubr.bf16.mxu1 %v2150_v38 }
 0x23a   : > { %3921 = vst.msk [vmem:[%s5622_s29 + $0xcc] sm:$0xf] %vm3869_vm0, %v4502_v41  ;;  %v1713_v45 = vpop.f32.mrb[161].mxu0  ;;  %5256 = vmatmul.mubr.bf16.gmra.mrb[156].mxu1 %v2151_v35  ;;  %v2034_v47 = vmax.f32 %v5045_v44, 0.0 }
 0x23b   : > { %3919 = vst.msk [vmem:[%s5622_s29 + $0xc4] sm:$0xf] %vm3869_vm0, %v4500_v43  ;;  %v5046_v46 = vpop.f32.mrb[162].mxu0  ;;  %v2032_v50 = vmax.f32 %v1713_v45, 0.0 }
 0x23c   : > { %v2035_v48 = vmax.f32 %v5046_v46, 0.0  ;;  %v1716_v49 = vpop.f32.mrb[163].mxu0 }
 0x23d   : > { %v2033_v51 = vmax.f32 %v1716_v49, 0.0  ;;  %v5153_v52 = vpop.f32.mrb[52].mxu1 }
 0x23e   : > { %v2153_v53 = vpack.c.bf16 %v2035_v48, %v2034_v47  ;;  %v4505_v54 = vpack.c.bf16 %v5153_v52, %v5153_v52  ;;  %v2478_v55 = vpop.f32.mrb[53].mxu1 }
 0x23f   : > { %v2152_v56 = vpack.c.bf16 %v2033_v51, %v2032_v50  ;;  %v4503_v57 = vpack.c.bf16 %v2478_v55, %v2478_v55  ;;  %v5154_v58 = vpop.f32.mrb[54].mxu1 }
 0x240   : > { %3924 = vst.msk [vmem:[%s5622_s29 + $0xd8] sm:$0xf] %vm3869_vm0, %v4505_v54  ;;  %v4506_v59 = vpack.c.bf16 %v5154_v58, %v5154_v58  ;;  %v2481_v60 = vpop.f32.mrb[55].mxu1 }
 0x241   : > { %3922 = vst.msk [vmem:[%s5622_s29 + $0xd0] sm:$0xf] %vm3869_vm0, %v4503_v57  ;;  %v4504_v61 = vpack.c.bf16 %v2481_v60, %v2481_v60  ;;  %v5049_v62 = vpop.f32.mrb[164].mxu0  ;;  %5259 = vmatprep.mubr.bf16.mxu1 %v2152_v56 }
 0x242   : > { %3925 = vst.msk [vmem:[%s5622_s29 + $0xdc] sm:$0xf] %vm3869_vm0, %v4506_v59  ;;  %v1729_v63 = vpop.f32.mrb[165].mxu0  ;;  %5260 = vmatmul.mubr.bf16.gmra.mrb[160].mxu1 %v2153_v53  ;;  %v2038_v1 = vmax.f32 %v5049_v62, 0.0 }
 0x243   : > { %3923 = vst.msk [vmem:[%s5622_s29 + $0xd4] sm:$0xf] %vm3869_vm0, %v4504_v61  ;;  %v5050_v0 = vpop.f32.mrb[166].mxu0  ;;  %v2036_v4 = vmax.f32 %v1729_v63, 0.0 }
 0x244   : > { %v2039_v2 = vmax.f32 %v5050_v0, 0.0  ;;  %v1732_v3 = vpop.f32.mrb[167].mxu0 }
 0x245   : > { %v2037_v5 = vmax.f32 %v1732_v3, 0.0  ;;  %v5157_v6 = vpop.f32.mrb[56].mxu1 }
 0x246   : > { %v2155_v7 = vpack.c.bf16 %v2039_v2, %v2038_v1  ;;  %v4509_v8 = vpack.c.bf16 %v5157_v6, %v5157_v6  ;;  %v2494_v9 = vpop.f32.mrb[57].mxu1 }
 0x247   : > { %v2154_v10 = vpack.c.bf16 %v2037_v5, %v2036_v4  ;;  %v4507_v11 = vpack.c.bf16 %v2494_v9, %v2494_v9  ;;  %v5158_v12 = vpop.f32.mrb[58].mxu1 }
 0x248   : > { %3928 = vst.msk [vmem:[%s5622_s29 + $0xe8] sm:$0xf] %vm3869_vm0, %v4509_v8  ;;  %v4510_v13 = vpack.c.bf16 %v5158_v12, %v5158_v12  ;;  %v2497_v14 = vpop.f32.mrb[59].mxu1 }
 0x249   : > { %3926 = vst.msk [vmem:[%s5622_s29 + $0xe0] sm:$0xf] %vm3869_vm0, %v4507_v11  ;;  %v4508_v15 = vpack.c.bf16 %v2497_v14, %v2497_v14  ;;  %v5053_v16 = vpop.f32.mrb[168].mxu0  ;;  %5263 = vmatprep.mubr.bf16.mxu1 %v2154_v10 }
 0x24a   : > { %3929 = vst.msk [vmem:[%s5622_s29 + $0xec] sm:$0xf] %vm3869_vm0, %v4510_v13  ;;  %v1745_v17 = vpop.f32.mrb[169].mxu0  ;;  %5264 = vmatmul.mubr.bf16.gmra.mrb[164].mxu1 %v2155_v7  ;;  %v2042_v19 = vmax.f32 %v5053_v16, 0.0 }
 0x24b   : > { %3927 = vst.msk [vmem:[%s5622_s29 + $0xe4] sm:$0xf] %vm3869_vm0, %v4508_v15  ;;  %v5054_v18 = vpop.f32.mrb[170].mxu0  ;;  %v2040_v22 = vmax.f32 %v1745_v17, 0.0 }
 0x24c   : > { %v2043_v20 = vmax.f32 %v5054_v18, 0.0  ;;  %v1748_v21 = vpop.f32.mrb[171].mxu0 }
 0x24d   : > { %v2041_v23 = vmax.f32 %v1748_v21, 0.0  ;;  %v5161_v24 = vpop.f32.mrb[60].mxu1 }
 0x24e   : > { %v2157_v25 = vpack.c.bf16 %v2043_v20, %v2042_v19  ;;  %v4513_v26 = vpack.c.bf16 %v5161_v24, %v5161_v24  ;;  %v2510_v27 = vpop.f32.mrb[61].mxu1 }
 0x24f   : > { %v2156_v28 = vpack.c.bf16 %v2041_v23, %v2040_v22  ;;  %v4511_v29 = vpack.c.bf16 %v2510_v27, %v2510_v27  ;;  %v5162_v30 = vpop.f32.mrb[62].mxu1 }
 0x250   : > { %3932 = vst.msk [vmem:[%s5622_s29 + $0xf8] sm:$0xf] %vm3869_vm0, %v4513_v26  ;;  %v4514_v31 = vpack.c.bf16 %v5162_v30, %v5162_v30  ;;  %v2513_v32 = vpop.f32.mrb[63].mxu1 }
 0x251   : > { %3930 = vst.msk [vmem:[%s5622_s29 + $0xf0] sm:$0xf] %vm3869_vm0, %v4511_v29  ;;  %v4512_v33 = vpack.c.bf16 %v2513_v32, %v2513_v32  ;;  %v5057_v34 = vpop.f32.mrb[172].mxu0  ;;  %5267 = vmatprep.mubr.bf16.mxu1 %v2156_v28 }
 0x252   : > { %3933 = vst.msk [vmem:[%s5622_s29 + $0xfc] sm:$0xf] %vm3869_vm0, %v4514_v31  ;;  %v1761_v35 = vpop.f32.mrb[173].mxu0  ;;  %5268 = vmatmul.mubr.bf16.gmra.mrb[168].mxu1 %v2157_v25  ;;  %v2046_v37 = vmax.f32 %v5057_v34, 0.0 }
 0x253   : > { %3931 = vst.msk [vmem:[%s5622_s29 + $0xf4] sm:$0xf] %vm3869_vm0, %v4512_v33  ;;  %v5058_v36 = vpop.f32.mrb[174].mxu0  ;;  %v2044_v40 = vmax.f32 %v1761_v35, 0.0 }
 0x254   : > { %v2047_v38 = vmax.f32 %v5058_v36, 0.0  ;;  %v1764_v39 = vpop.f32.mrb[175].mxu0 }
 0x255   : > { %v2045_v41 = vmax.f32 %v1764_v39, 0.0  ;;  %v5165_v42 = vpop.f32.mrb[64].mxu1 }
 0x256   : > { %v2159_v43 = vpack.c.bf16 %v2047_v38, %v2046_v37  ;;  %v4517_v44 = vpack.c.bf16 %v5165_v42, %v5165_v42  ;;  %v2526_v45 = vpop.f32.mrb[65].mxu1 }
 0x257   : > { %v2158_v46 = vpack.c.bf16 %v2045_v41, %v2044_v40  ;;  %v4515_v47 = vpack.c.bf16 %v2526_v45, %v2526_v45  ;;  %v5166_v48 = vpop.f32.mrb[66].mxu1 }
 0x258   : > { %3936 = vst.msk [vmem:[%s5622_s29 + $0x108] sm:$0xf] %vm3869_vm0, %v4517_v44  ;;  %v4518_v49 = vpack.c.bf16 %v5166_v48, %v5166_v48  ;;  %v2529_v50 = vpop.f32.mrb[67].mxu1 }
 0x259   : > { %3934 = vst.msk [vmem:[%s5622_s29 + $0x100] sm:$0xf] %vm3869_vm0, %v4515_v47  ;;  %v4516_v51 = vpack.c.bf16 %v2529_v50, %v2529_v50  ;;  %v5061_v52 = vpop.f32.mrb[176].mxu0  ;;  %5271 = vmatprep.mubr.bf16.mxu1 %v2158_v46 }
 0x25a   : > { %3937 = vst.msk [vmem:[%s5622_s29 + $0x10c] sm:$0xf] %vm3869_vm0, %v4518_v49  ;;  %v1777_v53 = vpop.f32.mrb[177].mxu0  ;;  %5272 = vmatmul.mubr.bf16.gmra.mrb[172].mxu1 %v2159_v43  ;;  %v2050_v55 = vmax.f32 %v5061_v52, 0.0 }
 0x25b   : > { %3935 = vst.msk [vmem:[%s5622_s29 + $0x104] sm:$0xf] %vm3869_vm0, %v4516_v51  ;;  %v5062_v54 = vpop.f32.mrb[178].mxu0  ;;  %v2048_v58 = vmax.f32 %v1777_v53, 0.0 }
 0x25c   : > { %v2051_v56 = vmax.f32 %v5062_v54, 0.0  ;;  %v1780_v57 = vpop.f32.mrb[179].mxu0 }
 0x25d   : > { %v2049_v59 = vmax.f32 %v1780_v57, 0.0  ;;  %v5169_v60 = vpop.f32.mrb[68].mxu1 }
 0x25e   : > { %v2161_v61 = vpack.c.bf16 %v2051_v56, %v2050_v55  ;;  %v4521_v62 = vpack.c.bf16 %v5169_v60, %v5169_v60  ;;  %v2542_v63 = vpop.f32.mrb[69].mxu1 }
 0x25f   : > { %v2160_v0 = vpack.c.bf16 %v2049_v59, %v2048_v58  ;;  %v4519_v1 = vpack.c.bf16 %v2542_v63, %v2542_v63  ;;  %v5170_v2 = vpop.f32.mrb[70].mxu1 }
 0x260   : > { %3940 = vst.msk [vmem:[%s5622_s29 + $0x118] sm:$0xf] %vm3869_vm0, %v4521_v62  ;;  %v4522_v3 = vpack.c.bf16 %v5170_v2, %v5170_v2  ;;  %v2545_v4 = vpop.f32.mrb[71].mxu1 }
 0x261   : > { %3938 = vst.msk [vmem:[%s5622_s29 + $0x110] sm:$0xf] %vm3869_vm0, %v4519_v1  ;;  %v4520_v5 = vpack.c.bf16 %v2545_v4, %v2545_v4  ;;  %v5065_v6 = vpop.f32.mrb[180].mxu0  ;;  %5275 = vmatprep.mubr.bf16.mxu1 %v2160_v0 }
 0x262   : > { %3941 = vst.msk [vmem:[%s5622_s29 + $0x11c] sm:$0xf] %vm3869_vm0, %v4522_v3  ;;  %v1793_v7 = vpop.f32.mrb[181].mxu0  ;;  %5276 = vmatmul.mubr.bf16.gmra.mrb[176].mxu1 %v2161_v61  ;;  %v2054_v9 = vmax.f32 %v5065_v6, 0.0 }
 0x263   : > { %3939 = vst.msk [vmem:[%s5622_s29 + $0x114] sm:$0xf] %vm3869_vm0, %v4520_v5  ;;  %v5066_v8 = vpop.f32.mrb[182].mxu0  ;;  %v2052_v12 = vmax.f32 %v1793_v7, 0.0 }
 0x264   : > { %v2055_v10 = vmax.f32 %v5066_v8, 0.0  ;;  %v1796_v11 = vpop.f32.mrb[183].mxu0 }
 0x265   : > { %v2053_v13 = vmax.f32 %v1796_v11, 0.0  ;;  %v5173_v14 = vpop.f32.mrb[72].mxu1 }
 0x266   : > { %v2163_v15 = vpack.c.bf16 %v2055_v10, %v2054_v9  ;;  %v4525_v16 = vpack.c.bf16 %v5173_v14, %v5173_v14  ;;  %v2558_v17 = vpop.f32.mrb[73].mxu1 }
 0x267   : > { %v2162_v18 = vpack.c.bf16 %v2053_v13, %v2052_v12  ;;  %v4523_v19 = vpack.c.bf16 %v2558_v17, %v2558_v17  ;;  %v5174_v20 = vpop.f32.mrb[74].mxu1 }
 0x268   : > { %3944 = vst.msk [vmem:[%s5622_s29 + $0x128] sm:$0xf] %vm3869_vm0, %v4525_v16  ;;  %v4526_v21 = vpack.c.bf16 %v5174_v20, %v5174_v20  ;;  %v2561_v22 = vpop.f32.mrb[75].mxu1 }
 0x269   : > { %3942 = vst.msk [vmem:[%s5622_s29 + $0x120] sm:$0xf] %vm3869_vm0, %v4523_v19  ;;  %v4524_v23 = vpack.c.bf16 %v2561_v22, %v2561_v22  ;;  %v5069_v24 = vpop.f32.mrb[184].mxu0  ;;  %5279 = vmatprep.mubr.bf16.mxu1 %v2162_v18 }
 0x26a   : > { %3945 = vst.msk [vmem:[%s5622_s29 + $0x12c] sm:$0xf] %vm3869_vm0, %v4526_v21  ;;  %v1809_v25 = vpop.f32.mrb[185].mxu0  ;;  %5280 = vmatmul.mubr.bf16.gmra.mrb[180].mxu1 %v2163_v15  ;;  %v2058_v27 = vmax.f32 %v5069_v24, 0.0 }
 0x26b   : > { %3943 = vst.msk [vmem:[%s5622_s29 + $0x124] sm:$0xf] %vm3869_vm0, %v4524_v23  ;;  %v5070_v26 = vpop.f32.mrb[186].mxu0  ;;  %v2056_v30 = vmax.f32 %v1809_v25, 0.0 }
 0x26c   : > { %v2059_v28 = vmax.f32 %v5070_v26, 0.0  ;;  %v1812_v29 = vpop.f32.mrb[187].mxu0 }
 0x26d   : > { %v2057_v31 = vmax.f32 %v1812_v29, 0.0  ;;  %v5177_v32 = vpop.f32.mrb[76].mxu1 }
 0x26e   : > { %v2165_v33 = vpack.c.bf16 %v2059_v28, %v2058_v27  ;;  %v4529_v34 = vpack.c.bf16 %v5177_v32, %v5177_v32  ;;  %v2574_v35 = vpop.f32.mrb[77].mxu1 }
 0x26f   : > { %v2164_v36 = vpack.c.bf16 %v2057_v31, %v2056_v30  ;;  %v4527_v37 = vpack.c.bf16 %v2574_v35, %v2574_v35  ;;  %v5178_v38 = vpop.f32.mrb[78].mxu1 }
 0x270   : > { %3948 = vst.msk [vmem:[%s5622_s29 + $0x138] sm:$0xf] %vm3869_vm0, %v4529_v34  ;;  %v4530_v39 = vpack.c.bf16 %v5178_v38, %v5178_v38  ;;  %v2577_v40 = vpop.f32.mrb[79].mxu1 }
 0x271   : > { %3946 = vst.msk [vmem:[%s5622_s29 + $0x130] sm:$0xf] %vm3869_vm0, %v4527_v37  ;;  %v4528_v41 = vpack.c.bf16 %v2577_v40, %v2577_v40  ;;  %v5073_v42 = vpop.f32.mrb[188].mxu0  ;;  %5283 = vmatprep.mubr.bf16.mxu1 %v2164_v36 }
 0x272   : > { %3949 = vst.msk [vmem:[%s5622_s29 + $0x13c] sm:$0xf] %vm3869_vm0, %v4530_v39  ;;  %v1825_v43 = vpop.f32.mrb[189].mxu0  ;;  %5284 = vmatmul.mubr.bf16.gmra.mrb[184].mxu1 %v2165_v33  ;;  %v2062_v45 = vmax.f32 %v5073_v42, 0.0 }
 0x273   : > { %3947 = vst.msk [vmem:[%s5622_s29 + $0x134] sm:$0xf] %vm3869_vm0, %v4528_v41  ;;  %v5074_v44 = vpop.f32.mrb[190].mxu0  ;;  %v2060_v48 = vmax.f32 %v1825_v43, 0.0 }
 0x274   : > { %v2063_v46 = vmax.f32 %v5074_v44, 0.0  ;;  %v1828_v47 = vpop.f32.mrb[191].mxu0 }
 0x275   : > { %v2061_v49 = vmax.f32 %v1828_v47, 0.0  ;;  %v5181_v50 = vpop.f32.mrb[80].mxu1 }
 0x276   : > { %v2167_v51 = vpack.c.bf16 %v2063_v46, %v2062_v45  ;;  %v4533_v52 = vpack.c.bf16 %v5181_v50, %v5181_v50  ;;  %v2590_v53 = vpop.f32.mrb[81].mxu1 }
 0x277   : > { %v2166_v54 = vpack.c.bf16 %v2061_v49, %v2060_v48  ;;  %v4531_v55 = vpack.c.bf16 %v2590_v53, %v2590_v53  ;;  %v5182_v56 = vpop.f32.mrb[82].mxu1 }
 0x278   : > { %3952 = vst.msk [vmem:[%s5622_s29 + $0x148] sm:$0xf] %vm3869_vm0, %v4533_v52  ;;  %v4534_v57 = vpack.c.bf16 %v5182_v56, %v5182_v56  ;;  %v2593_v58 = vpop.f32.mrb[83].mxu1 }
 0x279   : > { %3950 = vst.msk [vmem:[%s5622_s29 + $0x140] sm:$0xf] %vm3869_vm0, %v4531_v55  ;;  %v4532_v59 = vpack.c.bf16 %v2593_v58, %v2593_v58  ;;  %v5077_v60 = vpop.f32.mrb[192].mxu0  ;;  %5287 = vmatprep.mubr.bf16.mxu1 %v2166_v54 }
 0x27a   : > { %3953 = vst.msk [vmem:[%s5622_s29 + $0x14c] sm:$0xf] %vm3869_vm0, %v4534_v57  ;;  %v1841_v61 = vpop.f32.mrb[193].mxu0  ;;  %5288 = vmatmul.mubr.bf16.gmra.mrb[188].mxu1 %v2167_v51  ;;  %v2066_v63 = vmax.f32 %v5077_v60, 0.0 }
 0x27b   : > { %3951 = vst.msk [vmem:[%s5622_s29 + $0x144] sm:$0xf] %vm3869_vm0, %v4532_v59  ;;  %v5078_v62 = vpop.f32.mrb[194].mxu0  ;;  %v2064_v2 = vmax.f32 %v1841_v61, 0.0 }
 0x27c   : > { %v2067_v0 = vmax.f32 %v5078_v62, 0.0  ;;  %v1844_v1 = vpop.f32.mrb[195].mxu0 }
 0x27d   : > { %v2065_v3 = vmax.f32 %v1844_v1, 0.0  ;;  %v5185_v4 = vpop.f32.mrb[84].mxu1 }
 0x27e   : > { %v2169_v5 = vpack.c.bf16 %v2067_v0, %v2066_v63  ;;  %v4537_v6 = vpack.c.bf16 %v5185_v4, %v5185_v4  ;;  %v2606_v7 = vpop.f32.mrb[85].mxu1 }
 0x27f   : > { %v2168_v8 = vpack.c.bf16 %v2065_v3, %v2064_v2  ;;  %v4535_v9 = vpack.c.bf16 %v2606_v7, %v2606_v7  ;;  %v5186_v10 = vpop.f32.mrb[86].mxu1 }
 0x280   : > { %3956 = vst.msk [vmem:[%s5622_s29 + $0x158] sm:$0xf] %vm3869_vm0, %v4537_v6  ;;  %v4538_v11 = vpack.c.bf16 %v5186_v10, %v5186_v10  ;;  %v2609_v12 = vpop.f32.mrb[87].mxu1 }
 0x281   : > { %3954 = vst.msk [vmem:[%s5622_s29 + $0x150] sm:$0xf] %vm3869_vm0, %v4535_v9  ;;  %v4536_v13 = vpack.c.bf16 %v2609_v12, %v2609_v12  ;;  %v5081_v14 = vpop.f32.mrb[196].mxu0  ;;  %5291 = vmatprep.mubr.bf16.mxu1 %v2168_v8 }
 0x282   : > { %3957 = vst.msk [vmem:[%s5622_s29 + $0x15c] sm:$0xf] %vm3869_vm0, %v4538_v11  ;;  %v1857_v15 = vpop.f32.mrb[197].mxu0  ;;  %5292 = vmatmul.mubr.bf16.gmra.mrb[192].mxu1 %v2169_v5  ;;  %v2070_v17 = vmax.f32 %v5081_v14, 0.0 }
 0x283   : > { %3955 = vst.msk [vmem:[%s5622_s29 + $0x154] sm:$0xf] %vm3869_vm0, %v4536_v13  ;;  %v5082_v16 = vpop.f32.mrb[198].mxu0  ;;  %v2068_v20 = vmax.f32 %v1857_v15, 0.0 }
 0x284   : > { %v2071_v18 = vmax.f32 %v5082_v16, 0.0  ;;  %v1860_v19 = vpop.f32.mrb[199].mxu0 }
 0x285   : > { %v2069_v21 = vmax.f32 %v1860_v19, 0.0  ;;  %v5189_v22 = vpop.f32.mrb[88].mxu1 }
 0x286   : > { %v2171_v23 = vpack.c.bf16 %v2071_v18, %v2070_v17  ;;  %v4541_v24 = vpack.c.bf16 %v5189_v22, %v5189_v22  ;;  %v2622_v25 = vpop.f32.mrb[89].mxu1 }
 0x287   : > { %v2170_v26 = vpack.c.bf16 %v2069_v21, %v2068_v20  ;;  %v4539_v27 = vpack.c.bf16 %v2622_v25, %v2622_v25  ;;  %v5190_v28 = vpop.f32.mrb[90].mxu1 }
 0x288   : > { %3960 = vst.msk [vmem:[%s5622_s29 + $0x168] sm:$0xf] %vm3869_vm0, %v4541_v24  ;;  %v4542_v29 = vpack.c.bf16 %v5190_v28, %v5190_v28  ;;  %v2625_v30 = vpop.f32.mrb[91].mxu1 }
 0x289   : > { %3958 = vst.msk [vmem:[%s5622_s29 + $0x160] sm:$0xf] %vm3869_vm0, %v4539_v27  ;;  %v4540_v31 = vpack.c.bf16 %v2625_v30, %v2625_v30  ;;  %5295 = vmatprep.mubr.bf16.mxu1 %v2170_v26 }
 0x28a   : > { %3961 = vst.msk [vmem:[%s5622_s29 + $0x16c] sm:$0xf] %vm3869_vm0, %v4542_v29  ;;  %5296 = vmatmul.mubr.bf16.gmra.mrb[196].mxu1 %v2171_v23 }
 0x28b   : > { %3959 = vst.msk [vmem:[%s5622_s29 + $0x164] sm:$0xf] %vm3869_vm0, %v4540_v31 }
 0x28d   : > { %v5193_v32 = vpop.f32.mrb[92].mxu1 }
 0x28e   : > { %v4545_v33 = vpack.c.bf16 %v5193_v32, %v5193_v32  ;;  %v2638_v34 = vpop.f32.mrb[93].mxu1 }
 0x28f   : > { %v4543_v35 = vpack.c.bf16 %v2638_v34, %v2638_v34  ;;  %v5194_v36 = vpop.f32.mrb[94].mxu1 }
 0x290   : > { %3964 = vst.msk [vmem:[%s5622_s29 + $0x178] sm:$0xf] %vm3869_vm0, %v4545_v33  ;;  %v4546_v37 = vpack.c.bf16 %v5194_v36, %v5194_v36  ;;  %v2641_v38 = vpop.f32.mrb[95].mxu1 }
 0x291   : > { %3962 = vst.msk [vmem:[%s5622_s29 + $0x170] sm:$0xf] %vm3869_vm0, %v4543_v35  ;;  %v4544_v39 = vpack.c.bf16 %v2641_v38, %v2641_v38 }
 0x292   : > { %3965 = vst.msk [vmem:[%s5622_s29 + $0x17c] sm:$0xf] %vm3869_vm0, %v4546_v37 }
 0x293   : > { %3963 = vst.msk [vmem:[%s5622_s29 + $0x174] sm:$0xf] %vm3869_vm0, %v4544_v39 }
 0x295   : > { %v5197_v40 = vpop.f32.mrb[96].mxu1 }
 0x296   : > { %v4549_v41 = vpack.c.bf16 %v5197_v40, %v5197_v40  ;;  %v2654_v42 = vpop.f32.mrb[97].mxu1 }
 0x297   : > { %v4547_v43 = vpack.c.bf16 %v2654_v42, %v2654_v42  ;;  %v5198_v44 = vpop.f32.mrb[98].mxu1 }
 0x298   : > { %3968 = vst.msk [vmem:[%s5622_s29 + $0x188] sm:$0xf] %vm3869_vm0, %v4549_v41  ;;  %v4550_v45 = vpack.c.bf16 %v5198_v44, %v5198_v44  ;;  %v2657_v46 = vpop.f32.mrb[99].mxu1 }
 0x299   : > { %3966 = vst.msk [vmem:[%s5622_s29 + $0x180] sm:$0xf] %vm3869_vm0, %v4547_v43  ;;  %v4548_v47 = vpack.c.bf16 %v2657_v46, %v2657_v46 }
 0x29a   : > { %3969 = vst.msk [vmem:[%s5622_s29 + $0x18c] sm:$0xf] %vm3869_vm0, %v4550_v45 }
 0x29b   : > { %3967 = vst.msk [vmem:[%s5622_s29 + $0x184] sm:$0xf] %vm3869_vm0, %v4548_v47 }
 0x29d   : > { %v5201_v48 = vpop.f32.mrb[100].mxu1 }
 0x29e   : > { %v4553_v49 = vpack.c.bf16 %v5201_v48, %v5201_v48  ;;  %v2670_v50 = vpop.f32.mrb[101].mxu1 }
 0x29f   : > { %v4551_v51 = vpack.c.bf16 %v2670_v50, %v2670_v50  ;;  %v5202_v52 = vpop.f32.mrb[102].mxu1 }
 0x2a0   : > { %3972 = vst.msk [vmem:[%s5622_s29 + $0x198] sm:$0xf] %vm3869_vm0, %v4553_v49  ;;  %v4554_v53 = vpack.c.bf16 %v5202_v52, %v5202_v52  ;;  %v2673_v54 = vpop.f32.mrb[103].mxu1 }
 0x2a1   : > { %3970 = vst.msk [vmem:[%s5622_s29 + $0x190] sm:$0xf] %vm3869_vm0, %v4551_v51  ;;  %v4552_v55 = vpack.c.bf16 %v2673_v54, %v2673_v54 }
 0x2a2   : > { %3973 = vst.msk [vmem:[%s5622_s29 + $0x19c] sm:$0xf] %vm3869_vm0, %v4554_v53 }
 0x2a3   : > { %3971 = vst.msk [vmem:[%s5622_s29 + $0x194] sm:$0xf] %vm3869_vm0, %v4552_v55 }
 0x2a5   : > { %v5205_v56 = vpop.f32.mrb[104].mxu1 }
 0x2a6   : > { %v4557_v57 = vpack.c.bf16 %v5205_v56, %v5205_v56  ;;  %v2686_v58 = vpop.f32.mrb[105].mxu1 }
 0x2a7   : > { %v4555_v59 = vpack.c.bf16 %v2686_v58, %v2686_v58  ;;  %v5206_v60 = vpop.f32.mrb[106].mxu1 }
 0x2a8   : > { %3976 = vst.msk [vmem:[%s5622_s29 + $0x1a8] sm:$0xf] %vm3869_vm0, %v4557_v57  ;;  %v4558_v61 = vpack.c.bf16 %v5206_v60, %v5206_v60  ;;  %v2689_v62 = vpop.f32.mrb[107].mxu1 }
 0x2a9   : > { %3974 = vst.msk [vmem:[%s5622_s29 + $0x1a0] sm:$0xf] %vm3869_vm0, %v4555_v59  ;;  %v4556_v63 = vpack.c.bf16 %v2689_v62, %v2689_v62 }
 0x2aa   : > { %3977 = vst.msk [vmem:[%s5622_s29 + $0x1ac] sm:$0xf] %vm3869_vm0, %v4558_v61 }
 0x2ab   : > { %3975 = vst.msk [vmem:[%s5622_s29 + $0x1a4] sm:$0xf] %vm3869_vm0, %v4556_v63 }
 0x2ad   : > { %v5209_v0 = vpop.f32.mrb[108].mxu1 }
 0x2ae   : > { %v4561_v1 = vpack.c.bf16 %v5209_v0, %v5209_v0  ;;  %v2702_v2 = vpop.f32.mrb[109].mxu1 }
 0x2af   : > { %v4559_v3 = vpack.c.bf16 %v2702_v2, %v2702_v2  ;;  %v5210_v4 = vpop.f32.mrb[110].mxu1 }
 0x2b0   : > { %3980 = vst.msk [vmem:[%s5622_s29 + $0x1b8] sm:$0xf] %vm3869_vm0, %v4561_v1  ;;  %v4562_v5 = vpack.c.bf16 %v5210_v4, %v5210_v4  ;;  %v2705_v6 = vpop.f32.mrb[111].mxu1 }
 0x2b1   : > { %3978 = vst.msk [vmem:[%s5622_s29 + $0x1b0] sm:$0xf] %vm3869_vm0, %v4559_v3  ;;  %v4560_v7 = vpack.c.bf16 %v2705_v6, %v2705_v6 }
 0x2b2   : > { %3981 = vst.msk [vmem:[%s5622_s29 + $0x1bc] sm:$0xf] %vm3869_vm0, %v4562_v5 }
 0x2b3   : > { %3979 = vst.msk [vmem:[%s5622_s29 + $0x1b4] sm:$0xf] %vm3869_vm0, %v4560_v7 }
 0x2b5   : > { %v5213_v8 = vpop.f32.mrb[112].mxu1 }
 0x2b6   : > { %v4565_v9 = vpack.c.bf16 %v5213_v8, %v5213_v8  ;;  %v2718_v10 = vpop.f32.mrb[113].mxu1 }
 0x2b7   : > { %v4563_v11 = vpack.c.bf16 %v2718_v10, %v2718_v10  ;;  %v5214_v12 = vpop.f32.mrb[114].mxu1 }
 0x2b8   : > { %3984 = vst.msk [vmem:[%s5622_s29 + $0x1c8] sm:$0xf] %vm3869_vm0, %v4565_v9  ;;  %v4566_v13 = vpack.c.bf16 %v5214_v12, %v5214_v12  ;;  %v2721_v14 = vpop.f32.mrb[115].mxu1 }
 0x2b9   : > { %3982 = vst.msk [vmem:[%s5622_s29 + $0x1c0] sm:$0xf] %vm3869_vm0, %v4563_v11  ;;  %v4564_v15 = vpack.c.bf16 %v2721_v14, %v2721_v14 }
 0x2ba   : > { %3985 = vst.msk [vmem:[%s5622_s29 + $0x1cc] sm:$0xf] %vm3869_vm0, %v4566_v13 }
 0x2bb   : > { %3983 = vst.msk [vmem:[%s5622_s29 + $0x1c4] sm:$0xf] %vm3869_vm0, %v4564_v15 }
 0x2bd   : > { %v5217_v16 = vpop.f32.mrb[116].mxu1 }
 0x2be   : > { %v4569_v17 = vpack.c.bf16 %v5217_v16, %v5217_v16  ;;  %v2734_v18 = vpop.f32.mrb[117].mxu1 }
 0x2bf   : > { %v4567_v19 = vpack.c.bf16 %v2734_v18, %v2734_v18  ;;  %v5218_v20 = vpop.f32.mrb[118].mxu1 }
 0x2c0   : > { %3988 = vst.msk [vmem:[%s5622_s29 + $0x1d8] sm:$0xf] %vm3869_vm0, %v4569_v17  ;;  %v4570_v21 = vpack.c.bf16 %v5218_v20, %v5218_v20  ;;  %v2737_v22 = vpop.f32.mrb[119].mxu1 }
 0x2c1   : > { %3986 = vst.msk [vmem:[%s5622_s29 + $0x1d0] sm:$0xf] %vm3869_vm0, %v4567_v19  ;;  %v4568_v23 = vpack.c.bf16 %v2737_v22, %v2737_v22 }
 0x2c2   : > { %3989 = vst.msk [vmem:[%s5622_s29 + $0x1dc] sm:$0xf] %vm3869_vm0, %v4570_v21 }
 0x2c3   : > { %3987 = vst.msk [vmem:[%s5622_s29 + $0x1d4] sm:$0xf] %vm3869_vm0, %v4568_v23 }
 0x2c5   : > { %v5221_v24 = vpop.f32.mrb[120].mxu1 }
 0x2c6   : > { %v4573_v25 = vpack.c.bf16 %v5221_v24, %v5221_v24  ;;  %v2750_v26 = vpop.f32.mrb[121].mxu1 }
 0x2c7   : > { %v4571_v27 = vpack.c.bf16 %v2750_v26, %v2750_v26  ;;  %v5222_v28 = vpop.f32.mrb[122].mxu1 }
 0x2c8   : > { %3992 = vst.msk [vmem:[%s5622_s29 + $0x1e8] sm:$0xf] %vm3869_vm0, %v4573_v25  ;;  %v4574_v29 = vpack.c.bf16 %v5222_v28, %v5222_v28  ;;  %v2753_v30 = vpop.f32.mrb[123].mxu1 }
 0x2c9   : > { %3990 = vst.msk [vmem:[%s5622_s29 + $0x1e0] sm:$0xf] %vm3869_vm0, %v4571_v27  ;;  %v4572_v31 = vpack.c.bf16 %v2753_v30, %v2753_v30 }
 0x2ca   : > { %3993 = vst.msk [vmem:[%s5622_s29 + $0x1ec] sm:$0xf] %vm3869_vm0, %v4574_v29 }
 0x2cb   : > { %3991 = vst.msk [vmem:[%s5622_s29 + $0x1e4] sm:$0xf] %vm3869_vm0, %v4572_v31 }
 0x2cd   : > { %v5225_v32 = vpop.f32.mrb[124].mxu1 }
 0x2ce   : > { %v4577_v33 = vpack.c.bf16 %v5225_v32, %v5225_v32  ;;  %v2766_v34 = vpop.f32.mrb[125].mxu1 }
 0x2cf   : > { %v4575_v35 = vpack.c.bf16 %v2766_v34, %v2766_v34  ;;  %v5226_v36 = vpop.f32.mrb[126].mxu1 }
 0x2d0   : > { %3996 = vst.msk [vmem:[%s5622_s29 + $0x1f8] sm:$0xf] %vm3869_vm0, %v4577_v33  ;;  %v4578_v37 = vpack.c.bf16 %v5226_v36, %v5226_v36  ;;  %v2769_v38 = vpop.f32.mrb[127].mxu1 }
 0x2d1   : > { %3994 = vst.msk [vmem:[%s5622_s29 + $0x1f0] sm:$0xf] %vm3869_vm0, %v4575_v35  ;;  %v4576_v39 = vpack.c.bf16 %v2769_v38, %v2769_v38 }
 0x2d2   : > { %3997 = vst.msk [vmem:[%s5622_s29 + $0x1fc] sm:$0xf] %vm3869_vm0, %v4578_v37 }
 0x2d3   : > { %3995 = vst.msk [vmem:[%s5622_s29 + $0x1f4] sm:$0xf] %vm3869_vm0, %v4576_v39 }
 0x2d5   : > { %v5229_v40 = vpop.f32.mrb[128].mxu1 }
 0x2d6   : > { %v4581_v41 = vpack.c.bf16 %v5229_v40, %v5229_v40  ;;  %v2782_v42 = vpop.f32.mrb[129].mxu1 }
 0x2d7   : > { %v4579_v43 = vpack.c.bf16 %v2782_v42, %v2782_v42  ;;  %v5230_v44 = vpop.f32.mrb[130].mxu1 }
 0x2d8   : > { %4000 = vst.msk [vmem:[%s5622_s29 + $0x208] sm:$0xf] %vm3869_vm0, %v4581_v41  ;;  %v4582_v45 = vpack.c.bf16 %v5230_v44, %v5230_v44  ;;  %v2785_v46 = vpop.f32.mrb[131].mxu1 }
 0x2d9   : > { %3998 = vst.msk [vmem:[%s5622_s29 + $0x200] sm:$0xf] %vm3869_vm0, %v4579_v43  ;;  %v4580_v47 = vpack.c.bf16 %v2785_v46, %v2785_v46 }
 0x2da   : > { %4001 = vst.msk [vmem:[%s5622_s29 + $0x20c] sm:$0xf] %vm3869_vm0, %v4582_v45 }
 0x2db   : > { %3999 = vst.msk [vmem:[%s5622_s29 + $0x204] sm:$0xf] %vm3869_vm0, %v4580_v47 }
 0x2dd   : > { %v5233_v48 = vpop.f32.mrb[132].mxu1 }
 0x2de   : > { %v4585_v49 = vpack.c.bf16 %v5233_v48, %v5233_v48  ;;  %v2798_v50 = vpop.f32.mrb[133].mxu1 }
 0x2df   : > { %v4583_v51 = vpack.c.bf16 %v2798_v50, %v2798_v50  ;;  %v5234_v52 = vpop.f32.mrb[134].mxu1 }
 0x2e0   : > { %4004 = vst.msk [vmem:[%s5622_s29 + $0x218] sm:$0xf] %vm3869_vm0, %v4585_v49  ;;  %v4586_v53 = vpack.c.bf16 %v5234_v52, %v5234_v52  ;;  %v2801_v54 = vpop.f32.mrb[135].mxu1 }
 0x2e1   : > { %4002 = vst.msk [vmem:[%s5622_s29 + $0x210] sm:$0xf] %vm3869_vm0, %v4583_v51  ;;  %v4584_v55 = vpack.c.bf16 %v2801_v54, %v2801_v54 }
 0x2e2   : > { %4005 = vst.msk [vmem:[%s5622_s29 + $0x21c] sm:$0xf] %vm3869_vm0, %v4586_v53 }
 0x2e3   : > { %4003 = vst.msk [vmem:[%s5622_s29 + $0x214] sm:$0xf] %vm3869_vm0, %v4584_v55 }
 0x2e5   : > { %v5237_v56 = vpop.f32.mrb[136].mxu1 }
 0x2e6   : > { %v4589_v57 = vpack.c.bf16 %v5237_v56, %v5237_v56  ;;  %v2814_v58 = vpop.f32.mrb[137].mxu1 }
 0x2e7   : > { %v4587_v59 = vpack.c.bf16 %v2814_v58, %v2814_v58  ;;  %v5238_v60 = vpop.f32.mrb[138].mxu1 }
 0x2e8   : > { %4008 = vst.msk [vmem:[%s5622_s29 + $0x228] sm:$0xf] %vm3869_vm0, %v4589_v57  ;;  %v4590_v61 = vpack.c.bf16 %v5238_v60, %v5238_v60  ;;  %v2817_v62 = vpop.f32.mrb[139].mxu1 }
 0x2e9   : > { %4006 = vst.msk [vmem:[%s5622_s29 + $0x220] sm:$0xf] %vm3869_vm0, %v4587_v59  ;;  %v4588_v63 = vpack.c.bf16 %v2817_v62, %v2817_v62 }
 0x2ea   : > { %4009 = vst.msk [vmem:[%s5622_s29 + $0x22c] sm:$0xf] %vm3869_vm0, %v4590_v61 }
 0x2eb   : > { %4007 = vst.msk [vmem:[%s5622_s29 + $0x224] sm:$0xf] %vm3869_vm0, %v4588_v63 }
 0x2ed   : > { %v5241_v0 = vpop.f32.mrb[140].mxu1 }
 0x2ee   : > { %v4593_v1 = vpack.c.bf16 %v5241_v0, %v5241_v0  ;;  %v2830_v2 = vpop.f32.mrb[141].mxu1 }
 0x2ef   : > { %v4591_v3 = vpack.c.bf16 %v2830_v2, %v2830_v2  ;;  %v5242_v4 = vpop.f32.mrb[142].mxu1 }
 0x2f0   : > { %4012 = vst.msk [vmem:[%s5622_s29 + $0x238] sm:$0xf] %vm3869_vm0, %v4593_v1  ;;  %v4594_v5 = vpack.c.bf16 %v5242_v4, %v5242_v4  ;;  %v2833_v6 = vpop.f32.mrb[143].mxu1 }
 0x2f1   : > { %4010 = vst.msk [vmem:[%s5622_s29 + $0x230] sm:$0xf] %vm3869_vm0, %v4591_v3  ;;  %v4592_v7 = vpack.c.bf16 %v2833_v6, %v2833_v6 }
 0x2f2   : > { %4013 = vst.msk [vmem:[%s5622_s29 + $0x23c] sm:$0xf] %vm3869_vm0, %v4594_v5 }
 0x2f3   : > { %4011 = vst.msk [vmem:[%s5622_s29 + $0x234] sm:$0xf] %vm3869_vm0, %v4592_v7 }
 0x2f5   : > { %v5245_v8 = vpop.f32.mrb[144].mxu1 }
 0x2f6   : > { %v4597_v9 = vpack.c.bf16 %v5245_v8, %v5245_v8  ;;  %v2846_v10 = vpop.f32.mrb[145].mxu1 }
 0x2f7   : > { %v4595_v11 = vpack.c.bf16 %v2846_v10, %v2846_v10  ;;  %v5246_v12 = vpop.f32.mrb[146].mxu1 }
 0x2f8   : > { %4016 = vst.msk [vmem:[%s5622_s29 + $0x248] sm:$0xf] %vm3869_vm0, %v4597_v9  ;;  %v4598_v13 = vpack.c.bf16 %v5246_v12, %v5246_v12  ;;  %v2849_v14 = vpop.f32.mrb[147].mxu1 }
 0x2f9   : > { %4014 = vst.msk [vmem:[%s5622_s29 + $0x240] sm:$0xf] %vm3869_vm0, %v4595_v11  ;;  %v4596_v15 = vpack.c.bf16 %v2849_v14, %v2849_v14 }
 0x2fa   : > { %4017 = vst.msk [vmem:[%s5622_s29 + $0x24c] sm:$0xf] %vm3869_vm0, %v4598_v13 }
 0x2fb   : > { %4015 = vst.msk [vmem:[%s5622_s29 + $0x244] sm:$0xf] %vm3869_vm0, %v4596_v15 }
 0x2fd   : > { %v5249_v16 = vpop.f32.mrb[148].mxu1 }
 0x2fe   : > { %v4601_v17 = vpack.c.bf16 %v5249_v16, %v5249_v16  ;;  %v2862_v18 = vpop.f32.mrb[149].mxu1 }
 0x2ff   : > { %v4599_v19 = vpack.c.bf16 %v2862_v18, %v2862_v18  ;;  %v5250_v20 = vpop.f32.mrb[150].mxu1 }
 0x300   : > { %4020 = vst.msk [vmem:[%s5622_s29 + $0x258] sm:$0xf] %vm3869_vm0, %v4601_v17  ;;  %v4602_v21 = vpack.c.bf16 %v5250_v20, %v5250_v20  ;;  %v2865_v22 = vpop.f32.mrb[151].mxu1 }
 0x301   : > { %4018 = vst.msk [vmem:[%s5622_s29 + $0x250] sm:$0xf] %vm3869_vm0, %v4599_v19  ;;  %v4600_v23 = vpack.c.bf16 %v2865_v22, %v2865_v22 }
 0x302   : > { %4021 = vst.msk [vmem:[%s5622_s29 + $0x25c] sm:$0xf] %vm3869_vm0, %v4602_v21 }
 0x303   : > { %4019 = vst.msk [vmem:[%s5622_s29 + $0x254] sm:$0xf] %vm3869_vm0, %v4600_v23 }
 0x305   : > { %v5253_v24 = vpop.f32.mrb[152].mxu1 }
 0x306   : > { %v4605_v25 = vpack.c.bf16 %v5253_v24, %v5253_v24  ;;  %v2878_v26 = vpop.f32.mrb[153].mxu1 }
 0x307   : > { %v4603_v27 = vpack.c.bf16 %v2878_v26, %v2878_v26  ;;  %v5254_v28 = vpop.f32.mrb[154].mxu1 }
 0x308   : > { %4024 = vst.msk [vmem:[%s5622_s29 + $0x268] sm:$0xf] %vm3869_vm0, %v4605_v25  ;;  %v4606_v29 = vpack.c.bf16 %v5254_v28, %v5254_v28  ;;  %v2881_v30 = vpop.f32.mrb[155].mxu1 }
 0x309   : > { %4022 = vst.msk [vmem:[%s5622_s29 + $0x260] sm:$0xf] %vm3869_vm0, %v4603_v27  ;;  %v4604_v31 = vpack.c.bf16 %v2881_v30, %v2881_v30 }
 0x30a   : > { %4025 = vst.msk [vmem:[%s5622_s29 + $0x26c] sm:$0xf] %vm3869_vm0, %v4606_v29 }
 0x30b   : > { %4023 = vst.msk [vmem:[%s5622_s29 + $0x264] sm:$0xf] %vm3869_vm0, %v4604_v31 }
 0x30d   : > { %v5257_v32 = vpop.f32.mrb[156].mxu1 }
 0x30e   : > { %v4609_v33 = vpack.c.bf16 %v5257_v32, %v5257_v32  ;;  %v2894_v34 = vpop.f32.mrb[157].mxu1 }
 0x30f   : > { %v4607_v35 = vpack.c.bf16 %v2894_v34, %v2894_v34  ;;  %v5258_v36 = vpop.f32.mrb[158].mxu1 }
 0x310   : > { %4028 = vst.msk [vmem:[%s5622_s29 + $0x278] sm:$0xf] %vm3869_vm0, %v4609_v33  ;;  %v4610_v37 = vpack.c.bf16 %v5258_v36, %v5258_v36  ;;  %v2897_v38 = vpop.f32.mrb[159].mxu1 }
 0x311   : > { %4026 = vst.msk [vmem:[%s5622_s29 + $0x270] sm:$0xf] %vm3869_vm0, %v4607_v35  ;;  %v4608_v39 = vpack.c.bf16 %v2897_v38, %v2897_v38 }
 0x312   : > { %4029 = vst.msk [vmem:[%s5622_s29 + $0x27c] sm:$0xf] %vm3869_vm0, %v4610_v37 }
 0x313   : > { %4027 = vst.msk [vmem:[%s5622_s29 + $0x274] sm:$0xf] %vm3869_vm0, %v4608_v39 }
 0x315   : > { %v5261_v40 = vpop.f32.mrb[160].mxu1 }
 0x316   : > { %v4613_v41 = vpack.c.bf16 %v5261_v40, %v5261_v40  ;;  %v2910_v42 = vpop.f32.mrb[161].mxu1 }
 0x317   : > { %v4611_v43 = vpack.c.bf16 %v2910_v42, %v2910_v42  ;;  %v5262_v44 = vpop.f32.mrb[162].mxu1 }
 0x318   : > { %4032 = vst.msk [vmem:[%s5622_s29 + $0x288] sm:$0xf] %vm3869_vm0, %v4613_v41  ;;  %v4614_v45 = vpack.c.bf16 %v5262_v44, %v5262_v44  ;;  %v2913_v46 = vpop.f32.mrb[163].mxu1 }
 0x319   : > { %4030 = vst.msk [vmem:[%s5622_s29 + $0x280] sm:$0xf] %vm3869_vm0, %v4611_v43  ;;  %v4612_v47 = vpack.c.bf16 %v2913_v46, %v2913_v46 }
 0x31a   : > { %4033 = vst.msk [vmem:[%s5622_s29 + $0x28c] sm:$0xf] %vm3869_vm0, %v4614_v45 }
 0x31b   : > { %4031 = vst.msk [vmem:[%s5622_s29 + $0x284] sm:$0xf] %vm3869_vm0, %v4612_v47 }
 0x31d   : > { %v5265_v48 = vpop.f32.mrb[164].mxu1 }
 0x31e   : > { %v4617_v49 = vpack.c.bf16 %v5265_v48, %v5265_v48  ;;  %v2926_v50 = vpop.f32.mrb[165].mxu1 }
 0x31f   : > { %v4615_v51 = vpack.c.bf16 %v2926_v50, %v2926_v50  ;;  %v5266_v52 = vpop.f32.mrb[166].mxu1 }
 0x320   : > { %4036 = vst.msk [vmem:[%s5622_s29 + $0x298] sm:$0xf] %vm3869_vm0, %v4617_v49  ;;  %v4618_v53 = vpack.c.bf16 %v5266_v52, %v5266_v52  ;;  %v2929_v54 = vpop.f32.mrb[167].mxu1 }
 0x321   : > { %4034 = vst.msk [vmem:[%s5622_s29 + $0x290] sm:$0xf] %vm3869_vm0, %v4615_v51  ;;  %v4616_v55 = vpack.c.bf16 %v2929_v54, %v2929_v54 }
 0x322   : > { %4037 = vst.msk [vmem:[%s5622_s29 + $0x29c] sm:$0xf] %vm3869_vm0, %v4618_v53 }
 0x323   : > { %4035 = vst.msk [vmem:[%s5622_s29 + $0x294] sm:$0xf] %vm3869_vm0, %v4616_v55 }
 0x325   : > { %v5269_v56 = vpop.f32.mrb[168].mxu1 }
 0x326   : > { %v4621_v57 = vpack.c.bf16 %v5269_v56, %v5269_v56  ;;  %v2942_v58 = vpop.f32.mrb[169].mxu1 }
 0x327   : > { %v4619_v59 = vpack.c.bf16 %v2942_v58, %v2942_v58  ;;  %v5270_v60 = vpop.f32.mrb[170].mxu1 }
 0x328   : > { %4040 = vst.msk [vmem:[%s5622_s29 + $0x2a8] sm:$0xf] %vm3869_vm0, %v4621_v57  ;;  %v4622_v61 = vpack.c.bf16 %v5270_v60, %v5270_v60  ;;  %v2945_v62 = vpop.f32.mrb[171].mxu1 }
 0x329   : > { %4038 = vst.msk [vmem:[%s5622_s29 + $0x2a0] sm:$0xf] %vm3869_vm0, %v4619_v59  ;;  %v4620_v63 = vpack.c.bf16 %v2945_v62, %v2945_v62 }
 0x32a   : > { %4041 = vst.msk [vmem:[%s5622_s29 + $0x2ac] sm:$0xf] %vm3869_vm0, %v4622_v61 }
 0x32b   : > { %4039 = vst.msk [vmem:[%s5622_s29 + $0x2a4] sm:$0xf] %vm3869_vm0, %v4620_v63 }
 0x32d   : > { %v5273_v0 = vpop.f32.mrb[172].mxu1 }
 0x32e   : > { %v4625_v1 = vpack.c.bf16 %v5273_v0, %v5273_v0  ;;  %v2958_v2 = vpop.f32.mrb[173].mxu1 }
 0x32f   : > { %v4623_v3 = vpack.c.bf16 %v2958_v2, %v2958_v2  ;;  %v5274_v4 = vpop.f32.mrb[174].mxu1 }
 0x330   : > { %4044 = vst.msk [vmem:[%s5622_s29 + $0x2b8] sm:$0xf] %vm3869_vm0, %v4625_v1  ;;  %v4626_v5 = vpack.c.bf16 %v5274_v4, %v5274_v4  ;;  %v2961_v6 = vpop.f32.mrb[175].mxu1 }
 0x331   : > { %4042 = vst.msk [vmem:[%s5622_s29 + $0x2b0] sm:$0xf] %vm3869_vm0, %v4623_v3  ;;  %v4624_v7 = vpack.c.bf16 %v2961_v6, %v2961_v6 }
 0x332   : > { %4045 = vst.msk [vmem:[%s5622_s29 + $0x2bc] sm:$0xf] %vm3869_vm0, %v4626_v5 }
 0x333   : > { %4043 = vst.msk [vmem:[%s5622_s29 + $0x2b4] sm:$0xf] %vm3869_vm0, %v4624_v7 }
 0x335   : > { %v5277_v8 = vpop.f32.mrb[176].mxu1 }
 0x336   : > { %v4629_v9 = vpack.c.bf16 %v5277_v8, %v5277_v8  ;;  %v2974_v10 = vpop.f32.mrb[177].mxu1 }
 0x337   : > { %v4627_v11 = vpack.c.bf16 %v2974_v10, %v2974_v10  ;;  %v5278_v12 = vpop.f32.mrb[178].mxu1 }
 0x338   : > { %4048 = vst.msk [vmem:[%s5622_s29 + $0x2c8] sm:$0xf] %vm3869_vm0, %v4629_v9  ;;  %v4630_v13 = vpack.c.bf16 %v5278_v12, %v5278_v12  ;;  %v2977_v14 = vpop.f32.mrb[179].mxu1 }
 0x339   : > { %4046 = vst.msk [vmem:[%s5622_s29 + $0x2c0] sm:$0xf] %vm3869_vm0, %v4627_v11  ;;  %v4628_v15 = vpack.c.bf16 %v2977_v14, %v2977_v14 }
 0x33a   : > { %4049 = vst.msk [vmem:[%s5622_s29 + $0x2cc] sm:$0xf] %vm3869_vm0, %v4630_v13 }
 0x33b   : > { %4047 = vst.msk [vmem:[%s5622_s29 + $0x2c4] sm:$0xf] %vm3869_vm0, %v4628_v15 }
 0x33d   : > { %v5281_v16 = vpop.f32.mrb[180].mxu1 }
 0x33e   : > { %v4633_v17 = vpack.c.bf16 %v5281_v16, %v5281_v16  ;;  %v2990_v18 = vpop.f32.mrb[181].mxu1 }
 0x33f   : > { %v4631_v19 = vpack.c.bf16 %v2990_v18, %v2990_v18  ;;  %v5282_v20 = vpop.f32.mrb[182].mxu1 }
 0x340   : > { %4052 = vst.msk [vmem:[%s5622_s29 + $0x2d8] sm:$0xf] %vm3869_vm0, %v4633_v17  ;;  %v4634_v21 = vpack.c.bf16 %v5282_v20, %v5282_v20  ;;  %v2993_v22 = vpop.f32.mrb[183].mxu1 }
 0x341   : > { %4050 = vst.msk [vmem:[%s5622_s29 + $0x2d0] sm:$0xf] %vm3869_vm0, %v4631_v19  ;;  %v4632_v23 = vpack.c.bf16 %v2993_v22, %v2993_v22 }
 0x342   : > { %4053 = vst.msk [vmem:[%s5622_s29 + $0x2dc] sm:$0xf] %vm3869_vm0, %v4634_v21 }
 0x343   : > { %4051 = vst.msk [vmem:[%s5622_s29 + $0x2d4] sm:$0xf] %vm3869_vm0, %v4632_v23 }
 0x345   : > { %v5285_v24 = vpop.f32.mrb[184].mxu1 }
 0x346   : > { %v4637_v25 = vpack.c.bf16 %v5285_v24, %v5285_v24  ;;  %v3006_v26 = vpop.f32.mrb[185].mxu1 }
 0x347   : > { %v4635_v27 = vpack.c.bf16 %v3006_v26, %v3006_v26  ;;  %v5286_v28 = vpop.f32.mrb[186].mxu1 }
 0x348   : > { %4056 = vst.msk [vmem:[%s5622_s29 + $0x2e8] sm:$0xf] %vm3869_vm0, %v4637_v25  ;;  %v4638_v29 = vpack.c.bf16 %v5286_v28, %v5286_v28  ;;  %v3009_v30 = vpop.f32.mrb[187].mxu1 }
 0x349   : > { %4054 = vst.msk [vmem:[%s5622_s29 + $0x2e0] sm:$0xf] %vm3869_vm0, %v4635_v27  ;;  %v4636_v31 = vpack.c.bf16 %v3009_v30, %v3009_v30 }
 0x34a   : > { %4057 = vst.msk [vmem:[%s5622_s29 + $0x2ec] sm:$0xf] %vm3869_vm0, %v4638_v29 }
 0x34b   : > { %4055 = vst.msk [vmem:[%s5622_s29 + $0x2e4] sm:$0xf] %vm3869_vm0, %v4636_v31 }
 0x34d   : > { %v5289_v32 = vpop.f32.mrb[188].mxu1 }
 0x34e   : > { %v4641_v33 = vpack.c.bf16 %v5289_v32, %v5289_v32  ;;  %v3022_v34 = vpop.f32.mrb[189].mxu1 }
 0x34f   : > { %v4639_v35 = vpack.c.bf16 %v3022_v34, %v3022_v34  ;;  %v5290_v36 = vpop.f32.mrb[190].mxu1 }
 0x350   : > { %4060 = vst.msk [vmem:[%s5622_s29 + $0x2f8] sm:$0xf] %vm3869_vm0, %v4641_v33  ;;  %v4642_v37 = vpack.c.bf16 %v5290_v36, %v5290_v36  ;;  %v3025_v38 = vpop.f32.mrb[191].mxu1 }
 0x351   : > { %4058 = vst.msk [vmem:[%s5622_s29 + $0x2f0] sm:$0xf] %vm3869_vm0, %v4639_v35  ;;  %v4640_v39 = vpack.c.bf16 %v3025_v38, %v3025_v38 }
 0x352   : > { %4061 = vst.msk [vmem:[%s5622_s29 + $0x2fc] sm:$0xf] %vm3869_vm0, %v4642_v37 }
 0x353   : > { %4059 = vst.msk [vmem:[%s5622_s29 + $0x2f4] sm:$0xf] %vm3869_vm0, %v4640_v39 }
 0x355   : > { %v5293_v40 = vpop.f32.mrb[192].mxu1 }
 0x356   : > { %v4645_v41 = vpack.c.bf16 %v5293_v40, %v5293_v40  ;;  %v3038_v42 = vpop.f32.mrb[193].mxu1 }
 0x357   : > { %v4643_v43 = vpack.c.bf16 %v3038_v42, %v3038_v42  ;;  %v5294_v44 = vpop.f32.mrb[194].mxu1 }
 0x358   : > { %4064 = vst.msk [vmem:[%s5622_s29 + $0x308] sm:$0xf] %vm3869_vm0, %v4645_v41  ;;  %v4646_v45 = vpack.c.bf16 %v5294_v44, %v5294_v44  ;;  %v3041_v46 = vpop.f32.mrb[195].mxu1 }
 0x359   : > { %4062 = vst.msk [vmem:[%s5622_s29 + $0x300] sm:$0xf] %vm3869_vm0, %v4643_v43  ;;  %v4644_v47 = vpack.c.bf16 %v3041_v46, %v3041_v46 }
 0x35a   : > { %4065 = vst.msk [vmem:[%s5622_s29 + $0x30c] sm:$0xf] %vm3869_vm0, %v4646_v45 }
 0x35b   : > { %4063 = vst.msk [vmem:[%s5622_s29 + $0x304] sm:$0xf] %vm3869_vm0, %v4644_v47 }
 0x35d   : > { %v5297_v48 = vpop.f32.mrb[196].mxu1 }
 0x35e   : > { %v4649_v49 = vpack.c.bf16 %v5297_v48, %v5297_v48  ;;  %v3054_v50 = vpop.f32.mrb[197].mxu1 }
 0x35f   : > { %v4647_v51 = vpack.c.bf16 %v3054_v50, %v3054_v50  ;;  %v5298_v52 = vpop.f32.mrb[198].mxu1 }
 0x360   : > { %4068 = vst.msk [vmem:[%s5622_s29 + $0x318] sm:$0xf] %vm3869_vm0, %v4649_v49  ;;  %v4650_v53 = vpack.c.bf16 %v5298_v52, %v5298_v52  ;;  %v3057_v54 = vpop.f32.mrb[199].mxu1 }
 0x361   : > { %4066 = vst.msk [vmem:[%s5622_s29 + $0x310] sm:$0xf] %vm3869_vm0, %v4647_v51  ;;  %v4648_v55 = vpack.c.bf16 %v3057_v54, %v3057_v54 }
 0x362   : > { %4069 = vst.msk [vmem:[%s5622_s29 + $0x31c] sm:$0xf] %vm3869_vm0, %v4650_v53 }
 0x363   : > { %4067 = vst.msk [vmem:[%s5622_s29 + $0x314] sm:$0xf] %vm3869_vm0, %v4648_v55 }
 0x364 PF: > { %s13_s12 = sadd.s32 1, %s5429_s12  }
 0x365   : > { %p10_p4 = scmp.ge.s32.totalorder %s13_s12, 4  }
 0x367   :  { %12 = sbr.rel (!%p10_p4) target bundleno = 1 (0x1), region = 62 }

// kernel: laser_detector_forward.3
= control target key start
LH: loop header
LB: loop body
LE: loop exit
PB: predicated region body
PF: predicated region fallthrough
CT: control target
= control target key end

     0   :  { %s3526_s20 = smov 0   ;;  %s4185_s0 = inlined_call_operand.vmem [shape: bf16[32,3200], index: 0, kind: input, shape index: {}]   ;;  %s4186_s1 = inlined_call_operand.vmem [shape: bf16[3200,10], index: 1, kind: input, shape index: {}]   ;;  %s4187_s2 = inlined_call_operand.vmem [shape: f32[1,10], index: 2, kind: input, shape index: {}]   ;;  %s4188_s3 = inlined_call_operand.vmem [shape: f32[10,1], index: 3, kind: input, shape index: {}]   ;;  %s4189_s4 = inlined_call_operand.<no memory space> [shape: f32[1,1], index: 4, kind: input, shape index: {}]   ;;  %s4190_s5 = inlined_call_operand.vmem [shape: f32[32,1], index: 5, kind: output, shape index: {}]  }
   0x1   :  { %v10_v0 = vstv %s4189_s4 }
   0x2   :  { %11 = vst [vmem:[#allocation2] sm:$0x1] %v10_v0 }
   0x3 LB: > { %s2682_s21 = sadd.s32 4294967295, %s3488_s20   ;;  %p2686_p0 = scmp.ge.s32.totalorder %s3488_s20, 1  ;;  %s3488_s20 = sphi %s3526_s20, %s17_s20  }
   0x4   : > { %p191_p1 = scmp.lt.s32.totalorder %s3488_s20, 3 }
   0x6   : > { %p192_p2 = pnand %p2686_p0, %p191_p1 }
   0x7   : > { %v3245_v1 = vld [vmem:[%s4186_s1 + $0x40] sm:$0xff] (!%p192_p2)   ;;  %v3249_v5 = vld [vmem:[%s4186_s1 + $0x48] sm:$0xff] (!%p192_p2)   ;;  %v3253_v9 = vld [vmem:[%s4186_s1 + $0x50] sm:$0xff] (!%p192_p2)   ;;  %s2687_s25 = sshll.u32 (!%p192_p2), %s2682_s21, 1  ;;  %vm3491_vm0 = vmmov (!%p192_p2), 0   ;;  %vm2544_vm1 = vcmask (!%p192_p2), 1041408  }
   0x8   : > { %195 = sbr.rel (%p192_p2) target bundleno = 666 (0x29a), region = 40  ;;  %v3246_v2 = vld [vmem:[%s4186_s1] sm:$0xff] (!%p192_p2)   ;;  %2923 = vmatprep.subr.bf16.mxu0 (!%p192_p2), %v3245_v1  ;;  %v3250_v6 = vld [vmem:[%s4186_s1 + $0x8] sm:$0xff] (!%p192_p2)   ;;  %v3254_v10 = vld [vmem:[%s4186_s1 + $0x10] sm:$0xff] (!%p192_p2)   ;;  %p221_p3 = scmp.lt.s32.totalorder (!%p192_p2), %s2687_s25, 3  ;;  %vm3492_vm2 = vmmov (!%p192_p2), 1  }
   0x9   : > { %v3247_v3 = vld [vmem:[%s4186_s1 + $0xc0] sm:$0xff] (!%p192_p2)   ;;  %2924 = vmatpush3.bf16.msra.mxu0 (!%p192_p2), %v3246_v2  ;;  %v3251_v7 = vld [vmem:[%s4186_s1 + $0xc8] sm:$0xff] (!%p192_p2)   ;;  %v3255_v11 = vld [vmem:[%s4186_s1 + $0xd0] sm:$0xff] (!%p192_p2)   ;;  %vm2537_vm4 = vcmask (!%p192_p2), 80896   ;;  %vm2623_vm5 = vcmask (!%p192_p2), 7168  }
   0xa   : > { %v3248_v4 = vld [vmem:[%s4186_s1 + $0x80] sm:$0xff] (!%p192_p2)   ;;  %2945 = vmatprep.subr.bf16.mxu1 (!%p192_p2), %v3247_v3  ;;  %2925 = vmatprep.subr.bf16.mxu0 (!%p192_p2), %v3249_v5  ;;  %v3252_v8 = vld [vmem:[%s4186_s1 + $0x88] sm:$0xff] (!%p192_p2)   ;;  %v3256_v12 = vld [vmem:[%s4186_s1 + $0x90] sm:$0xff] (!%p192_p2)  }
   0xb   : > { %2946 = vmatpush3.bf16.msra.mxu1 (!%p192_p2), %v3248_v4  ;;  %v3257_v13 = vld [vmem:[%s4186_s1 + $0x58] sm:$0xff] (!%p192_p2)   ;;  %v3261_v17 = vld [vmem:[%s4186_s1 + $0x60] sm:$0xff] (!%p192_p2)   ;;  %v3265_v21 = vld [vmem:[%s4186_s1 + $0x68] sm:$0xff] (!%p192_p2)  }
   0xc   : > { %2947 = vmatprep.subr.bf16.mxu1 (!%p192_p2), %v3251_v7  ;;  %v3258_v14 = vld [vmem:[%s4186_s1 + $0x18] sm:$0xff] (!%p192_p2)   ;;  %v3262_v18 = vld [vmem:[%s4186_s1 + $0x20] sm:$0xff] (!%p192_p2)   ;;  %v3266_v22 = vld [vmem:[%s4186_s1 + $0x28] sm:$0xff] (!%p192_p2)  }
   0xd   : > { %2926 = vmatpush3.bf16.msra.mxu0 (!%p192_p2), %v3250_v6  ;;  %v3259_v15 = vld [vmem:[%s4186_s1 + $0xd8] sm:$0xff] (!%p192_p2)   ;;  %v3263_v19 = vld [vmem:[%s4186_s1 + $0xe0] sm:$0xff] (!%p192_p2)   ;;  %v3267_v23 = vld [vmem:[%s4186_s1 + $0xe8] sm:$0xff] (!%p192_p2)  }
   0xe   : > { %2927 = vmatprep.subr.bf16.mxu0 (!%p192_p2), %v3253_v9  ;;  %v3260_v16 = vld [vmem:[%s4186_s1 + $0x98] sm:$0xff] (!%p192_p2)   ;;  %v3264_v20 = vld [vmem:[%s4186_s1 + $0xa0] sm:$0xff] (!%p192_p2)   ;;  %v3268_v24 = vld [vmem:[%s4186_s1 + $0xa8] sm:$0xff] (!%p192_p2)  }
   0xf   : > { %2948 = vmatpush3.bf16.msra.mxu1 %v3252_v8  ;;  %s4192_s25 = smov (!%p221_p3, %s2687_s25), 3  ;;  %v3269_v25 = vld [vmem:[%s4186_s1 + $0x70] sm:$0xff]   ;;  %v3273_v29 = vld [vmem:[%s4186_s1 + $0x78] sm:$0xff]   ;;  %v3280_v35 = vld [vmem:[%s4186_s1 + $0x140] sm:$0xff]  }
  0x10   : > { %2949 = vmatprep.subr.bf16.mxu1 %v3255_v11  ;;  %s3233_s4 = smul.u32 100, %s4192_s25  ;;  %v3270_v26 = vld [vmem:[%s4186_s1 + $0x30] sm:$0xff]   ;;  %v3274_v30 = vld [vmem:[%s4186_s1 + $0x38] sm:$0xff]   ;;  %v3284_v38 = vld [vmem:[%s4186_s1 + $0x100] sm:$0xff]   ;;  %s2690_s12 = sshll.u32 %s4192_s25, 3 }
  0x11   : > { %2928 = vmatpush3.bf16.msra.mxu0 %v3254_v10  ;;  %v3271_v27 = vld [vmem:[%s4186_s1 + $0xf0] sm:$0xff]   ;;  %v3275_v31 = vld [vmem:[%s4186_s1 + $0xf8] sm:$0xff]   ;;  %v3285_v39 = vld [vmem:[%s4186_s1 + $0x1c0] sm:$0xff]   ;;  %s231_s15 = scalar_lea.vmem %s4190_s5, %s2690_s12 }
  0x12   : > { %2929 = vmatprep.subr.bf16.mxu0 %v3257_v13  ;;  %v3272_v28 = vld [vmem:[%s4186_s1 + $0xb0] sm:$0xff]   ;;  %s3629_s9 = scalar_lea.vmem %s4185_s0, %s3233_s4  ;;  %v3279_v34 = vld [vmem:[%s4186_s1 + $0xb8] sm:$0xff]   ;;  %v3286_v40 = vld [vmem:[%s4186_s1 + $0x180] sm:$0xff]  }
  0x13   : > { %2950 = vmatpush3.bf16.msra.mxu1 %v3256_v12  ;;  %v3276_v32 = vld [vmem:[%s3629_s9] ss:$100 sps:$4 sm:$0xff]   ;;  %v3281_v36 = vld [vmem:[%s3629_s9 + $0x8] ss:$100 sps:$4 sm:$0xff]   ;;  %v3291_v45 = vld [vmem:[%s4186_s1 + $0x150] sm:$0xff]  }
  0x14   : > { %2951 = vmatprep.subr.bf16.mxu1 %v3259_v15  ;;  %v3278_v33 = vld [vmem:[%s3629_s9 + $0x4] ss:$100 sps:$4 sm:$0xff]   ;;  %v3283_v37 = vld [vmem:[%s3629_s9 + $0xc] ss:$100 sps:$4 sm:$0xff]   ;;  %v3295_v49 = vld [vmem:[%s4186_s1 + $0x158] sm:$0xff]  }
  0x15   : > { %2930 = vmatpush3.bf16.msra.mxu0 %v3258_v14  ;;  %2025 = vmatprep.mubr.bf16.mxu0 %v3278_v33  ;;  %v3287_v41 = vld [vmem:[%s4186_s1 + $0x148] sm:$0xff]   ;;  %v3292_v46 = vld [vmem:[%s4186_s1 + $0x110] sm:$0xff]   ;;  %v3296_v50 = vld [vmem:[%s4186_s1 + $0x118] sm:$0xff]  }
  0x16   : > { %2931 = vmatprep.subr.bf16.mxu0 %v3261_v17  ;;  %2066 = vmatprep.mubr.bf16.mxu1 %v3283_v37  ;;  %v3288_v42 = vld [vmem:[%s4186_s1 + $0x108] sm:$0xff]   ;;  %v3293_v47 = vld [vmem:[%s4186_s1 + $0x1d0] sm:$0xff]   ;;  %v3297_v51 = vld [vmem:[%s4186_s1 + $0x1d8] sm:$0xff]  }
  0x17   : > { %2952 = vmatpush3.bf16.msra.mxu1 %v3260_v16  ;;  %v3289_v43 = vld [vmem:[%s4186_s1 + $0x1c8] sm:$0xff]   ;;  %v3294_v48 = vld [vmem:[%s4186_s1 + $0x190] sm:$0xff]   ;;  %v3298_v52 = vld [vmem:[%s4186_s1 + $0x198] sm:$0xff]  }
  0x18   : > { %2953 = vmatprep.subr.bf16.mxu1 %v3263_v19  ;;  %v3290_v44 = vld [vmem:[%s4186_s1 + $0x188] sm:$0xff]   ;;  %v3299_v53 = vld [vmem:[%s4186_s1 + $0x160] sm:$0xff]   ;;  %v3307_v61 = vld [vmem:[%s4186_s1 + $0x170] sm:$0xff]  }
  0x19   : > { %2932 = vmatpush3.bf16.msra.mxu0 %v3262_v18  ;;  %v3300_v54 = vld [vmem:[%s4186_s1 + $0x120] sm:$0xff]   ;;  %v3303_v57 = vld [vmem:[%s4186_s1 + $0x168] sm:$0xff]   ;;  %v3308_v62 = vld [vmem:[%s4186_s1 + $0x130] sm:$0xff]  }
  0x1a   : > { %2933 = vmatprep.subr.bf16.mxu0 %v3265_v21  ;;  %v3301_v55 = vld [vmem:[%s4186_s1 + $0x1e0] sm:$0xff]   ;;  %v3304_v58 = vld [vmem:[%s4186_s1 + $0x128] sm:$0xff]   ;;  %v3309_v63 = vld [vmem:[%s4186_s1 + $0x1f0] sm:$0xff]  }
  0x1b   : > { %2954 = vmatpush3.bf16.msra.mxu1 %v3264_v20  ;;  %v3302_v56 = vld [vmem:[%s4186_s1 + $0x1a0] sm:$0xff]   ;;  %v3305_v59 = vld [vmem:[%s4186_s1 + $0x1e8] sm:$0xff]   ;;  %v3310_v0 = vld [vmem:[%s4186_s1 + $0x1b0] sm:$0xff]  }
  0x1c   : > { %2955 = vmatprep.subr.bf16.mxu1 %v3267_v23  ;;  %v3306_v60 = vld [vmem:[%s4186_s1 + $0x1a8] sm:$0xff]   ;;  %v3311_v1 = vld [vmem:[%s4186_s1 + $0x178] sm:$0xff]   ;;  %v3314_v4 = vld [vmem:[%s3629_s9 + $0x10] ss:$100 sps:$4 sm:$0xff]  }
  0x1d   : > { %2934 = vmatpush3.bf16.msra.mxu0 %v3266_v22  ;;  %v3312_v2 = vld [vmem:[%s4186_s1 + $0x138] sm:$0xff]   ;;  %v3318_v7 = vld [vmem:[%s4186_s1 + $0x240] sm:$0xff]   ;;  %v3325_v13 = vld [vmem:[%s4186_s1 + $0x248] sm:$0xff]  }
  0x1e   : > { %2935 = vmatprep.subr.bf16.mxu0 %v3269_v25  ;;  %v3313_v3 = vld [vmem:[%s4186_s1 + $0x1f8] sm:$0xff]   ;;  %v3322_v10 = vld [vmem:[%s4186_s1 + $0x200] sm:$0xff]   ;;  %v3326_v14 = vld [vmem:[%s4186_s1 + $0x208] sm:$0xff]  }
  0x1f   : > { %2956 = vmatpush3.bf16.msra.mxu1 %v3268_v24  ;;  %v3316_v5 = vld [vmem:[%s3629_s9 + $0x14] ss:$100 sps:$4 sm:$0xff]   ;;  %v3321_v9 = vld [vmem:[%s3629_s9 + $0x1c] ss:$100 sps:$4 sm:$0xff]   ;;  %v3327_v15 = vld [vmem:[%s4186_s1 + $0x2c8] sm:$0xff]  }
  0x20   : > { %2957 = vmatprep.subr.bf16.mxu1 %v3271_v27  ;;  %v3317_v6 = vld [vmem:[%s4186_s1 + $0x1b8] sm:$0xff]   ;;  %v3323_v11 = vld [vmem:[%s4186_s1 + $0x2c0] sm:$0xff]   ;;  %v3328_v16 = vld [vmem:[%s4186_s1 + $0x288] sm:$0xff]  }
  0x21   : > { %2936 = vmatpush3.bf16.msra.mxu0 %v3270_v26  ;;  %v3319_v8 = vld [vmem:[%s3629_s9 + $0x18] ss:$100 sps:$4 sm:$0xff]   ;;  %v3324_v12 = vld [vmem:[%s4186_s1 + $0x280] sm:$0xff]   ;;  %v3329_v17 = vld [vmem:[%s4186_s1 + $0x250] sm:$0xff]  }
  0x22   : > { %2937 = vmatprep.subr.bf16.mxu0 %v3273_v29  ;;  %v3330_v18 = vld [vmem:[%s4186_s1 + $0x210] sm:$0xff]   ;;  %v3333_v21 = vld [vmem:[%s4186_s1 + $0x258] sm:$0xff]   ;;  %v3337_v25 = vld [vmem:[%s4186_s1 + $0x260] sm:$0xff]  }
  0x23   : > { %2958 = vmatpush3.bf16.msra.mxu1 %v3272_v28  ;;  %v3331_v19 = vld [vmem:[%s4186_s1 + $0x2d0] sm:$0xff]   ;;  %v3334_v22 = vld [vmem:[%s4186_s1 + $0x218] sm:$0xff]   ;;  %v3338_v26 = vld [vmem:[%s4186_s1 + $0x220] sm:$0xff]  }
  0x24   : > { %2959 = vmatprep.subr.bf16.mxu1 %v3275_v31  ;;  %v3332_v20 = vld [vmem:[%s4186_s1 + $0x290] sm:$0xff]   ;;  %v3335_v23 = vld [vmem:[%s4186_s1 + $0x2d8] sm:$0xff]   ;;  %v3339_v27 = vld [vmem:[%s4186_s1 + $0x2e0] sm:$0xff]  }
  0x25   : > { %2938 = vmatpush3.bf16.msra.mxu0 %v3274_v30  ;;  %v3336_v24 = vld [vmem:[%s4186_s1 + $0x298] sm:$0xff]   ;;  %v3340_v28 = vld [vmem:[%s4186_s1 + $0x2a0] sm:$0xff]   ;;  %v3341_v29 = vld [vmem:[%s4186_s1 + $0x268] sm:$0xff]  }
  0x26   : > { %2967 = vmatprep.subr.bf16.mxu0 %v3280_v35  ;;  %v3342_v30 = vld [vmem:[%s4186_s1 + $0x228] sm:$0xff]   ;;  %v3345_v33 = vld [vmem:[%s4186_s1 + $0x270] sm:$0xff]   ;;  %v3349_v37 = vld [vmem:[%s4186_s1 + $0x278] sm:$0xff]  }
  0x27   : > { %2960 = vmatpush3.bf16.msra.mxu1 %v3279_v34  ;;  %v3343_v31 = vld [vmem:[%s4186_s1 + $0x2e8] sm:$0xff]   ;;  %v3346_v34 = vld [vmem:[%s4186_s1 + $0x230] sm:$0xff]   ;;  %vm3228_vm3 = vmpackc.low %vm2544_vm1, %vm3492_vm2 }
  0x28   : > { %2026 = vmatmul.mubr.bf16.vlgmr.msra.gmra.mrb[0].mxu0 %v3276_v32  ;;  %2989 = vmatprep.subr.bf16.mxu1 %v3285_v39  ;;  %v3344_v32 = vld [vmem:[%s4186_s1 + $0x2a8] sm:$0xff]   ;;  %v3347_v35 = vld [vmem:[%s4186_s1 + $0x2f0] sm:$0xff]   ;;  %v3351_v39 = vld [vmem:[%s4186_s1 + $0x2f8] sm:$0xff]  }
  0x29   : > { %2968 = vmatpush3.bf16.msra.mxu0 %v3284_v38  ;;  %2107 = vmatprep.mubr.bf16.mxu0 %v3316_v5  ;;  %v3350_v38 = vld [vmem:[%s4186_s1 + $0x238] sm:$0xff]   ;;  %v3383_v5 = vld [vmem:[%s4186_s1 + $0x370] sm:$0xff]  }
  0x2a   : > { %2067 = vmatmul.mubr.bf16.vlgmr.msra.gmra.mrb[0].mxu1 %v3281_v36  ;;  %2969 = vmatprep.subr.bf16.mxu0 %v3287_v41  ;;  %v3348_v36 = vld [vmem:[%s4186_s1 + $0x2b0] sm:$0xff]   ;;  %v3354_v41 = vld [vmem:[%s3629_s9 + $0x24] ss:$100 sps:$4 sm:$0xff]  }
  0x2b   : > { %2990 = vmatpush3.bf16.msra.mxu1 %v3286_v40  ;;  %2148 = vmatprep.mubr.bf16.mxu1 %v3321_v9  ;;  %v3352_v40 = vld [vmem:[%s3629_s9 + $0x20] ss:$100 sps:$4 sm:$0xff]   ;;  %v3387_v9 = vld [vmem:[%s4186_s1 + $0x378] sm:$0xff]  }
  0x2c   : > { %2991 = vmatprep.subr.bf16.mxu1 %v3289_v43  ;;  %v3356_v43 = vld [vmem:[%s4186_s1 + $0x340] sm:$0xff]  }
  0x2d   : > { %2970 = vmatpush3.bf16.msra.mxu0 %v3288_v42  ;;  %v3355_v42 = vld [vmem:[%s4186_s1 + $0x2b8] sm:$0xff]  }
  0x2e   : > { %2971 = vmatprep.subr.bf16.mxu0 %v3291_v45  ;;  %v3359_v45 = vld [vmem:[%s3629_s9 + $0x2c] ss:$100 sps:$4 sm:$0xff]  }
  0x2f   : > { %2992 = vmatpush3.bf16.msra.mxu1 %v3290_v44  ;;  %v3357_v44 = vld [vmem:[%s3629_s9 + $0x28] ss:$100 sps:$4 sm:$0xff]  }
  0x30   : > { %2993 = vmatprep.subr.bf16.mxu1 %v3293_v47  ;;  %v3361_v47 = vld [vmem:[%s4186_s1 + $0x3c0] sm:$0xff]  }
  0x31   : > { %2972 = vmatpush3.bf16.msra.mxu0 %v3292_v46  ;;  %v3360_v46 = vld [vmem:[%s4186_s1 + $0x300] sm:$0xff]  }
  0x32   : > { %2973 = vmatprep.subr.bf16.mxu0 %v3295_v49  ;;  %v3363_v49 = vld [vmem:[%s4186_s1 + $0x348] sm:$0xff]  }
  0x33   : > { %2994 = vmatpush3.bf16.msra.mxu1 %v3294_v48  ;;  %v3362_v48 = vld [vmem:[%s4186_s1 + $0x380] sm:$0xff]  }
  0x34   : > { %2995 = vmatprep.subr.bf16.mxu1 %v3297_v51  ;;  %v3365_v51 = vld [vmem:[%s4186_s1 + $0x3c8] sm:$0xff]  }
  0x35   : > { %2974 = vmatpush3.bf16.msra.mxu0 %v3296_v50  ;;  %v3364_v50 = vld [vmem:[%s4186_s1 + $0x308] sm:$0xff]  }
  0x36   : > { %2975 = vmatprep.subr.bf16.mxu0 %v3299_v53  ;;  %v3367_v53 = vld [vmem:[%s4186_s1 + $0x350] sm:$0xff]  }
  0x37   : > { %2996 = vmatpush3.bf16.msra.mxu1 %v3298_v52  ;;  %v3366_v52 = vld [vmem:[%s4186_s1 + $0x388] sm:$0xff]  }
  0x38   : > { %2997 = vmatprep.subr.bf16.mxu1 %v3301_v55  ;;  %v3369_v55 = vld [vmem:[%s4186_s1 + $0x3d0] sm:$0xff]  }
  0x39   : > { %2976 = vmatpush3.bf16.msra.mxu0 %v3300_v54  ;;  %v3368_v54 = vld [vmem:[%s4186_s1 + $0x310] sm:$0xff]  }
  0x3a   : > { %2977 = vmatprep.subr.bf16.mxu0 %v3303_v57  ;;  %v3371_v57 = vld [vmem:[%s4186_s1 + $0x358] sm:$0xff]  }
  0x3b   : > { %2998 = vmatpush3.bf16.msra.mxu1 %v3302_v56  ;;  %v3370_v56 = vld [vmem:[%s4186_s1 + $0x390] sm:$0xff]  }
  0x3c   : > { %2999 = vmatprep.subr.bf16.mxu1 %v3305_v59  ;;  %v3373_v59 = vld [vmem:[%s4186_s1 + $0x3d8] sm:$0xff]  }
  0x3d   : > { %2978 = vmatpush3.bf16.msra.mxu0 %v3304_v58  ;;  %v3372_v58 = vld [vmem:[%s4186_s1 + $0x318] sm:$0xff]  }
  0x3e   : > { %2979 = vmatprep.subr.bf16.mxu0 %v3307_v61  ;;  %v3375_v61 = vld [vmem:[%s4186_s1 + $0x360] sm:$0xff]  }
  0x3f   : > { %3000 = vmatpush3.bf16.msra.mxu1 %v3306_v60  ;;  %v3374_v60 = vld [vmem:[%s4186_s1 + $0x398] sm:$0xff]  }
  0x40   : > { %3001 = vmatprep.subr.bf16.mxu1 %v3309_v63  ;;  %v3377_v63 = vld [vmem:[%s4186_s1 + $0x3e0] sm:$0xff]  }
  0x41   : > { %2980 = vmatpush3.bf16.msra.mxu0 %v3308_v62  ;;  %v3376_v62 = vld [vmem:[%s4186_s1 + $0x320] sm:$0xff]  }
  0x42   : > { %2981 = vmatprep.subr.bf16.mxu0 %v3311_v1  ;;  %v3379_v1 = vld [vmem:[%s4186_s1 + $0x368] sm:$0xff]  }
  0x43   : > { %3002 = vmatpush3.bf16.msra.mxu1 %v3310_v0  ;;  %v3378_v0 = vld [vmem:[%s4186_s1 + $0x3a0] sm:$0xff]  }
  0x44   : > { %3003 = vmatprep.subr.bf16.mxu1 %v3313_v3  ;;  %v3381_v3 = vld [vmem:[%s4186_s1 + $0x3e8] sm:$0xff]  }
  0x45   : > { %2982 = vmatpush3.bf16.msra.mxu0 %v3312_v2  ;;  %v3380_v2 = vld [vmem:[%s4186_s1 + $0x328] sm:$0xff]  }
  0x46   : > { %3011 = vmatprep.subr.bf16.mxu0 %v3318_v7  ;;  %v3385_v7 = vld [vmem:[%s4186_s1 + $0x3f0] sm:$0xff]  }
  0x47   : > { %3004 = vmatpush3.bf16.msra.mxu1 %v3317_v6  ;;  %v3384_v6 = vld [vmem:[%s4186_s1 + $0x330] sm:$0xff]  }
  0x48   : > { %2108 = vmatmul.mubr.bf16.vlgmr.msra.gmra.mrb[4].mxu0 %v3314_v4  ;;  %3033 = vmatprep.subr.bf16.mxu1 %v3323_v11  ;;  %v3382_v4 = vld [vmem:[%s4186_s1 + $0x3a8] sm:$0xff]   ;;  %v3389_v11 = vld [vmem:[%s4186_s1 + $0x3f8] sm:$0xff]  }
  0x49   : > { %3012 = vmatpush3.bf16.msra.mxu0 %v3322_v10  ;;  %2189 = vmatprep.mubr.bf16.mxu0 %v3354_v41  ;;  %v3388_v10 = vld [vmem:[%s4186_s1 + $0x338] sm:$0xff]   ;;  %v3421_v41 = vld [vmem:[%s4186_s1 + $0x470] sm:$0xff]  }
  0x4a   : > { %2149 = vmatmul.mubr.bf16.vlgmr.msra.gmra.mrb[4].mxu1 %v3319_v8  ;;  %3013 = vmatprep.subr.bf16.mxu0 %v3325_v13  ;;  %v3386_v8 = vld [vmem:[%s4186_s1 + $0x3b0] sm:$0xff]  }
  0x4b   : > { %3034 = vmatpush3.bf16.msra.mxu1 %v3324_v12  ;;  %2230 = vmatprep.mubr.bf16.mxu1 %v3359_v45  ;;  %v3390_v12 = vld [vmem:[%s3629_s9 + $0x30] ss:$100 sps:$4 sm:$0xff]   ;;  %v3425_v45 = vld [vmem:[%s4186_s1 + $0x478] sm:$0xff]  }
  0x4c   : > { %3035 = vmatprep.subr.bf16.mxu1 %v3327_v15  ;;  %v3392_v13 = vld [vmem:[%s3629_s9 + $0x34] ss:$100 sps:$4 sm:$0xff]   ;;  %v3394_v15 = vld [vmem:[%s4186_s1 + $0x440] sm:$0xff]  }
  0x4d   : > { %3014 = vmatpush3.bf16.msra.mxu0 %v3326_v14  ;;  %v3393_v14 = vld [vmem:[%s4186_s1 + $0x3b8] sm:$0xff]  }
  0x4e   : > { %3015 = vmatprep.subr.bf16.mxu0 %v3329_v17  ;;  %v3397_v17 = vld [vmem:[%s3629_s9 + $0x3c] ss:$100 sps:$4 sm:$0xff]  }
  0x4f   : > { %3036 = vmatpush3.bf16.msra.mxu1 %v3328_v16  ;;  %v3395_v16 = vld [vmem:[%s3629_s9 + $0x38] ss:$100 sps:$4 sm:$0xff]  }
  0x50   : > { %3037 = vmatprep.subr.bf16.mxu1 %v3331_v19  ;;  %v3399_v19 = vld [vmem:[%s4186_s1 + $0x4c0] sm:$0xff]  }
  0x51   : > { %3016 = vmatpush3.bf16.msra.mxu0 %v3330_v18  ;;  %v3398_v18 = vld [vmem:[%s4186_s1 + $0x400] sm:$0xff]  }
  0x52   : > { %3017 = vmatprep.subr.bf16.mxu0 %v3333_v21  ;;  %v3401_v21 = vld [vmem:[%s4186_s1 + $0x448] sm:$0xff]  }
  0x53   : > { %3038 = vmatpush3.bf16.msra.mxu1 %v3332_v20  ;;  %v3400_v20 = vld [vmem:[%s4186_s1 + $0x480] sm:$0xff]  }
  0x54   : > { %3039 = vmatprep.subr.bf16.mxu1 %v3335_v23  ;;  %v3403_v23 = vld [vmem:[%s4186_s1 + $0x4c8] sm:$0xff]  }
  0x55   : > { %3018 = vmatpush3.bf16.msra.mxu0 %v3334_v22  ;;  %v3402_v22 = vld [vmem:[%s4186_s1 + $0x408] sm:$0xff]  }
  0x56   : > { %3019 = vmatprep.subr.bf16.mxu0 %v3337_v25  ;;  %v3405_v25 = vld [vmem:[%s4186_s1 + $0x450] sm:$0xff]  }
  0x57   : > { %3040 = vmatpush3.bf16.msra.mxu1 %v3336_v24  ;;  %v3404_v24 = vld [vmem:[%s4186_s1 + $0x488] sm:$0xff]  }
  0x58   : > { %3041 = vmatprep.subr.bf16.mxu1 %v3339_v27  ;;  %v3407_v27 = vld [vmem:[%s4186_s1 + $0x4d0] sm:$0xff]  }
  0x59   : > { %3020 = vmatpush3.bf16.msra.mxu0 %v3338_v26  ;;  %v3406_v26 = vld [vmem:[%s4186_s1 + $0x410] sm:$0xff]  }
  0x5a   : > { %3021 = vmatprep.subr.bf16.mxu0 %v3341_v29  ;;  %v3409_v29 = vld [vmem:[%s4186_s1 + $0x458] sm:$0xff]  }
  0x5b   : > { %3042 = vmatpush3.bf16.msra.mxu1 %v3340_v28  ;;  %v3408_v28 = vld [vmem:[%s4186_s1 + $0x490] sm:$0xff]  }
  0x5c   : > { %3043 = vmatprep.subr.bf16.mxu1 %v3343_v31  ;;  %v3411_v31 = vld [vmem:[%s4186_s1 + $0x4d8] sm:$0xff]  }
  0x5d   : > { %3022 = vmatpush3.bf16.msra.mxu0 %v3342_v30  ;;  %v3410_v30 = vld [vmem:[%s4186_s1 + $0x418] sm:$0xff]  }
  0x5e   : > { %3023 = vmatprep.subr.bf16.mxu0 %v3345_v33  ;;  %v3413_v33 = vld [vmem:[%s4186_s1 + $0x460] sm:$0xff]  }
  0x5f   : > { %3044 = vmatpush3.bf16.msra.mxu1 %v3344_v32  ;;  %v3412_v32 = vld [vmem:[%s4186_s1 + $0x498] sm:$0xff]  }
  0x60   : > { %3045 = vmatprep.subr.bf16.mxu1 %v3347_v35  ;;  %v3415_v35 = vld [vmem:[%s4186_s1 + $0x4e0] sm:$0xff]  }
  0x61   : > { %3024 = vmatpush3.bf16.msra.mxu0 %v3346_v34  ;;  %v3414_v34 = vld [vmem:[%s4186_s1 + $0x420] sm:$0xff]  }
  0x62   : > { %3025 = vmatprep.subr.bf16.mxu0 %v3349_v37  ;;  %v3417_v37 = vld [vmem:[%s4186_s1 + $0x468] sm:$0xff]  }
  0x63   : > { %3046 = vmatpush3.bf16.msra.mxu1 %v3348_v36  ;;  %v3416_v36 = vld [vmem:[%s4186_s1 + $0x4a0] sm:$0xff]  }
  0x64   : > { %3047 = vmatprep.subr.bf16.mxu1 %v3351_v39  ;;  %v3419_v39 = vld [vmem:[%s4186_s1 + $0x4e8] sm:$0xff]  }
  0x65   : > { %3026 = vmatpush3.bf16.msra.mxu0 %v3350_v38  ;;  %v3418_v38 = vld [vmem:[%s4186_s1 + $0x428] sm:$0xff]  }
  0x66   : > { %3055 = vmatprep.subr.bf16.mxu0 %v3356_v43  ;;  %v3423_v43 = vld [vmem:[%s4186_s1 + $0x4f0] sm:$0xff]  }
  0x67   : > { %3048 = vmatpush3.bf16.msra.mxu1 %v3355_v42  ;;  %v3422_v42 = vld [vmem:[%s4186_s1 + $0x430] sm:$0xff]  }
  0x68   : > { %2190 = vmatmul.mubr.bf16.vlgmr.msra.gmra.mrb[8].mxu0 %v3352_v40  ;;  %3077 = vmatprep.subr.bf16.mxu1 %v3361_v47  ;;  %v3420_v40 = vld [vmem:[%s4186_s1 + $0x4a8] sm:$0xff]   ;;  %v3427_v47 = vld [vmem:[%s4186_s1 + $0x4f8] sm:$0xff]  }
  0x69   : > { %3056 = vmatpush3.bf16.msra.mxu0 %v3360_v46  ;;  %2271 = vmatprep.mubr.bf16.mxu0 %v3392_v13  ;;  %v3426_v46 = vld [vmem:[%s4186_s1 + $0x438] sm:$0xff]   ;;  %v3459_v13 = vld [vmem:[%s4186_s1 + $0x570] sm:$0xff]  }
  0x6a   : > { %2231 = vmatmul.mubr.bf16.vlgmr.msra.gmra.mrb[8].mxu1 %v3357_v44  ;;  %3057 = vmatprep.subr.bf16.mxu0 %v3363_v49  ;;  %v3424_v44 = vld [vmem:[%s4186_s1 + $0x4b0] sm:$0xff]   ;;  %v3430_v49 = vld [vmem:[%s3629_s9 + $0x44] ss:$100 sps:$4 sm:$0xff]  }
  0x6b   : > { %3078 = vmatpush3.bf16.msra.mxu1 %v3362_v48  ;;  %2312 = vmatprep.mubr.bf16.mxu1 %v3397_v17  ;;  %v3428_v48 = vld [vmem:[%s3629_s9 + $0x40] ss:$100 sps:$4 sm:$0xff]   ;;  %v3463_v17 = vld [vmem:[%s4186_s1 + $0x578] sm:$0xff]  }
  0x6c   : > { %3079 = vmatprep.subr.bf16.mxu1 %v3365_v51  ;;  %v3432_v51 = vld [vmem:[%s4186_s1 + $0x540] sm:$0xff]  }
  0x6d   : > { %3058 = vmatpush3.bf16.msra.mxu0 %v3364_v50  ;;  %v3431_v50 = vld [vmem:[%s4186_s1 + $0x4b8] sm:$0xff]  }
  0x6e   : > { %3059 = vmatprep.subr.bf16.mxu0 %v3367_v53  ;;  %v3435_v53 = vld [vmem:[%s3629_s9 + $0x4c] ss:$100 sps:$4 sm:$0xff]  }
  0x6f   : > { %3080 = vmatpush3.bf16.msra.mxu1 %v3366_v52  ;;  %v3433_v52 = vld [vmem:[%s3629_s9 + $0x48] ss:$100 sps:$4 sm:$0xff]  }
  0x70   : > { %3081 = vmatprep.subr.bf16.mxu1 %v3369_v55  ;;  %v3437_v55 = vld [vmem:[%s4186_s1 + $0x5c0] sm:$0xff]  }
  0x71   : > { %3060 = vmatpush3.bf16.msra.mxu0 %v3368_v54  ;;  %v3436_v54 = vld [vmem:[%s4186_s1 + $0x500] sm:$0xff]  }
  0x72   : > { %3061 = vmatprep.subr.bf16.mxu0 %v3371_v57  ;;  %v3439_v57 = vld [vmem:[%s4186_s1 + $0x548] sm:$0xff]  }
  0x73   : > { %3082 = vmatpush3.bf16.msra.mxu1 %v3370_v56  ;;  %v3438_v56 = vld [vmem:[%s4186_s1 + $0x580] sm:$0xff]  }
  0x74   : > { %3083 = vmatprep.subr.bf16.mxu1 %v3373_v59  ;;  %v3441_v59 = vld [vmem:[%s4186_s1 + $0x5c8] sm:$0xff]  }
  0x75   : > { %3062 = vmatpush3.bf16.msra.mxu0 %v3372_v58  ;;  %v3440_v58 = vld [vmem:[%s4186_s1 + $0x508] sm:$0xff]  }
  0x76   : > { %3063 = vmatprep.subr.bf16.mxu0 %v3375_v61  ;;  %v3443_v61 = vld [vmem:[%s4186_s1 + $0x550] sm:$0xff]  }
  0x77   : > { %3084 = vmatpush3.bf16.msra.mxu1 %v3374_v60  ;;  %v3442_v60 = vld [vmem:[%s4186_s1 + $0x588] sm:$0xff]  }
  0x78   : > { %3085 = vmatprep.subr.bf16.mxu1 %v3377_v63  ;;  %v3445_v63 = vld [vmem:[%s4186_s1 + $0x5d0] sm:$0xff]  }
  0x79   : > { %3064 = vmatpush3.bf16.msra.mxu0 %v3376_v62  ;;  %v3444_v62 = vld [vmem:[%s4186_s1 + $0x510] sm:$0xff]  }
  0x7a   : > { %3065 = vmatprep.subr.bf16.mxu0 %v3379_v1  ;;  %v3447_v1 = vld [vmem:[%s4186_s1 + $0x558] sm:$0xff]  }
  0x7b   : > { %3086 = vmatpush3.bf16.msra.mxu1 %v3378_v0  ;;  %v3446_v0 = vld [vmem:[%s4186_s1 + $0x590] sm:$0xff]  }
  0x7c   : > { %3087 = vmatprep.subr.bf16.mxu1 %v3381_v3  ;;  %v3449_v3 = vld [vmem:[%s4186_s1 + $0x5d8] sm:$0xff]  }
  0x7d   : > { %3066 = vmatpush3.bf16.msra.mxu0 %v3380_v2  ;;  %v3448_v2 = vld [vmem:[%s4186_s1 + $0x518] sm:$0xff]  }
  0x7e   : > { %3067 = vmatprep.subr.bf16.mxu0 %v3383_v5  ;;  %v3451_v5 = vld [vmem:[%s4186_s1 + $0x560] sm:$0xff]  }
  0x7f   : > { %3088 = vmatpush3.bf16.msra.mxu1 %v3382_v4  ;;  %v3450_v4 = vld [vmem:[%s4186_s1 + $0x598] sm:$0xff]  }
  0x80   : > { %3089 = vmatprep.subr.bf16.mxu1 %v3385_v7  ;;  %v3453_v7 = vld [vmem:[%s4186_s1 + $0x5e0] sm:$0xff]  }
  0x81   : > { %3068 = vmatpush3.bf16.msra.mxu0 %v3384_v6  ;;  %v3452_v6 = vld [vmem:[%s4186_s1 + $0x520] sm:$0xff]  }
  0x82   : > { %3069 = vmatprep.subr.bf16.mxu0 %v3387_v9  ;;  %v3455_v9 = vld [vmem:[%s4186_s1 + $0x568] sm:$0xff]  }
  0x83   : > { %3090 = vmatpush3.bf16.msra.mxu1 %v3386_v8  ;;  %v3454_v8 = vld [vmem:[%s4186_s1 + $0x5a0] sm:$0xff]  }
  0x84   : > { %3091 = vmatprep.subr.bf16.mxu1 %v3389_v11  ;;  %v3457_v11 = vld [vmem:[%s4186_s1 + $0x5e8] sm:$0xff]  }
  0x85   : > { %3070 = vmatpush3.bf16.msra.mxu0 %v3388_v10  ;;  %v3456_v10 = vld [vmem:[%s4186_s1 + $0x528] sm:$0xff]  }
  0x86   : > { %3099 = vmatprep.subr.bf16.mxu0 %v3394_v15  ;;  %v3461_v15 = vld [vmem:[%s4186_s1 + $0x5f0] sm:$0xff]  }
  0x87   : > { %3092 = vmatpush3.bf16.msra.mxu1 %v3393_v14  ;;  %v3460_v14 = vld [vmem:[%s4186_s1 + $0x530] sm:$0xff]  }
  0x88   : > { %2272 = vmatmul.mubr.bf16.vlgmr.msra.gmra.mrb[12].mxu0 %v3390_v12  ;;  %3121 = vmatprep.subr.bf16.mxu1 %v3399_v19  ;;  %v3458_v12 = vld [vmem:[%s4186_s1 + $0x5a8] sm:$0xff]   ;;  %v3465_v19 = vld [vmem:[%s4186_s1 + $0x5f8] sm:$0xff]  }
  0x89   : > { %3100 = vmatpush3.bf16.msra.mxu0 %v3398_v18  ;;  %2353 = vmatprep.mubr.bf16.mxu0 %v3430_v49  ;;  %v3464_v18 = vld [vmem:[%s4186_s1 + $0x538] sm:$0xff]  }
  0x8a   : > { %2313 = vmatmul.mubr.bf16.vlgmr.msra.gmra.mrb[12].mxu1 %v3395_v16  ;;  %3101 = vmatprep.subr.bf16.mxu0 %v3401_v21  ;;  %v3462_v16 = vld [vmem:[%s4186_s1 + $0x5b0] sm:$0xff]  }
  0x8b   : > { %3122 = vmatpush3.bf16.msra.mxu1 %v3400_v20  ;;  %2394 = vmatprep.mubr.bf16.mxu1 %v3435_v53  ;;  %v3466_v20 = vld [vmem:[%s3629_s9 + $0x50] ss:$100 sps:$4 sm:$0xff]  }
  0x8c   : > { %3123 = vmatprep.subr.bf16.mxu1 %v3403_v23  ;;  %v3468_v21 = vld [vmem:[%s3629_s9 + $0x54] ss:$100 sps:$4 sm:$0xff]   ;;  %v3490_v23 = vmov 0.0  }
  0x8d   : > { %3102 = vmatpush3.bf16.msra.mxu0 %v3402_v22  ;;  %v3469_v22 = vld [vmem:[%s4186_s1 + $0x5b8] sm:$0xff]  }
  0x8e   : > { %3103 = vmatprep.subr.bf16.mxu0 %v3405_v25  ;;  %v3472_v25 = vld [vmem:[%s3629_s9 + $0x5c] ss:$100 sps:$4 sm:$0xff]  }
  0x8f   : > { %3124 = vmatpush3.bf16.msra.mxu1 %v3404_v24  ;;  %v3470_v24 = vld [vmem:[%s3629_s9 + $0x58] ss:$100 sps:$4 sm:$0xff]  }
  0x90   : > { %3125 = vmatprep.subr.bf16.mxu1 %v3407_v27  ;;  %v3474_v27 = vld [vmem:[%s4186_s1 + $0x608] sm:$0xff]  }
  0x91   : > { %3104 = vmatpush3.bf16.msra.mxu0 %v3406_v26  ;;  %v3473_v26 = vld [vmem:[%s4186_s1 + $0x600] sm:$0xff]  }
  0x92   : > { %3105 = vmatprep.subr.bf16.mxu0 %v3409_v29  ;;  %v3476_v29 = vld [vmem:[%s4186_s1 + $0x618] sm:$0xff]  }
  0x93   : > { %3126 = vmatpush3.bf16.msra.mxu1 %v3408_v28  ;;  %v3475_v28 = vld [vmem:[%s4186_s1 + $0x610] sm:$0xff]  }
  0x94   : > { %3127 = vmatprep.subr.bf16.mxu1 %v3411_v31  ;;  %v3478_v31 = vld [vmem:[%s4186_s1 + $0x628] sm:$0xff]  }
  0x95   : > { %3106 = vmatpush3.bf16.msra.mxu0 %v3410_v30  ;;  %v3477_v30 = vld [vmem:[%s4186_s1 + $0x620] sm:$0xff]  }
  0x96   : > { %3107 = vmatprep.subr.bf16.mxu0 %v3413_v33  ;;  %v3480_v33 = vld [vmem:[%s4186_s1 + $0x638] sm:$0xff]  }
  0x97   : > { %3128 = vmatpush3.bf16.msra.mxu1 %v3412_v32  ;;  %v3479_v32 = vld [vmem:[%s4186_s1 + $0x630] sm:$0xff]  }
  0x98   : > { %3129 = vmatprep.subr.bf16.mxu1 %v3415_v35 }
  0x99   : > { %3108 = vmatpush3.bf16.msra.mxu0 %v3414_v34  ;;  %v3481_v34 = vld [vmem:[%s3629_s9 + $0x60] ss:$100 sps:$4 sm:$0xff]  }
  0x9a   : > { %3109 = vmatprep.subr.bf16.mxu0 %v3417_v37 }
  0x9b   : > { %3130 = vmatpush3.bf16.msra.mxu1 %v3416_v36  ;;  %v2691_v36 = vld [vmem:[%s4187_s2] ss:$0 sm:$0xff] }
  0x9c   : > { %3131 = vmatprep.subr.bf16.mxu1 %v3419_v39 }
  0x9d   : > { %3110 = vmatpush3.bf16.msra.mxu0 %v3418_v38 }
  0x9e   : > { %3111 = vmatprep.subr.bf16.mxu0 %v3421_v41 }
  0x9f   : > { %3132 = vmatpush3.bf16.msra.mxu1 %v3420_v40 }
  0xa0   : > { %3133 = vmatprep.subr.bf16.mxu1 %v3423_v43 }
  0xa1   : > { %3112 = vmatpush3.bf16.msra.mxu0 %v3422_v42 }
  0xa2   : > { %3113 = vmatprep.subr.bf16.mxu0 %v3425_v45 }
  0xa3   : > { %3134 = vmatpush3.bf16.msra.mxu1 %v3424_v44 }
  0xa4   : > { %3135 = vmatprep.subr.bf16.mxu1 %v3427_v47 }
  0xa5   : > { %3114 = vmatpush3.bf16.msra.mxu0 %v3426_v46 }
  0xa6   : > { %3143 = vmatprep.subr.bf16.mxu0 %v3432_v51 }
  0xa7   : > { %3136 = vmatpush3.bf16.msra.mxu1 %v3431_v50 }
  0xa8   : > { %2354 = vmatmul.mubr.bf16.vlgmr.msra.gmra.mrb[16].mxu0 %v3428_v48  ;;  %3165 = vmatprep.subr.bf16.mxu1 %v3437_v55 }
  0xa9   : > { %3144 = vmatpush3.bf16.msra.mxu0 %v3436_v54  ;;  %2435 = vmatprep.mubr.bf16.mxu0 %v3468_v21 }
  0xaa   : > { %2395 = vmatmul.mubr.bf16.vlgmr.msra.gmra.mrb[16].mxu1 %v3433_v52  ;;  %3145 = vmatprep.subr.bf16.mxu0 %v3439_v57 }
  0xab   : > { %3166 = vmatpush3.bf16.msra.mxu1 %v3438_v56  ;;  %2476 = vmatprep.mubr.bf16.mxu1 %v3472_v25 }
  0xac   : > { %3167 = vmatprep.subr.bf16.mxu1 %v3441_v59 }
  0xad   : > { %3146 = vmatpush3.bf16.msra.mxu0 %v3440_v58 }
  0xae   : > { %3147 = vmatprep.subr.bf16.mxu0 %v3443_v61 }
  0xaf   : > { %3168 = vmatpush3.bf16.msra.mxu1 %v3442_v60 }
  0xb0   : > { %3169 = vmatprep.subr.bf16.mxu1 %v3445_v63 }
  0xb1   : > { %3148 = vmatpush3.bf16.msra.mxu0 %v3444_v62 }
  0xb2   : > { %3149 = vmatprep.subr.bf16.mxu0 %v3447_v1 }
  0xb3   : > { %3170 = vmatpush3.bf16.msra.mxu1 %v3446_v0 }
  0xb4   : > { %3171 = vmatprep.subr.bf16.mxu1 %v3449_v3 }
  0xb5   : > { %3150 = vmatpush3.bf16.msra.mxu0 %v3448_v2 }
  0xb6   : > { %3151 = vmatprep.subr.bf16.mxu0 %v3451_v5  ;;  %v2529_v5 = vld [vmem:[%s4188_s3 + $0x8] sm:$0x3] }
  0xb7   : > { %3172 = vmatpush3.bf16.msra.mxu1 %v3450_v4  ;;  %v2528_v4 = vld [vmem:[%s4188_s3] sm:$0xff] }
  0xb8   : > { %3173 = vmatprep.subr.bf16.mxu1 %v3453_v7 }
  0xb9   : > { %3152 = vmatpush3.bf16.msra.mxu0 %v3452_v6  ;;  %v3227_v6 = vpack.c.bf16 %v2529_v5, %v2528_v4 }
  0xba   : > { %3153 = vmatprep.subr.bf16.mxu0 %v3455_v9 }
  0xbb   : > { %3174 = vmatpush3.bf16.msra.mxu1 %v3454_v8 }
  0xbc   : > { %3175 = vmatprep.subr.bf16.mxu1 %v3457_v11 }
  0xbd   : > { %3154 = vmatpush3.bf16.msra.mxu0 %v3456_v10 }
  0xbe   : > { %3155 = vmatprep.subr.bf16.mxu0 %v3459_v13 }
  0xbf   : > { %3176 = vmatpush3.bf16.msra.mxu1 %v3458_v12 }
  0xc0   : > { %3177 = vmatprep.subr.bf16.mxu1 %v3461_v15 }
  0xc1   : > { %3156 = vmatpush3.bf16.msra.mxu0 %v3460_v14 }
  0xc2   : > { %3157 = vmatprep.subr.bf16.mxu0 %v3463_v17 }
  0xc3   : > { %3178 = vmatpush3.bf16.msra.mxu1 %v3462_v16 }
  0xc4   : > { %3179 = vmatprep.subr.bf16.mxu1 %v3465_v19 }
  0xc5   : > { %3158 = vmatpush3.bf16.msra.mxu0 %v3464_v18 }
  0xc6   : > { %3200 = vmatprep.subr.bf16.mxu0 %v3490_v23 }
  0xc7   : > { %3180 = vmatpush3.bf16.msra.mxu1 %v3469_v22 }
  0xc8   : > { %2436 = vmatmul.mubr.bf16.vlgmr.msra.gmra.mrb[20].mxu0 %v3466_v20  ;;  %3229 = vmatprep.subr.msk.bf16.mxu1 %vm3228_vm3, %v3227_v6 }
  0xc9   : > { %3216 = vmatprep.mubr.msk.bf16.mxu0 %vm3491_vm0, %v3490_v23  ;;  %3201 = vmatpush3.bf16.msra.mxu0 %v3473_v26 }
  0xca   : > { %2477 = vmatmul.mubr.bf16.vlgmr.msra.gmra.mrb[20].mxu1 %v3470_v24  ;;  %3202 = vmatprep.subr.bf16.mxu0 %v3490_v23 }
  0xcb   : > { %3232 = vmatpush3.bf16.msk.msra.mxu1 %vm3228_vm3, %v3227_v6 }
  0xcd   : > { %3203 = vmatpush3.bf16.msra.mxu0 %v3474_v27 }
  0xce   : > { %3204 = vmatprep.subr.bf16.mxu0 %v3490_v23 }
  0xd1   : > { %3205 = vmatpush3.bf16.msra.mxu0 %v3475_v28 }
  0xd2   : > { %3206 = vmatprep.subr.bf16.mxu0 %v3490_v23 }
  0xd5   : > { %3207 = vmatpush3.bf16.msra.mxu0 %v3476_v29 }
  0xd6   : > { %3208 = vmatprep.subr.bf16.mxu0 %v3490_v23 }
  0xd9   : > { %3209 = vmatpush3.bf16.msra.mxu0 %v3477_v30 }
  0xda   : > { %3210 = vmatprep.subr.bf16.mxu0 %v3490_v23 }
  0xdd   : > { %3211 = vmatpush3.bf16.msra.mxu0 %v3478_v31 }
  0xde   : > { %3212 = vmatprep.subr.bf16.mxu0 %v3490_v23 }
  0xe1   : > { %3213 = vmatpush3.bf16.msra.mxu0 %v3479_v32 }
  0xe2   : > { %3214 = vmatprep.subr.bf16.mxu0 %v3490_v23 }
  0xe5   : > { %3215 = vmatpush3.bf16.msra.mxu0 %v3480_v33 }
  0xe8   : > { %3217 = vmatmul.mubr.bf16.vlgmr.msra.gmra.mrb[24].mxu0 %v3481_v34 }
  0xfb   : > { %v2939_v35 = vpop.f32.mrb[0].mxu0 }
  0xfc   : > { %v2940_v37 = vpop.f32.mrb[1].mxu0 }
  0xfd   : > { %v2941_v38 = vadd.f32 %v2940_v37, %v2939_v35  ;;  %v2942_v39 = vpop.f32.mrb[2].mxu0  ;;  %v2961_v40 = vpop.f32.mrb[0].mxu1 }
  0xfe   : > { %v2943_v41 = vpop.f32.mrb[3].mxu0  ;;  %v2962_v44 = vpop.f32.mrb[1].mxu1 }
  0xff   : > { %v2028_v42 = vadd.f32 %v2941_v38, %v2691_v36  ;;  %v2944_v43 = vadd.f32 %v2943_v41, %v2942_v39  ;;  %v2963_v45 = vadd.f32 %v2962_v44, %v2961_v40  ;;  %v2964_v46 = vpop.f32.mrb[2].mxu1 }
 0x100   : > { %v2965_v48 = vpop.f32.mrb[3].mxu1 }
 0x101   : > { %v2031_v47 = vadd.f32 %v2944_v43, %v2691_v36  ;;  %v2069_v49 = vadd.f32 %v2963_v45, %v2028_v42  ;;  %v2966_v50 = vadd.f32 %v2965_v48, %v2964_v46 }
 0x103   : > { %v2072_v51 = vadd.f32 %v2966_v50, %v2031_v47 }
 0x11b   : > { %v2983_v52 = vpop.f32.mrb[4].mxu0 }
 0x11c   : > { %v2984_v53 = vpop.f32.mrb[5].mxu0 }
 0x11d   : > { %v2985_v54 = vadd.f32 %v2984_v53, %v2983_v52  ;;  %v2986_v55 = vpop.f32.mrb[6].mxu0  ;;  %v3005_v58 = vpop.f32.mrb[4].mxu1 }
 0x11e   : > { %v2987_v56 = vpop.f32.mrb[7].mxu0  ;;  %v3006_v60 = vpop.f32.mrb[5].mxu1 }
 0x11f   : > { %v2110_v57 = vadd.f32 %v2985_v54, %v2069_v49  ;;  %v2988_v59 = vadd.f32 %v2987_v56, %v2986_v55  ;;  %v3007_v62 = vadd.f32 %v3006_v60, %v3005_v58  ;;  %v3008_v63 = vpop.f32.mrb[6].mxu1 }
 0x120   : > { %v3009_v0 = vpop.f32.mrb[7].mxu1 }
 0x121   : > { %v2113_v61 = vadd.f32 %v2988_v59, %v2072_v51  ;;  %v2151_v1 = vadd.f32 %v3007_v62, %v2110_v57  ;;  %v3010_v2 = vadd.f32 %v3009_v0, %v3008_v63 }
 0x123   : > { %v2154_v3 = vadd.f32 %v3010_v2, %v2113_v61 }
 0x13b   : > { %v3027_v7 = vpop.f32.mrb[8].mxu0 }
 0x13c   : > { %v3028_v8 = vpop.f32.mrb[9].mxu0 }
 0x13d   : > { %v3029_v9 = vadd.f32 %v3028_v8, %v3027_v7  ;;  %v3030_v10 = vpop.f32.mrb[10].mxu0  ;;  %v3049_v11 = vpop.f32.mrb[8].mxu1 }
 0x13e   : > { %v3031_v12 = vpop.f32.mrb[11].mxu0  ;;  %v3050_v15 = vpop.f32.mrb[9].mxu1 }
 0x13f   : > { %v2192_v13 = vadd.f32 %v3029_v9, %v2151_v1  ;;  %v3032_v14 = vadd.f32 %v3031_v12, %v3030_v10  ;;  %v3051_v16 = vadd.f32 %v3050_v15, %v3049_v11  ;;  %v3052_v17 = vpop.f32.mrb[10].mxu1  ;;  %v2917_v15 = vld [vmem:[#allocation2] ss:$0 sm:$0xff] }
 0x140   : > { %v3053_v19 = vpop.f32.mrb[11].mxu1 }
 0x141   : > { %v2195_v18 = vadd.f32 %v3032_v14, %v2154_v3  ;;  %v2233_v20 = vadd.f32 %v3051_v16, %v2192_v13  ;;  %v3054_v21 = vadd.f32 %v3053_v19, %v3052_v17 }
 0x143   : > { %v2236_v22 = vadd.f32 %v3054_v21, %v2195_v18 }
 0x15b   : > { %v3071_v23 = vpop.f32.mrb[12].mxu0 }
 0x15c   : > { %v3072_v24 = vpop.f32.mrb[13].mxu0 }
 0x15d   : > { %v3073_v25 = vadd.f32 %v3072_v24, %v3071_v23  ;;  %v3074_v26 = vpop.f32.mrb[14].mxu0  ;;  %v3093_v27 = vpop.f32.mrb[12].mxu1 }
 0x15e   : > { %v3075_v28 = vpop.f32.mrb[15].mxu0  ;;  %v3094_v31 = vpop.f32.mrb[13].mxu1 }
 0x15f   : > { %v2274_v29 = vadd.f32 %v3073_v25, %v2233_v20  ;;  %v3076_v30 = vadd.f32 %v3075_v28, %v3074_v26  ;;  %v3095_v32 = vadd.f32 %v3094_v31, %v3093_v27  ;;  %v3096_v33 = vpop.f32.mrb[14].mxu1 }
 0x160   : > { %v3097_v35 = vpop.f32.mrb[15].mxu1 }
 0x161   : > { %v2277_v34 = vadd.f32 %v3076_v30, %v2236_v22  ;;  %v2315_v36 = vadd.f32 %v3095_v32, %v2274_v29  ;;  %v3098_v37 = vadd.f32 %v3097_v35, %v3096_v33 }
 0x163   : > { %v2318_v38 = vadd.f32 %v3098_v37, %v2277_v34 }
 0x17b   : > { %v3115_v39 = vpop.f32.mrb[16].mxu0 }
 0x17c   : > { %v3116_v40 = vpop.f32.mrb[17].mxu0 }
 0x17d   : > { %v3117_v41 = vadd.f32 %v3116_v40, %v3115_v39  ;;  %v3118_v42 = vpop.f32.mrb[18].mxu0  ;;  %v3137_v45 = vpop.f32.mrb[16].mxu1 }
 0x17e   : > { %v3119_v43 = vpop.f32.mrb[19].mxu0  ;;  %v3138_v47 = vpop.f32.mrb[17].mxu1 }
 0x17f   : > { %v2356_v44 = vadd.f32 %v3117_v41, %v2315_v36  ;;  %v3120_v46 = vadd.f32 %v3119_v43, %v3118_v42  ;;  %v3139_v49 = vadd.f32 %v3138_v47, %v3137_v45  ;;  %v3140_v50 = vpop.f32.mrb[18].mxu1 }
 0x180   : > { %v3141_v51 = vpop.f32.mrb[19].mxu1 }
 0x181   : > { %v2359_v48 = vadd.f32 %v3120_v46, %v2318_v38  ;;  %v2397_v52 = vadd.f32 %v3139_v49, %v2356_v44  ;;  %v3142_v53 = vadd.f32 %v3141_v51, %v3140_v50 }
 0x183   : > { %v2400_v54 = vadd.f32 %v3142_v53, %v2359_v48 }
 0x19b   : > { %v3159_v55 = vpop.f32.mrb[20].mxu0 }
 0x19c   : > { %v3160_v56 = vpop.f32.mrb[21].mxu0 }
 0x19d   : > { %v3161_v57 = vadd.f32 %v3160_v56, %v3159_v55  ;;  %v3162_v58 = vpop.f32.mrb[22].mxu0  ;;  %v3181_v59 = vpop.f32.mrb[20].mxu1 }
 0x19e   : > { %v3163_v60 = vpop.f32.mrb[23].mxu0  ;;  %v3182_v63 = vpop.f32.mrb[21].mxu1 }
 0x19f   : > { %v2438_v61 = vadd.f32 %v3161_v57, %v2397_v52  ;;  %v3164_v62 = vadd.f32 %v3163_v60, %v3162_v58  ;;  %v3183_v0 = vadd.f32 %v3182_v63, %v3181_v59  ;;  %v3184_v1 = vpop.f32.mrb[22].mxu1 }
 0x1a0   : > { %v3185_v3 = vpop.f32.mrb[23].mxu1 }
 0x1a1   : > { %v2441_v2 = vadd.f32 %v3164_v62, %v2400_v54  ;;  %v3186_v4 = vadd.f32 %v3185_v3, %v3184_v1  ;;  %v2479_v5 = vadd.f32 %v3183_v0, %v2438_v61 }
 0x1a3   : > { %v2482_v6 = vadd.f32 %v3186_v4, %v2441_v2 }
 0x1bb   : > { %v2519_v7 = vpop.f32.mrb[24].mxu0 }
 0x1bc   : > { %v2520_v8 = vadd.f32 %v2519_v7, %v2479_v5  ;;  %v3218_v9 = vpop.f32.mrb[25].mxu0 }
 0x1bd   : > { %v2522_v10 = vpop.f32.mrb[26].mxu0 }
 0x1be   : > { %v2526_v11 = vmax.f32 %v2520_v8, 0.0  ;;  %v2523_v12 = vadd.f32 %v2522_v10, %v2482_v6  ;;  %v3219_v13 = vpop.f32.mrb[27].mxu0 }
 0x1c0   : > { %v2527_v14 = vmax.f32 %v2523_v12, 0.0  ;;  %3224 = vmatprep.mubr.msk.f32.mxu1 %vm2537_vm4, %v2526_v11 }
 0x1c2   : > { %3225 = vmatmul.mubr.msk.f32.vlgmr.msra.gmra.mrb[24].mxu1 %vm2537_vm4, %v2527_v14 }
 0x295   : > { %v3226_v16 = vpop.f32.mrb[24].mxu1 }
 0x296   : > { %v2614_v17 = vpop.f32.mrb[25].mxu1  ;;  %v2620_v19 = vadd.f32 %v3226_v16, %v2917_v15 }
 0x297   : > { %v2615_v18 = vadd.f32 %v2917_v15, %v2614_v17 }
 0x298   : > { %2625 = vst.msk [vmem:[%s231_s15 + $0x8] sm:$0xff] %vm2623_vm5, %v2620_v19 }
 0x299   : > { %2624 = vst.msk [vmem:[%s231_s15] sm:$0xff] %vm2623_vm5, %v2615_v18 }
 0x29a PF: > { %s17_s20 = sadd.s32 1, %s3488_s20  }
 0x29b   : > { %p14_p4 = scmp.ge.s32.totalorder %s17_s20, 4  }
 0x29d   :  { %16 = sbr.rel (!%p14_p4) target bundleno = 3 (0x3), region = 70 }

</bundles_post_ra>
